<compile_context>
chip_gen: v7x
topology: tpu7x:2x2x1
jax: 0.10.0
libtpu: 0.0.40
codegen_flags: <defaults>
</compile_context>

<pallas_src>
import numpy as np
import jax
import jax.numpy as jnp
from jax import lax
from jax.experimental import pallas as pl
from jax.experimental.pallas import tpu as pltpu

CIN, COUT = 4, 8
H = W = 16
HW = H * W
HO = WO = 8            # spatial size after stride-2 pool / skip conv
HOWO = HO * WO
BN_EPS = 1e-5

PAD = 16               # sublane-aligned vertical halo inside stencil scratch
PADROWS = HW + 2 * PAD # 288 rows (multiple of 8)
NEG = -3.0e38          # finite "-inf" for max-pool padding (center tap inits)

LSH = 1                # roll amount giving x[i-1]  (left / col j-1 tap)
RSH = HW - 1           # roll amount giving x[i+1]  (right / col j+1 tap)


def _build_downsample():
    """One-hot (HOWO, HW) matrix selecting pixels (2o, 2p)."""
    d = np.zeros((HOWO, HW), np.float32)
    for o in range(HO):
        for p in range(WO):
            d[o * WO + p, (2 * o) * W + 2 * p] = 1.0
    return jnp.asarray(d)


def block_kernel(x_ref, ds_ref,
                 dw1_ref, pw1_ref, bn1s_ref, bn1b_ref,
                 dw2_ref, pw2_ref, bn2s_ref, bn2b_ref,
                 skw_ref, bnss_ref, bnsb_ref,
                 out_ref, pad_a_ref, pad_b_ref, pad_c_ref):
    x = x_ref[0]                                     # (HW, Lin)
    lin = pad_a_ref.shape[1]
    lout = pad_b_ref.shape[1]

    # Column index of every flattened spatial row; masks hoisted to full lane
    # width once (JAX does not CSE broadcast_in_dim inside the unrolled taps).
    col = jnp.bitwise_and(
        lax.broadcasted_iota(jnp.int32, (HW, 1), 0), W - 1)
    ml_in = jnp.broadcast_to(col >= 1, (HW, lin))
    mr_in = jnp.broadcast_to(col <= W - 2, (HW, lin))
    ml_out = jnp.broadcast_to(col >= 1, (HW, lout))
    mr_out = jnp.broadcast_to(col <= W - 2, (HW, lout))

    # Refresh only the halo rows (interior is fully overwritten below).  Done
    # every step (tiny: 6 stores of (PAD, L)) so the kernel stays correct when
    # the parallel grid axis is split across TensorCores.
    zin = jnp.zeros((PAD, lin), jnp.float32)
    zout = jnp.zeros((PAD, lout), jnp.float32)
    nout = jnp.full((PAD, lout), NEG, jnp.float32)
    pad_a_ref[pl.ds(0, PAD), :] = zin
    pad_a_ref[pl.ds(PAD + HW, PAD), :] = zin
    pad_b_ref[pl.ds(0, PAD), :] = zout
    pad_b_ref[pl.ds(PAD + HW, PAD), :] = zout
    pad_c_ref[pl.ds(0, PAD), :] = nout
    pad_c_ref[pl.ds(PAD + HW, PAD), :] = nout

    def dw3x3(inp, pad_ref, dw_ref, ml, mr):
        """Depthwise 3x3, pad=1, stride=1 on lane-packed (HW, L) data.

        Vertical taps come from two sublane-aligned slab loads of a
        zero-halo scratch (center row is the value itself); the +/-1 column
        taps are pltpu.roll of the slab with the wrapped element masked.
        """
        pad_ref[pl.ds(PAD, HW), :] = inp
        up = pad_ref[pl.ds(PAD - W, HW), :]          # aligned (PAD-W = 0)
        dn = pad_ref[pl.ds(PAD + W, HW), :]          # aligned (PAD+W = 32)
        acc = None
        for di, slab in ((1, inp), (0, up), (2, dn)):
            left = jnp.where(ml, pltpu.roll(slab, LSH, 0), 0.0)
            right = jnp.where(mr, pltpu.roll(slab, RSH, 0), 0.0)
            c = (slab * dw_ref[3 * di + 1]
                 + left * dw_ref[3 * di]
                 + right * dw_ref[3 * di + 2])
            acc = c if acc is None else acc + c
        return acc

    # ---- rep path: ReLU -> SepConv(CIN->COUT) -> BN -> ReLU -> SepConv -> BN
    h = jnp.maximum(x, 0.0)                          # start_with_relu
    h = dw3x3(h, pad_a_ref, dw1_ref, ml_in, mr_in)
    h = jnp.dot(h, pw1_ref[...], preferred_element_type=jnp.float32)
    h = h * bn1s_ref[...] + bn1b_ref[...]

    h = jnp.maximum(h, 0.0)
    h = dw3x3(h, pad_b_ref, dw2_ref, ml_out, mr_out)
    h = jnp.dot(h, pw2_ref[...], preferred_element_type=jnp.float32)
    h = h * bn2s_ref[...] + bn2b_ref[...]

    # ---- MaxPool2d(3, stride=2, padding=1): full-res 3x3 max (center-tap
    # init, NEG-halo scratch), stride-2 grid selected by the one-hot matmul.
    pad_c_ref[pl.ds(PAD, HW), :] = h
    up = pad_c_ref[pl.ds(PAD - W, HW), :]
    dn = pad_c_ref[pl.ds(PAD + W, HW), :]
    m = h                                            # center tap, always valid
    for slab in (h, up, dn):
        m = jnp.maximum(m, jnp.where(ml_out, pltpu.roll(slab, LSH, 0), NEG))
        m = jnp.maximum(m, jnp.where(mr_out, pltpu.roll(slab, RSH, 0), NEG))
    m = jnp.maximum(m, up)
    m = jnp.maximum(m, dn)

    # ---- fused stride-2 subsample (pool output + skip input in one MXU pass)
    both = jnp.dot(ds_ref[...], jnp.concatenate([m, x], axis=1),
                   preferred_element_type=jnp.float32)   # (HOWO, Lout+Lin)
    pooled = both[:, :lout]
    xs = both[:, lout:]

    # ---- skip path: Conv2d(CIN->COUT, 1, stride=2, bias=False) + BN ----
    sk = jnp.dot(xs, skw_ref[...], preferred_element_type=jnp.float32)
    sk = sk * bnss_ref[...] + bnsb_ref[...]

    out_ref[0] = (pooled + sk).astype(out_ref.dtype)     # residual add


def init_params(key):
    ks = jax.random.split(key, 8)

    def bn_fold(k, c):
        k1, k2, k3, k4 = jax.random.split(k, 4)
        gamma = 1.0 + 0.1 * jax.random.normal(k1, (c,), jnp.float32)
        beta = 0.1 * jax.random.normal(k2, (c,), jnp.float32)
        mean = 0.1 * jax.random.normal(k3, (c,), jnp.float32)
        var = 1.0 + 0.1 * jnp.abs(jax.random.normal(k4, (c,), jnp.float32))
        # TODO(synk): PyTorch BatchNorm2d in train mode uses batch statistics;
        # we implement eval-mode semantics (running stats folded to scale/shift).
        scale = gamma / jnp.sqrt(var + BN_EPS)
        shift = beta - mean * scale
        return scale, shift

    dw1 = 0.2 * jax.random.normal(ks[0], (3, 3, CIN), jnp.float32)
    pw1 = 0.3 * jax.random.normal(ks[1], (CIN, COUT), jnp.float32)
    dw2 = 0.2 * jax.random.normal(ks[2], (3, 3, COUT), jnp.float32)
    pw2 = 0.3 * jax.random.normal(ks[3], (COUT, COUT), jnp.float32)
    skw = 0.3 * jax.random.normal(ks[4], (CIN, COUT), jnp.float32)
    s1, b1 = bn_fold(ks[5], COUT)
    s2, b2 = bn_fold(ks[6], COUT)
    ss, sb = bn_fold(ks[7], COUT)

    return dict(
        raw=dict(dw1=dw1, pw1=pw1, dw2=dw2, pw2=pw2, skw=skw,
                 s1=s1, b1=b1, s2=s2, b2=b2, ss=ss, sb=sb),
        downsample=_build_downsample(),
    )


def _plan_batch(n):
    """Pad N to a multiple of 32; B=32 lane-pack unless that would leave a
    single grid step, in which case B=16 so both v7x TensorCores get work."""
    n_pad = -(-n // 32) * 32
    if n_pad // 32 >= 2:
        return n_pad, 32
    return n_pad, 16


def xception_block(x_nchw, params):
    N = x_nchw.shape[0]
    n_pad, B = _plan_batch(N)
    if n_pad != N:
        x_nchw = jnp.pad(x_nchw, ((0, n_pad - N), (0, 0), (0, 0), (0, 0)))
    NB = n_pad // B
    Lin, Lout = B * CIN, B * COUT

    # NCHW -> lane-packed (NB, HW, B*CIN): row = i*W+j, lane = b*CIN + c
    xp = jnp.transpose(x_nchw.reshape(NB, B, CIN, H, W), (0, 3, 4, 1, 2))
    xp = xp.reshape(NB, HW, Lin)

    r = params["raw"]
    eye = jnp.eye(B, dtype=jnp.float32)
    bd = lambda w: jnp.kron(eye, w)                               # block-diag pointwise
    row = lambda v: jnp.tile(v, (B,)).reshape(1, -1)              # per-lane BN row
    dwp = lambda w: jnp.tile(w.reshape(9, -1), (1, B)).reshape(9, 1, -1)

    ins = [xp, params["downsample"],
           dwp(r["dw1"]), bd(r["pw1"]), row(r["s1"]), row(r["b1"]),
           dwp(r["dw2"]), bd(r["pw2"]), row(r["s2"]), row(r["b2"]),
           bd(r["skw"]), row(r["ss"]), row(r["sb"])]

    def const_spec(a):
        return pl.BlockSpec(a.shape, lambda b, _n=a.ndim: (0,) * _n)

    in_specs = ([pl.BlockSpec((1, HW, Lin), lambda b: (b, 0, 0))]
                + [const_spec(a) for a in ins[1:]])

    out_flat = pl.pallas_call(
        block_kernel,
        out_shape=jax.ShapeDtypeStruct((NB, HOWO, Lout), jnp.float32),
        grid_spec=pltpu.PrefetchScalarGridSpec(
            num_scalar_prefetch=0,
            grid=(NB,),
            in_specs=in_specs,
            out_specs=pl.BlockSpec((1, HOWO, Lout), lambda b: (b, 0, 0)),
            scratch_shapes=[pltpu.VMEM((PADROWS, Lin), jnp.float32),
                            pltpu.VMEM((PADROWS, Lout), jnp.float32),
                            pltpu.VMEM((PADROWS, Lout), jnp.float32)],
        ),
        compiler_params=pltpu.CompilerParams(
            dimension_semantics=("parallel",)),
    )(*ins)

    # unpack lanes -> NCHW, drop batch padding
    y = out_flat.reshape(NB, HO, WO, B, COUT)
    y = jnp.transpose(y, (0, 3, 4, 1, 2)).reshape(n_pad, COUT, HO, WO)
    return y[:N]


def reference(x_nchw, params):
    """Pure-JAX NCHW reference of Block.forward (eval-mode BN)."""
    r = params["raw"]

    def depthwise(x, w33c):  # w: (3,3,C)
        c = x.shape[1]
        rhs = jnp.transpose(w33c, (2, 0, 1))[:, None, :, :]       # (C,1,3,3)
        return lax.conv_general_dilated(
            x, rhs, (1, 1), ((1, 1), (1, 1)),
            dimension_numbers=("NCHW", "OIHW", "NCHW"),
            feature_group_count=c)

    def pointwise(x, w, stride=1):
        rhs = jnp.transpose(w)[:, :, None, None]                  # (Cout,Cin,1,1)
        return lax.conv_general_dilated(
            x, rhs, (stride, stride), ((0, 0), (0, 0)),
            dimension_numbers=("NCHW", "OIHW", "NCHW"))

    def bn(x, s, b):
        return x * s[None, :, None, None] + b[None, :, None, None]

    h = jnp.maximum(x_nchw, 0.0)
    h = bn(pointwise(depthwise(h, r["dw1"]), r["pw1"]), r["s1"], r["b1"])
    h = jnp.maximum(h, 0.0)
    h = bn(pointwise(depthwise(h, r["dw2"]), r["pw2"]), r["s2"], r["b2"])
    h = lax.reduce_window(h, -jnp.inf, lax.max, (1, 1, 3, 3), (1, 1, 2, 2),
                          ((0, 0), (0, 0), (1, 1), (1, 1)))
    skip = bn(pointwise(x_nchw, r["skw"], stride=2), r["ss"], r["sb"])
    return h + skip


if __name__ == "__main__":
    key = jax.random.PRNGKey(0)
    kx, kp = jax.random.split(key)
    x = jax.random.normal(kx, (2, CIN, H, W), jnp.float32)   # NCHW, like PyTorch
    params = init_params(kp)

    out = xception_block(x, params)
    jax.block_until_ready(out)

    ref = reference(x, params)
    np.testing.assert_allclose(np.asarray(out), np.asarray(ref),
                               rtol=2e-2, atol=2e-2)
    print("KERNEL_OK")
</pallas_src>

<mosaic_0001>
module attributes {stable_mosaic.version = 11 : i64} {
  func.func @block_kernel(%arg0: i32, %arg1: memref<1x256x64xf32, #tpu.memory_space<vmem>>, %arg2: memref<64x256xf32, #tpu.memory_space<vmem>>, %arg3: memref<9x1x64xf32, #tpu.memory_space<vmem>>, %arg4: memref<64x128xf32, #tpu.memory_space<vmem>>, %arg5: memref<1x128xf32, #tpu.memory_space<vmem>>, %arg6: memref<1x128xf32, #tpu.memory_space<vmem>>, %arg7: memref<9x1x128xf32, #tpu.memory_space<vmem>>, %arg8: memref<128x128xf32, #tpu.memory_space<vmem>>, %arg9: memref<1x128xf32, #tpu.memory_space<vmem>>, %arg10: memref<1x128xf32, #tpu.memory_space<vmem>>, %arg11: memref<64x128xf32, #tpu.memory_space<vmem>>, %arg12: memref<1x128xf32, #tpu.memory_space<vmem>>, %arg13: memref<1x128xf32, #tpu.memory_space<vmem>>, %arg14: memref<1x64x128xf32, #tpu.memory_space<vmem>>, %arg15: memref<288x64xf32, #tpu.memory_space<vmem>>, %arg16: memref<288x128xf32, #tpu.memory_space<vmem>>, %arg17: memref<288x128xf32, #tpu.memory_space<vmem>>) attributes {dimension_semantics = [#tpu.dimension_semantics<parallel>], iteration_bounds = array<i64: 2>, scalar_prefetch = 0 : i64, scratch_operands = 3 : i64, tpu.core_type = #tpu.core_type<tc>, window_params = [{transform_indices = @transform_0, window_bounds = array<i64: 1, 256, 64>}, {pipeline_mode = #tpu.pipeline_mode<synchronous>, transform_indices = @transform_1, window_bounds = array<i64: 64, 256>}, {pipeline_mode = #tpu.pipeline_mode<synchronous>, transform_indices = @transform_2, window_bounds = array<i64: 9, 1, 64>}, {pipeline_mode = #tpu.pipeline_mode<synchronous>, transform_indices = @transform_3, window_bounds = array<i64: 64, 128>}, {pipeline_mode = #tpu.pipeline_mode<synchronous>, transform_indices = @transform_4, window_bounds = array<i64: 1, 128>}, {pipeline_mode = #tpu.pipeline_mode<synchronous>, transform_indices = @transform_5, window_bounds = array<i64: 1, 128>}, {pipeline_mode = #tpu.pipeline_mode<synchronous>, transform_indices = @transform_6, window_bounds = array<i64: 9, 1, 128>}, {pipeline_mode = #tpu.pipeline_mode<synchronous>, transform_indices = @transform_7, window_bounds = array<i64: 128, 128>}, {pipeline_mode = #tpu.pipeline_mode<synchronous>, transform_indices = @transform_8, window_bounds = array<i64: 1, 128>}, {pipeline_mode = #tpu.pipeline_mode<synchronous>, transform_indices = @transform_9, window_bounds = array<i64: 1, 128>}, {pipeline_mode = #tpu.pipeline_mode<synchronous>, transform_indices = @transform_10, window_bounds = array<i64: 64, 128>}, {pipeline_mode = #tpu.pipeline_mode<synchronous>, transform_indices = @transform_11, window_bounds = array<i64: 1, 128>}, {pipeline_mode = #tpu.pipeline_mode<synchronous>, transform_indices = @transform_12, window_bounds = array<i64: 1, 128>}, {transform_indices = @transform_13, window_bounds = array<i64: 1, 64, 128>}]} {
    %c0 = arith.constant 0 : index
    %c0_0 = arith.constant 0 : index
    %c0_1 = arith.constant 0 : index
    %0 = vector.load %arg1[%c0, %c0_0, %c0_1] : memref<1x256x64xf32, #tpu.memory_space<vmem>>, vector<1x256x64xf32>
    %1 = vector.shape_cast %0 : vector<1x256x64xf32> to vector<256x64xf32>
    %2 = tpu.iota {dimensions = array<i32: 0>} : vector<256x1xi32>
    %c15_i32 = arith.constant 15 : i32
    %3 = vector.broadcast %c15_i32 : i32 to vector<256x1xi32>
    %4 = arith.andi %2, %3 : vector<256x1xi32>
    %c1_i32 = arith.constant 1 : i32
    %5 = vector.broadcast %c1_i32 : i32 to vector<256x1xi32>
    %6 = arith.cmpi sge, %4, %5 : vector<256x1xi32>
    %7 = vector.shape_cast %6 : vector<256x1xi1> to vector<256x1xi1>
    %8 = vector.broadcast %7 : vector<256x1xi1> to vector<256x64xi1>
    %c14_i32 = arith.constant 14 : i32
    %9 = vector.broadcast %c14_i32 : i32 to vector<256x1xi32>
    %10 = arith.cmpi sle, %4, %9 : vector<256x1xi32>
    %11 = vector.shape_cast %10 : vector<256x1xi1> to vector<256x1xi1>
    %12 = vector.broadcast %11 : vector<256x1xi1> to vector<256x64xi1>
    %c1_i32_2 = arith.constant 1 : i32
    %13 = vector.broadcast %c1_i32_2 : i32 to vector<256x1xi32>
    %14 = arith.cmpi sge, %4, %13 : vector<256x1xi32>
    %15 = vector.shape_cast %14 : vector<256x1xi1> to vector<256x1xi1>
    %16 = vector.broadcast %15 : vector<256x1xi1> to vector<256x128xi1>
    %c14_i32_3 = arith.constant 14 : i32
    %17 = vector.broadcast %c14_i32_3 : i32 to vector<256x1xi32>
    %18 = arith.cmpi sle, %4, %17 : vector<256x1xi32>
    %19 = vector.shape_cast %18 : vector<256x1xi1> to vector<256x1xi1>
    %20 = vector.broadcast %19 : vector<256x1xi1> to vector<256x128xi1>
    %cst = arith.constant 0.000000e+00 : f32
    %21 = vector.broadcast %cst : f32 to vector<16x64xf32>
    %cst_4 = arith.constant 0.000000e+00 : f32
    %22 = vector.broadcast %cst_4 : f32 to vector<16x128xf32>
    %cst_5 = arith.constant -3.000000e+38 : f32
    %23 = vector.broadcast %cst_5 : f32 to vector<16x128xf32>
    %c0_6 = arith.constant 0 : index
    %c0_7 = arith.constant 0 : index
    %24 = vector.load %arg15[%c0_6, %c0_7] : memref<288x64xf32, #tpu.memory_space<vmem>>, vector<16x64xf32>
    tpu.vector_store %arg15[%c0_6, %c0_7], %21 {strides = array<i32>} : memref<288x64xf32, #tpu.memory_space<vmem>>, vector<16x64xf32>,
    %c272 = arith.constant 272 : index
    %c0_8 = arith.constant 0 : index
    %25 = vector.load %arg15[%c272, %c0_8] : memref<288x64xf32, #tpu.memory_space<vmem>>, vector<16x64xf32>
    tpu.vector_store %arg15[%c272, %c0_8], %21 {strides = array<i32>} : memref<288x64xf32, #tpu.memory_space<vmem>>, vector<16x64xf32>,
    %c0_9 = arith.constant 0 : index
    %c0_10 = arith.constant 0 : index
    %26 = vector.load %arg16[%c0_9, %c0_10] : memref<288x128xf32, #tpu.memory_space<vmem>>, vector<16x128xf32>
    tpu.vector_store %arg16[%c0_9, %c0_10], %22 {strides = array<i32>} : memref<288x128xf32, #tpu.memory_space<vmem>>, vector<16x128xf32>,
    %c272_11 = arith.constant 272 : index
    %c0_12 = arith.constant 0 : index
    %27 = vector.load %arg16[%c272_11, %c0_12] : memref<288x128xf32, #tpu.memory_space<vmem>>, vector<16x128xf32>
    tpu.vector_store %arg16[%c272_11, %c0_12], %22 {strides = array<i32>} : memref<288x128xf32, #tpu.memory_space<vmem>>, vector<16x128xf32>,
    %c0_13 = arith.constant 0 : index
    %c0_14 = arith.constant 0 : index
    %28 = vector.load %arg17[%c0_13, %c0_14] : memref<288x128xf32, #tpu.memory_space<vmem>>, vector<16x128xf32>
    tpu.vector_store %arg17[%c0_13, %c0_14], %23 {strides = array<i32>} : memref<288x128xf32, #tpu.memory_space<vmem>>, vector<16x128xf32>,
    %c272_15 = arith.constant 272 : index
    %c0_16 = arith.constant 0 : index
    %29 = vector.load %arg17[%c272_15, %c0_16] : memref<288x128xf32, #tpu.memory_space<vmem>>, vector<16x128xf32>
    tpu.vector_store %arg17[%c272_15, %c0_16], %23 {strides = array<i32>} : memref<288x128xf32, #tpu.memory_space<vmem>>, vector<16x128xf32>,
    %cst_17 = arith.constant 0.000000e+00 : f32
    %30 = vector.broadcast %cst_17 : f32 to vector<256x64xf32>
    %31 = arith.maximumf %1, %30 : vector<256x64xf32>
    %c16 = arith.constant 16 : index
    %c0_18 = arith.constant 0 : index
    %32 = vector.load %arg15[%c16, %c0_18] : memref<288x64xf32, #tpu.memory_space<vmem>>, vector<256x64xf32>
    tpu.vector_store %arg15[%c16, %c0_18], %31 {strides = array<i32>} : memref<288x64xf32, #tpu.memory_space<vmem>>, vector<256x64xf32>,
    %c0_19 = arith.constant 0 : index
    %c0_20 = arith.constant 0 : index
    %33 = vector.load %arg15[%c0_19, %c0_20] : memref<288x64xf32, #tpu.memory_space<vmem>>, vector<256x64xf32>
    %c32 = arith.constant 32 : index
    %c0_21 = arith.constant 0 : index
    %34 = vector.load %arg15[%c32, %c0_21] : memref<288x64xf32, #tpu.memory_space<vmem>>, vector<256x64xf32>
    %c1_i32_22 = arith.constant 1 : i32
    %35 = tpu.dynamic_rotate %31 by %c1_i32_22 dim 0 : vector<256x64xf32>, i32 -> vector<256x64xf32>
    %cst_23 = arith.constant 0.000000e+00 : f32
    %36 = vector.broadcast %cst_23 : f32 to vector<256x64xf32>
    %37 = arith.select %8, %35, %36 : vector<256x64xi1>, vector<256x64xf32>
    %c255_i32 = arith.constant 255 : i32
    %38 = tpu.dynamic_rotate %31 by %c255_i32 dim 0 : vector<256x64xf32>, i32 -> vector<256x64xf32>
    %cst_24 = arith.constant 0.000000e+00 : f32
    %39 = vector.broadcast %cst_24 : f32 to vector<256x64xf32>
    %40 = arith.select %12, %38, %39 : vector<256x64xi1>, vector<256x64xf32>
    %c4 = arith.constant 4 : index
    %c0_25 = arith.constant 0 : index
    %c0_26 = arith.constant 0 : index
    %41 = vector.load %arg3[%c4, %c0_25, %c0_26] : memref<9x1x64xf32, #tpu.memory_space<vmem>>, vector<1x1x64xf32>
    %42 = vector.shape_cast %41 : vector<1x1x64xf32> to vector<1x64xf32>
    %43 = vector.broadcast %42 : vector<1x64xf32> to vector<256x64xf32>
    %44 = arith.mulf %31, %43 : vector<256x64xf32>
    %c3 = arith.constant 3 : index
    %c0_27 = arith.constant 0 : index
    %c0_28 = arith.constant 0 : index
    %45 = vector.load %arg3[%c3, %c0_27, %c0_28] : memref<9x1x64xf32, #tpu.memory_space<vmem>>, vector<1x1x64xf32>
    %46 = vector.shape_cast %45 : vector<1x1x64xf32> to vector<1x64xf32>
    %47 = vector.broadcast %46 : vector<1x64xf32> to vector<256x64xf32>
    %48 = arith.mulf %37, %47 : vector<256x64xf32>
    %49 = arith.addf %44, %48 : vector<256x64xf32>
    %c5 = arith.constant 5 : index
    %c0_29 = arith.constant 0 : index
    %c0_30 = arith.constant 0 : index
    %50 = vector.load %arg3[%c5, %c0_29, %c0_30] : memref<9x1x64xf32, #tpu.memory_space<vmem>>, vector<1x1x64xf32>
    %51 = vector.shape_cast %50 : vector<1x1x64xf32> to vector<1x64xf32>
    %52 = vector.broadcast %51 : vector<1x64xf32> to vector<256x64xf32>
    %53 = arith.mulf %40, %52 : vector<256x64xf32>
    %54 = arith.addf %49, %53 : vector<256x64xf32>
    %c1_i32_31 = arith.constant 1 : i32
    %55 = tpu.dynamic_rotate %33 by %c1_i32_31 dim 0 : vector<256x64xf32>, i32 -> vector<256x64xf32>
    %cst_32 = arith.constant 0.000000e+00 : f32
    %56 = vector.broadcast %cst_32 : f32 to vector<256x64xf32>
    %57 = arith.select %8, %55, %56 : vector<256x64xi1>, vector<256x64xf32>
    %c255_i32_33 = arith.constant 255 : i32
    %58 = tpu.dynamic_rotate %33 by %c255_i32_33 dim 0 : vector<256x64xf32>, i32 -> vector<256x64xf32>
    %cst_34 = arith.constant 0.000000e+00 : f32
    %59 = vector.broadcast %cst_34 : f32 to vector<256x64xf32>
    %60 = arith.select %12, %58, %59 : vector<256x64xi1>, vector<256x64xf32>
    %c1 = arith.constant 1 : index
    %c0_35 = arith.constant 0 : index
    %c0_36 = arith.constant 0 : index
    %61 = vector.load %arg3[%c1, %c0_35, %c0_36] : memref<9x1x64xf32, #tpu.memory_space<vmem>>, vector<1x1x64xf32>
    %62 = vector.shape_cast %61 : vector<1x1x64xf32> to vector<1x64xf32>
    %63 = vector.broadcast %62 : vector<1x64xf32> to vector<256x64xf32>
    %64 = arith.mulf %33, %63 : vector<256x64xf32>
    %c0_37 = arith.constant 0 : index
    %c0_38 = arith.constant 0 : index
    %c0_39 = arith.constant 0 : index
    %65 = vector.load %arg3[%c0_37, %c0_38, %c0_39] : memref<9x1x64xf32, #tpu.memory_space<vmem>>, vector<1x1x64xf32>
    %66 = vector.shape_cast %65 : vector<1x1x64xf32> to vector<1x64xf32>
    %67 = vector.broadcast %66 : vector<1x64xf32> to vector<256x64xf32>
    %68 = arith.mulf %57, %67 : vector<256x64xf32>
    %69 = arith.addf %64, %68 : vector<256x64xf32>
    %c2 = arith.constant 2 : index
    %c0_40 = arith.constant 0 : index
    %c0_41 = arith.constant 0 : index
    %70 = vector.load %arg3[%c2, %c0_40, %c0_41] : memref<9x1x64xf32, #tpu.memory_space<vmem>>, vector<1x1x64xf32>
    %71 = vector.shape_cast %70 : vector<1x1x64xf32> to vector<1x64xf32>
    %72 = vector.broadcast %71 : vector<1x64xf32> to vector<256x64xf32>
    %73 = arith.mulf %60, %72 : vector<256x64xf32>
    %74 = arith.addf %69, %73 : vector<256x64xf32>
    %75 = arith.addf %54, %74 : vector<256x64xf32>
    %c1_i32_42 = arith.constant 1 : i32
    %76 = tpu.dynamic_rotate %34 by %c1_i32_42 dim 0 : vector<256x64xf32>, i32 -> vector<256x64xf32>
    %cst_43 = arith.constant 0.000000e+00 : f32
    %77 = vector.broadcast %cst_43 : f32 to vector<256x64xf32>
    %78 = arith.select %8, %76, %77 : vector<256x64xi1>, vector<256x64xf32>
    %c255_i32_44 = arith.constant 255 : i32
    %79 = tpu.dynamic_rotate %34 by %c255_i32_44 dim 0 : vector<256x64xf32>, i32 -> vector<256x64xf32>
    %cst_45 = arith.constant 0.000000e+00 : f32
    %80 = vector.broadcast %cst_45 : f32 to vector<256x64xf32>
    %81 = arith.select %12, %79, %80 : vector<256x64xi1>, vector<256x64xf32>
    %c7 = arith.constant 7 : index
    %c0_46 = arith.constant 0 : index
    %c0_47 = arith.constant 0 : index
    %82 = vector.load %arg3[%c7, %c0_46, %c0_47] : memref<9x1x64xf32, #tpu.memory_space<vmem>>, vector<1x1x64xf32>
    %83 = vector.shape_cast %82 : vector<1x1x64xf32> to vector<1x64xf32>
    %84 = vector.broadcast %83 : vector<1x64xf32> to vector<256x64xf32>
    %85 = arith.mulf %34, %84 : vector<256x64xf32>
    %c6 = arith.constant 6 : index
    %c0_48 = arith.constant 0 : index
    %c0_49 = arith.constant 0 : index
    %86 = vector.load %arg3[%c6, %c0_48, %c0_49] : memref<9x1x64xf32, #tpu.memory_space<vmem>>, vector<1x1x64xf32>
    %87 = vector.shape_cast %86 : vector<1x1x64xf32> to vector<1x64xf32>
    %88 = vector.broadcast %87 : vector<1x64xf32> to vector<256x64xf32>
    %89 = arith.mulf %78, %88 : vector<256x64xf32>
    %90 = arith.addf %85, %89 : vector<256x64xf32>
    %c8 = arith.constant 8 : index
    %c0_50 = arith.constant 0 : index
    %c0_51 = arith.constant 0 : index
    %91 = vector.load %arg3[%c8, %c0_50, %c0_51] : memref<9x1x64xf32, #tpu.memory_space<vmem>>, vector<1x1x64xf32>
    %92 = vector.shape_cast %91 : vector<1x1x64xf32> to vector<1x64xf32>
    %93 = vector.broadcast %92 : vector<1x64xf32> to vector<256x64xf32>
    %94 = arith.mulf %81, %93 : vector<256x64xf32>
    %95 = arith.addf %90, %94 : vector<256x64xf32>
    %96 = arith.addf %75, %95 : vector<256x64xf32>
    %c0_52 = arith.constant 0 : index
    %c0_53 = arith.constant 0 : index
    %97 = vector.load %arg4[%c0_52, %c0_53] : memref<64x128xf32, #tpu.memory_space<vmem>>, vector<64x128xf32>
    %cst_54 = arith.constant dense<0.000000e+00> : vector<256x128xf32>
    %98 = tpu.matmul %96, %97, %cst_54 {dimension_numbers = #tpu.dot_dimension_numbers<[1], [0], [0], [1], [0, 0, 1, 1], [], []>} : vector<256x64xf32>, vector<64x128xf32>, vector<256x128xf32> -> vector<256x128xf32>
    %c0_55 = arith.constant 0 : index
    %c0_56 = arith.constant 0 : index
    %99 = vector.load %arg5[%c0_55, %c0_56] : memref<1x128xf32, #tpu.memory_space<vmem>>, vector<1x128xf32>
    %100 = vector.broadcast %99 : vector<1x128xf32> to vector<256x128xf32>
    %101 = arith.mulf %98, %100 : vector<256x128xf32>
    %c0_57 = arith.constant 0 : index
    %c0_58 = arith.constant 0 : index
    %102 = vector.load %arg6[%c0_57, %c0_58] : memref<1x128xf32, #tpu.memory_space<vmem>>, vector<1x128xf32>
    %103 = vector.broadcast %102 : vector<1x128xf32> to vector<256x128xf32>
    %104 = arith.addf %101, %103 : vector<256x128xf32>
    %cst_59 = arith.constant 0.000000e+00 : f32
    %105 = vector.broadcast %cst_59 : f32 to vector<256x128xf32>
    %106 = arith.maximumf %104, %105 : vector<256x128xf32>
    %c16_60 = arith.constant 16 : index
    %c0_61 = arith.constant 0 : index
    %107 = vector.load %arg16[%c16_60, %c0_61] : memref<288x128xf32, #tpu.memory_space<vmem>>, vector<256x128xf32>
    tpu.vector_store %arg16[%c16_60, %c0_61], %106 {strides = array<i32>} : memref<288x128xf32, #tpu.memory_space<vmem>>, vector<256x128xf32>,
    %c0_62 = arith.constant 0 : index
    %c0_63 = arith.constant 0 : index
    %108 = vector.load %arg16[%c0_62, %c0_63] : memref<288x128xf32, #tpu.memory_space<vmem>>, vector<256x128xf32>
    %c32_64 = arith.constant 32 : index
    %c0_65 = arith.constant 0 : index
    %109 = vector.load %arg16[%c32_64, %c0_65] : memref<288x128xf32, #tpu.memory_space<vmem>>, vector<256x128xf32>
    %c1_i32_66 = arith.constant 1 : i32
    %110 = tpu.dynamic_rotate %106 by %c1_i32_66 dim 0 : vector<256x128xf32>, i32 -> vector<256x128xf32>
    %cst_67 = arith.constant 0.000000e+00 : f32
    %111 = vector.broadcast %cst_67 : f32 to vector<256x128xf32>
    %112 = arith.select %16, %110, %111 : vector<256x128xi1>, vector<256x128xf32>
    %c255_i32_68 = arith.constant 255 : i32
    %113 = tpu.dynamic_rotate %106 by %c255_i32_68 dim 0 : vector<256x128xf32>, i32 -> vector<256x128xf32>
    %cst_69 = arith.constant 0.000000e+00 : f32
    %114 = vector.broadcast %cst_69 : f32 to vector<256x128xf32>
    %115 = arith.select %20, %113, %114 : vector<256x128xi1>, vector<256x128xf32>
    %c4_70 = arith.constant 4 : index
    %c0_71 = arith.constant 0 : index
    %c0_72 = arith.constant 0 : index
    %116 = vector.load %arg7[%c4_70, %c0_71, %c0_72] : memref<9x1x128xf32, #tpu.memory_space<vmem>>, vector<1x1x128xf32>
    %117 = vector.shape_cast %116 : vector<1x1x128xf32> to vector<1x128xf32>
    %118 = vector.broadcast %117 : vector<1x128xf32> to vector<256x128xf32>
    %119 = arith.mulf %106, %118 : vector<256x128xf32>
    %c3_73 = arith.constant 3 : index
    %c0_74 = arith.constant 0 : index
    %c0_75 = arith.constant 0 : index
    %120 = vector.load %arg7[%c3_73, %c0_74, %c0_75] : memref<9x1x128xf32, #tpu.memory_space<vmem>>, vector<1x1x128xf32>
    %121 = vector.shape_cast %120 : vector<1x1x128xf32> to vector<1x128xf32>
    %122 = vector.broadcast %121 : vector<1x128xf32> to vector<256x128xf32>
    %123 = arith.mulf %112, %122 : vector<256x128xf32>
    %124 = arith.addf %119, %123 : vector<256x128xf32>
    %c5_76 = arith.constant 5 : index
    %c0_77 = arith.constant 0 : index
    %c0_78 = arith.constant 0 : index
    %125 = vector.load %arg7[%c5_76, %c0_77, %c0_78] : memref<9x1x128xf32, #tpu.memory_space<vmem>>, vector<1x1x128xf32>
    %126 = vector.shape_cast %125 : vector<1x1x128xf32> to vector<1x128xf32>
    %127 = vector.broadcast %126 : vector<1x128xf32> to vector<256x128xf32>
    %128 = arith.mulf %115, %127 : vector<256x128xf32>
    %129 = arith.addf %124, %128 : vector<256x128xf32>
    %c1_i32_79 = arith.constant 1 : i32
    %130 = tpu.dynamic_rotate %108 by %c1_i32_79 dim 0 : vector<256x128xf32>, i32 -> vector<256x128xf32>
    %cst_80 = arith.constant 0.000000e+00 : f32
    %131 = vector.broadcast %cst_80 : f32 to vector<256x128xf32>
    %132 = arith.select %16, %130, %131 : vector<256x128xi1>, vector<256x128xf32>
    %c255_i32_81 = arith.constant 255 : i32
    %133 = tpu.dynamic_rotate %108 by %c255_i32_81 dim 0 : vector<256x128xf32>, i32 -> vector<256x128xf32>
    %cst_82 = arith.constant 0.000000e+00 : f32
    %134 = vector.broadcast %cst_82 : f32 to vector<256x128xf32>
    %135 = arith.select %20, %133, %134 : vector<256x128xi1>, vector<256x128xf32>
    %c1_83 = arith.constant 1 : index
    %c0_84 = arith.constant 0 : index
    %c0_85 = arith.constant 0 : index
    %136 = vector.load %arg7[%c1_83, %c0_84, %c0_85] : memref<9x1x128xf32, #tpu.memory_space<vmem>>, vector<1x1x128xf32>
    %137 = vector.shape_cast %136 : vector<1x1x128xf32> to vector<1x128xf32>
    %138 = vector.broadcast %137 : vector<1x128xf32> to vector<256x128xf32>
    %139 = arith.mulf %108, %138 : vector<256x128xf32>
    %c0_86 = arith.constant 0 : index
    %c0_87 = arith.constant 0 : index
    %c0_88 = arith.constant 0 : index
    %140 = vector.load %arg7[%c0_86, %c0_87, %c0_88] : memref<9x1x128xf32, #tpu.memory_space<vmem>>, vector<1x1x128xf32>
    %141 = vector.shape_cast %140 : vector<1x1x128xf32> to vector<1x128xf32>
    %142 = vector.broadcast %141 : vector<1x128xf32> to vector<256x128xf32>
    %143 = arith.mulf %132, %142 : vector<256x128xf32>
    %144 = arith.addf %139, %143 : vector<256x128xf32>
    %c2_89 = arith.constant 2 : index
    %c0_90 = arith.constant 0 : index
    %c0_91 = arith.constant 0 : index
    %145 = vector.load %arg7[%c2_89, %c0_90, %c0_91] : memref<9x1x128xf32, #tpu.memory_space<vmem>>, vector<1x1x128xf32>
    %146 = vector.shape_cast %145 : vector<1x1x128xf32> to vector<1x128xf32>
    %147 = vector.broadcast %146 : vector<1x128xf32> to vector<256x128xf32>
    %148 = arith.mulf %135, %147 : vector<256x128xf32>
    %149 = arith.addf %144, %148 : vector<256x128xf32>
    %150 = arith.addf %129, %149 : vector<256x128xf32>
    %c1_i32_92 = arith.constant 1 : i32
    %151 = tpu.dynamic_rotate %109 by %c1_i32_92 dim 0 : vector<256x128xf32>, i32 -> vector<256x128xf32>
    %cst_93 = arith.constant 0.000000e+00 : f32
    %152 = vector.broadcast %cst_93 : f32 to vector<256x128xf32>
    %153 = arith.select %16, %151, %152 : vector<256x128xi1>, vector<256x128xf32>
    %c255_i32_94 = arith.constant 255 : i32
    %154 = tpu.dynamic_rotate %109 by %c255_i32_94 dim 0 : vector<256x128xf32>, i32 -> vector<256x128xf32>
    %cst_95 = arith.constant 0.000000e+00 : f32
    %155 = vector.broadcast %cst_95 : f32 to vector<256x128xf32>
    %156 = arith.select %20, %154, %155 : vector<256x128xi1>, vector<256x128xf32>
    %c7_96 = arith.constant 7 : index
    %c0_97 = arith.constant 0 : index
    %c0_98 = arith.constant 0 : index
    %157 = vector.load %arg7[%c7_96, %c0_97, %c0_98] : memref<9x1x128xf32, #tpu.memory_space<vmem>>, vector<1x1x128xf32>
    %158 = vector.shape_cast %157 : vector<1x1x128xf32> to vector<1x128xf32>
    %159 = vector.broadcast %158 : vector<1x128xf32> to vector<256x128xf32>
    %160 = arith.mulf %109, %159 : vector<256x128xf32>
    %c6_99 = arith.constant 6 : index
    %c0_100 = arith.constant 0 : index
    %c0_101 = arith.constant 0 : index
    %161 = vector.load %arg7[%c6_99, %c0_100, %c0_101] : memref<9x1x128xf32, #tpu.memory_space<vmem>>, vector<1x1x128xf32>
    %162 = vector.shape_cast %161 : vector<1x1x128xf32> to vector<1x128xf32>
    %163 = vector.broadcast %162 : vector<1x128xf32> to vector<256x128xf32>
    %164 = arith.mulf %153, %163 : vector<256x128xf32>
    %165 = arith.addf %160, %164 : vector<256x128xf32>
    %c8_102 = arith.constant 8 : index
    %c0_103 = arith.constant 0 : index
    %c0_104 = arith.constant 0 : index
    %166 = vector.load %arg7[%c8_102, %c0_103, %c0_104] : memref<9x1x128xf32, #tpu.memory_space<vmem>>, vector<1x1x128xf32>
    %167 = vector.shape_cast %166 : vector<1x1x128xf32> to vector<1x128xf32>
    %168 = vector.broadcast %167 : vector<1x128xf32> to vector<256x128xf32>
    %169 = arith.mulf %156, %168 : vector<256x128xf32>
    %170 = arith.addf %165, %169 : vector<256x128xf32>
    %171 = arith.addf %150, %170 : vector<256x128xf32>
    %c0_105 = arith.constant 0 : index
    %c0_106 = arith.constant 0 : index
    %172 = vector.load %arg8[%c0_105, %c0_106] : memref<128x128xf32, #tpu.memory_space<vmem>>, vector<128x128xf32>
    %cst_107 = arith.constant dense<0.000000e+00> : vector<256x128xf32>
    %173 = tpu.matmul %171, %172, %cst_107 {dimension_numbers = #tpu.dot_dimension_numbers<[1], [0], [0], [1], [0, 0, 1, 1], [], []>} : vector<256x128xf32>, vector<128x128xf32>, vector<256x128xf32> -> vector<256x128xf32>
    %c0_108 = arith.constant 0 : index
    %c0_109 = arith.constant 0 : index
    %174 = vector.load %arg9[%c0_108, %c0_109] : memref<1x128xf32, #tpu.memory_space<vmem>>, vector<1x128xf32>
    %175 = vector.broadcast %174 : vector<1x128xf32> to vector<256x128xf32>
    %176 = arith.mulf %173, %175 : vector<256x128xf32>
    %c0_110 = arith.constant 0 : index
    %c0_111 = arith.constant 0 : index
    %177 = vector.load %arg10[%c0_110, %c0_111] : memref<1x128xf32, #tpu.memory_space<vmem>>, vector<1x128xf32>
    %178 = vector.broadcast %177 : vector<1x128xf32> to vector<256x128xf32>
    %179 = arith.addf %176, %178 : vector<256x128xf32>
    %c16_112 = arith.constant 16 : index
    %c0_113 = arith.constant 0 : index
    %180 = vector.load %arg17[%c16_112, %c0_113] : memref<288x128xf32, #tpu.memory_space<vmem>>, vector<256x128xf32>
    tpu.vector_store %arg17[%c16_112, %c0_113], %179 {strides = array<i32>} : memref<288x128xf32, #tpu.memory_space<vmem>>, vector<256x128xf32>,
    %c0_114 = arith.constant 0 : index
    %c0_115 = arith.constant 0 : index
    %181 = vector.load %arg17[%c0_114, %c0_115] : memref<288x128xf32, #tpu.memory_space<vmem>>, vector<256x128xf32>
    %c32_116 = arith.constant 32 : index
    %c0_117 = arith.constant 0 : index
    %182 = vector.load %arg17[%c32_116, %c0_117] : memref<288x128xf32, #tpu.memory_space<vmem>>, vector<256x128xf32>
    %c1_i32_118 = arith.constant 1 : i32
    %183 = tpu.dynamic_rotate %179 by %c1_i32_118 dim 0 : vector<256x128xf32>, i32 -> vector<256x128xf32>
    %cst_119 = arith.constant -3.000000e+38 : f32
    %184 = vector.broadcast %cst_119 : f32 to vector<256x128xf32>
    %185 = arith.select %16, %183, %184 : vector<256x128xi1>, vector<256x128xf32>
    %186 = arith.maximumf %179, %185 : vector<256x128xf32>
    %c255_i32_120 = arith.constant 255 : i32
    %187 = tpu.dynamic_rotate %179 by %c255_i32_120 dim 0 : vector<256x128xf32>, i32 -> vector<256x128xf32>
    %cst_121 = arith.constant -3.000000e+38 : f32
    %188 = vector.broadcast %cst_121 : f32 to vector<256x128xf32>
    %189 = arith.select %20, %187, %188 : vector<256x128xi1>, vector<256x128xf32>
    %190 = arith.maximumf %186, %189 : vector<256x128xf32>
    %c1_i32_122 = arith.constant 1 : i32
    %191 = tpu.dynamic_rotate %181 by %c1_i32_122 dim 0 : vector<256x128xf32>, i32 -> vector<256x128xf32>
    %cst_123 = arith.constant -3.000000e+38 : f32
    %192 = vector.broadcast %cst_123 : f32 to vector<256x128xf32>
    %193 = arith.select %16, %191, %192 : vector<256x128xi1>, vector<256x128xf32>
    %194 = arith.maximumf %190, %193 : vector<256x128xf32>
    %c255_i32_124 = arith.constant 255 : i32
    %195 = tpu.dynamic_rotate %181 by %c255_i32_124 dim 0 : vector<256x128xf32>, i32 -> vector<256x128xf32>
    %cst_125 = arith.constant -3.000000e+38 : f32
    %196 = vector.broadcast %cst_125 : f32 to vector<256x128xf32>
    %197 = arith.select %20, %195, %196 : vector<256x128xi1>, vector<256x128xf32>
    %198 = arith.maximumf %194, %197 : vector<256x128xf32>
    %c1_i32_126 = arith.constant 1 : i32
    %199 = tpu.dynamic_rotate %182 by %c1_i32_126 dim 0 : vector<256x128xf32>, i32 -> vector<256x128xf32>
    %cst_127 = arith.constant -3.000000e+38 : f32
    %200 = vector.broadcast %cst_127 : f32 to vector<256x128xf32>
    %201 = arith.select %16, %199, %200 : vector<256x128xi1>, vector<256x128xf32>
    %202 = arith.maximumf %198, %201 : vector<256x128xf32>
    %c255_i32_128 = arith.constant 255 : i32
    %203 = tpu.dynamic_rotate %182 by %c255_i32_128 dim 0 : vector<256x128xf32>, i32 -> vector<256x128xf32>
    %cst_129 = arith.constant -3.000000e+38 : f32
    %204 = vector.broadcast %cst_129 : f32 to vector<256x128xf32>
    %205 = arith.select %20, %203, %204 : vector<256x128xi1>, vector<256x128xf32>
    %206 = arith.maximumf %202, %205 : vector<256x128xf32>
    %207 = arith.maximumf %206, %181 : vector<256x128xf32>
    %208 = arith.maximumf %207, %182 : vector<256x128xf32>
    %c0_130 = arith.constant 0 : index
    %c0_131 = arith.constant 0 : index
    %209 = vector.load %arg2[%c0_130, %c0_131] : memref<64x256xf32, #tpu.memory_space<vmem>>, vector<64x256xf32>
    %210 = tpu.concatenate %208, %1 in 1 : vector<256x128xf32>, vector<256x64xf32> -> vector<256x192xf32>
    %cst_132 = arith.constant dense<0.000000e+00> : vector<64x192xf32>
    %211 = tpu.matmul %209, %210, %cst_132 {dimension_numbers = #tpu.dot_dimension_numbers<[1], [0], [0], [1], [0, 0, 1, 1], [], []>} : vector<64x256xf32>, vector<256x192xf32>, vector<64x192xf32> -> vector<64x192xf32>
    %212 = vector.extract_strided_slice %211 {offsets = [0, 0], sizes = [64, 128], strides = [1, 1]} : vector<64x192xf32> to vector<64x128xf32>
    %213 = vector.extract_strided_slice %211 {offsets = [0, 128], sizes = [64, 64], strides = [1, 1]} : vector<64x192xf32> to vector<64x64xf32>
    %c0_133 = arith.constant 0 : index
    %c0_134 = arith.constant 0 : index
    %214 = vector.load %arg11[%c0_133, %c0_134] : memref<64x128xf32, #tpu.memory_space<vmem>>, vector<64x128xf32>
    %cst_135 = arith.constant dense<0.000000e+00> : vector<64x128xf32>
    %215 = tpu.matmul %213, %214, %cst_135 {dimension_numbers = #tpu.dot_dimension_numbers<[1], [0], [0], [1], [0, 0, 1, 1], [], []>} : vector<64x64xf32>, vector<64x128xf32>, vector<64x128xf32> -> vector<64x128xf32>
    %c0_136 = arith.constant 0 : index
    %c0_137 = arith.constant 0 : index
    %216 = vector.load %arg12[%c0_136, %c0_137] : memref<1x128xf32, #tpu.memory_space<vmem>>, vector<1x128xf32>
    %217 = vector.broadcast %216 : vector<1x128xf32> to vector<64x128xf32>
    %218 = arith.mulf %215, %217 : vector<64x128xf32>
    %c0_138 = arith.constant 0 : index
    %c0_139 = arith.constant 0 : index
    %219 = vector.load %arg13[%c0_138, %c0_139] : memref<1x128xf32, #tpu.memory_space<vmem>>, vector<1x128xf32>
    %220 = vector.broadcast %219 : vector<1x128xf32> to vector<64x128xf32>
    %221 = arith.addf %218, %220 : vector<64x128xf32>
    %222 = arith.addf %212, %221 : vector<64x128xf32>
    %c0_140 = arith.constant 0 : index
    %c0_141 = arith.constant 0 : index
    %c0_142 = arith.constant 0 : index
    %223 = vector.load %arg14[%c0_140, %c0_141, %c0_142] : memref<1x64x128xf32, #tpu.memory_space<vmem>>, vector<1x64x128xf32>
    %224 = vector.shape_cast %223 : vector<1x64x128xf32> to vector<64x128xf32>
    %225 = vector.shape_cast %222 : vector<64x128xf32> to vector<1x64x128xf32>
    tpu.vector_store %arg14[%c0_140, %c0_141, %c0_142], %225 {strides = array<i32>} : memref<1x64x128xf32, #tpu.memory_space<vmem>>, vector<1x64x128xf32>,
    return
  }
  func.func @transform_0(%arg0: i32) -> (i32, i32, i32) {
    %c0_i32 = arith.constant 0 : i32
    %c0_i32_0 = arith.constant 0 : i32
    %c0_i32_1 = arith.constant 0 : i32
    return %arg0, %c0_i32, %c0_i32_0 : i32, i32, i32
  }
  func.func @transform_1(%arg0: i32) -> (i32, i32) {
    %c0_i32 = arith.constant 0 : i32
    %c0_i32_0 = arith.constant 0 : i32
    %c0_i32_1 = arith.constant 0 : i32
    return %c0_i32, %c0_i32_0 : i32, i32
  }
  func.func @transform_2(%arg0: i32) -> (i32, i32, i32) {
    %c0_i32 = arith.constant 0 : i32
    %c0_i32_0 = arith.constant 0 : i32
    %c0_i32_1 = arith.constant 0 : i32
    %c0_i32_2 = arith.constant 0 : i32
    return %c0_i32, %c0_i32_0, %c0_i32_1 : i32, i32, i32
  }
  func.func @transform_3(%arg0: i32) -> (i32, i32) {
    %c0_i32 = arith.constant 0 : i32
    %c0_i32_0 = arith.constant 0 : i32
    %c0_i32_1 = arith.constant 0 : i32
    return %c0_i32, %c0_i32_0 : i32, i32
  }
  func.func @transform_4(%arg0: i32) -> (i32, i32) {
    %c0_i32 = arith.constant 0 : i32
    %c0_i32_0 = arith.constant 0 : i32
    %c0_i32_1 = arith.constant 0 : i32
    return %c0_i32, %c0_i32_0 : i32, i32
  }
  func.func @transform_5(%arg0: i32) -> (i32, i32) {
    %c0_i32 = arith.constant 0 : i32
    %c0_i32_0 = arith.constant 0 : i32
    %c0_i32_1 = arith.constant 0 : i32
    return %c0_i32, %c0_i32_0 : i32, i32
  }
  func.func @transform_6(%arg0: i32) -> (i32, i32, i32) {
    %c0_i32 = arith.constant 0 : i32
    %c0_i32_0 = arith.constant 0 : i32
    %c0_i32_1 = arith.constant 0 : i32
    %c0_i32_2 = arith.constant 0 : i32
    return %c0_i32, %c0_i32_0, %c0_i32_1 : i32, i32, i32
  }
  func.func @transform_7(%arg0: i32) -> (i32, i32) {
    %c0_i32 = arith.constant 0 : i32
    %c0_i32_0 = arith.constant 0 : i32
    %c0_i32_1 = arith.constant 0 : i32
    return %c0_i32, %c0_i32_0 : i32, i32
  }
  func.func @transform_8(%arg0: i32) -> (i32, i32) {
    %c0_i32 = arith.constant 0 : i32
    %c0_i32_0 = arith.constant 0 : i32
    %c0_i32_1 = arith.constant 0 : i32
    return %c0_i32, %c0_i32_0 : i32, i32
  }
  func.func @transform_9(%arg0: i32) -> (i32, i32) {
    %c0_i32 = arith.constant 0 : i32
    %c0_i32_0 = arith.constant 0 : i32
    %c0_i32_1 = arith.constant 0 : i32
    return %c0_i32, %c0_i32_0 : i32, i32
  }
  func.func @transform_10(%arg0: i32) -> (i32, i32) {
    %c0_i32 = arith.constant 0 : i32
    %c0_i32_0 = arith.constant 0 : i32
    %c0_i32_1 = arith.constant 0 : i32
    return %c0_i32, %c0_i32_0 : i32, i32
  }
  func.func @transform_11(%arg0: i32) -> (i32, i32) {
    %c0_i32 = arith.constant 0 : i32
    %c0_i32_0 = arith.constant 0 : i32
    %c0_i32_1 = arith.constant 0 : i32
    return %c0_i32, %c0_i32_0 : i32, i32
  }
  func.func @transform_12(%arg0: i32) -> (i32, i32) {
    %c0_i32 = arith.constant 0 : i32
    %c0_i32_0 = arith.constant 0 : i32
    %c0_i32_1 = arith.constant 0 : i32
    return %c0_i32, %c0_i32_0 : i32, i32
  }
  func.func @transform_13(%arg0: i32) -> (i32, i32, i32) {
    %c0_i32 = arith.constant 0 : i32
    %c0_i32_0 = arith.constant 0 : i32
    %c0_i32_1 = arith.constant 0 : i32
    return %arg0, %c0_i32, %c0_i32_0 : i32, i32, i32
  }
}

</mosaic_0001>

<bundles_post_ra>
// kernel: tpu_custom_call.1
= control target key start
LH: loop header
LB: loop body
LE: loop exit
PB: predicated region body
PF: predicated region fallthrough
CT: control target
= control target key end

     0   :  { %18 = vsyncpa [#allocation6], 0  ;;  %s11115_s0 = inlined_call_operand.vmem [shape: f32[2,256,64], index: 0, kind: input, shape index: {}]   ;;  %s11116_s1 = inlined_call_operand.vmem [shape: f32[64,256], index: 1, kind: input, shape index: {}]   ;;  %s11117_s2 = inlined_call_operand.vmem [shape: f32[9,1,64], index: 2, kind: input, shape index: {}]   ;;  %s11118_s3 = inlined_call_operand.vmem [shape: f32[64,128], index: 3, kind: input, shape index: {}]   ;;  %s11119_s4 = inlined_call_operand.vmem [shape: f32[1,128], index: 4, kind: input, shape index: {}]   ;;  %s11120_s5 = inlined_call_operand.vmem [shape: f32[1,128], index: 5, kind: input, shape index: {}]   ;;  %s11121_s6 = inlined_call_operand.vmem [shape: f32[9,1,128], index: 6, kind: input, shape index: {}]   ;;  %s11122_s7 = inlined_call_operand.vmem [shape: f32[128,128], index: 7, kind: input, shape index: {}]   ;;  %s11123_s8 = inlined_call_operand.vmem [shape: f32[1,128], index: 8, kind: input, shape index: {}]   ;;  %s11124_s9 = inlined_call_operand.vmem [shape: f32[1,128], index: 9, kind: input, shape index: {}]   ;;  %s11125_s10 = inlined_call_operand.vmem [shape: f32[64,128], index: 10, kind: input, shape index: {}]   ;;  %s11126_s11 = inlined_call_operand.vmem [shape: f32[1,128], index: 11, kind: input, shape index: {}]   ;;  %s11127_s12 = inlined_call_operand.vmem [shape: f32[1,128], index: 12, kind: input, shape index: {}]   ;;  %s11128_s13 = inlined_call_operand.hbm [shape: f32[2,64,128], index: 13, kind: output, shape index: {}]  }
   0x1   :  { %20 = vsyncpa [#allocation6 + $0x1], 0  ;;  %s6028_s25 = smov 0   ;;  %s6030_s26 = smov 0  }
   0x2   :  { %s6032_s27 = smov 0   ;;  %s6034_s28 = smov 0  }
   0x3 LB: > { %11393 = sst [smem:[#allocation8_spill]] %s5947_s27  ;;  %s6049_s29 = sadd.s32 4294967295, %s5951_s28   ;;  %s5951_s28 = sphi %s6034_s28, %s12075_s28   ;;  %s5947_s27 = sphi %s6032_s27, %s12072_s27   ;;  %s5943_s26 = sphi %s6030_s26, %s12074_s26   ;;  %s5939_s25 = sphi %s6028_s25, %s12073_s25  }
   0x4   : > { %s5285_s30 = sadd.s32 4294967294, %s5951_s28   ;;  %s6053_s14 = sadd.s32 1, %s5951_s28  }
   0x5   : > { %s311_s15 = sadd.s32 1, %s5947_s27  ;;  %s308_s16 = ssub.s32 %s5951_s28, %s6053_s14 }
   0x6   : > { %p321_p0 = scmp.ne.s32.totalorder %s5947_s27, %s5943_s26  ;;  %p309_p1 = scmp.eq.s32.totalorder %s308_s16, 0 }
   0x7   : > { %p322_p2 = scmp.eq.s32.totalorder %s6049_s29, 1  ;;  %p327_p3 = scmp.ne.s32.totalorder %s5943_s26, %s5939_s25 }
   0x8   : > { %p328_p4 = scmp.eq.s32.totalorder %s5285_s30, 1  ;;  %p5288_p7 = scmp.ge.s32.totalorder %s5951_s28, 1 }
   0x9   : > { %s6064_s17 = scalar_select %p309_p1, %s5947_s27, %s311_s15  }
   0xa   : > { %p6066_p5 = por %p322_p2, %p321_p0  ;;  %p6070_p6 = por %p328_p4, %p327_p3 }
   0xb   : > { %11394 = sst [smem:[#allocation9_spill]] %s6064_s17  ;;  %p390_p8 = scmp.lt.s32.totalorder %s5951_s28, 3 }
   0xd   : > { %p391_p9 = pnand %p5288_p7, %p390_p8 }
   0xf   : > { %394 = sbr.rel (%p391_p9) target bundleno = 1418 (0x58a), region = 72 }
  0x16   : > { %v1924_v0 = vld [vmem:[%s11118_s3] sm:$0xff]  ;;  %v1925_v1 = vld [vmem:[%s11118_s3 + $0x8] sm:$0xff]  ;;  %v1926_v2 = vld [vmem:[%s11118_s3 + $0x10] sm:$0xff]  ;;  %p434_p10 = scmp.lt.s32.totalorder %s6049_s29, 1  ;;  %v471_v3 = vlaneseq  ;;  %vm11212_vm0 = vcmask 523264   ;;  %v11130_v6 = vmov 0.0  }
  0x17   : > { %v5655_v4 = vpack.c.bf16 %v1925_v1, %v1924_v0  ;;  %v1927_v5 = vld [vmem:[%s11118_s3 + $0x18] sm:$0xff]  ;;  %729 = vst.msk [vmem:[#allocation2] sm:$0xff] %vm11212_vm0, %v11130_v6  ;;  %730 = vst.msk [vmem:[#allocation2 + $0x8] sm:$0xff] %vm11212_vm0, %v11130_v6  ;;  %v1928_v8 = vld [vmem:[%s11118_s3 + $0x20] sm:$0xff]  ;;  %v11399_v36 = vmov 0  ;;  %v11402_v1 = vmov 0 }
  0x18   : > { %732 = vst.msk [vmem:[#allocation2 + $0x118] sm:$0xff] %vm11212_vm0, %v11130_v6  ;;  %731 = vst.msk [vmem:[#allocation2 + $0x110] sm:$0xff] %vm11212_vm0, %v11130_v6  ;;  %v5659_v7 = vpack.c.bf16 %v1927_v5, %v1926_v2  ;;  %v1929_v9 = vld [vmem:[%s11118_s3 + $0x28] sm:$0xff]  ;;  %s435_s24 = scalar_select %p434_p10, %s6049_s29, 1  ;;  %v6104_v10 = vshrl.u32 %v471_v3, 7  ;;  %v1930_v11 = vld [vmem:[%s11118_s3 + $0x30] sm:$0xff] }
  0x19   : > { %5656 = vmatprep.subr.bf16.mxu0 %v5655_v4  ;;  %v1931_v12 = vld [vmem:[%s11118_s3 + $0x38] sm:$0xff]  ;;  %v5663_v15 = vpack.c.bf16 %v1929_v9, %v1928_v8  ;;  %v6123_v16 = vld [vmem:[%s11117_s2 + $0x4] ss:$0 sm:$0xff]  ;;  %v6136_v22 = vld [vmem:[%s11117_s2 + $0x1] ss:$0 sm:$0xff]  ;;  %s5378_s15 = sshll.u32 %s6049_s29, 10 }
  0x1a   : > { %5658 = vmatpush3.bf16.msra.mxu0 %v5655_v4  ;;  %s5377_s27 = sshll.u32 %s435_s24, 8  ;;  %v476_v13 = vadd.s32 32, %v6104_v10  ;;  %v504_v14 = vand.u32 15, %v6104_v10  ;;  %vm11215_vm1 = vcmp.lt.s32.totalorder %v6104_v10, 1  ;;  %vm11216_vm3 = vcmp.lt.s32.totalorder %v6104_v10, 7  ;;  %s11066_s17 = scalar_lea.hbm %s11128_s13, %s5378_s15 }
  0x1b   : > { %5660 = vmatprep.subr.bf16.mxu0 %v5659_v7  ;;  %s6117_s22 = scalar_lea.vmem %s11115_s0, %s5377_s27  ;;  %v5667_v23 = vpack.c.bf16 %v1931_v12, %v1930_v11  ;;  %v473_v35 = vadd.s32 8, %v6104_v10  ;;  %v6178_v42 = vld [vmem:[%s11117_s2 + $0x5] ss:$0 sm:$0xff]  ;;  %v6190_v44 = vld [vmem:[%s11117_s2 + $0x3] ss:$0 sm:$0xff]  ;;  %s5955_s27 = smov [#allocation5]  }
  0x1c   : > { %v439_v17 = vld [vmem:[%s6117_s22] sm:$0xff]  ;;  %v440_v18 = vld [vmem:[%s6117_s22 + $0x8] sm:$0xff]  ;;  %v441_v19 = vld [vmem:[%s6117_s22 + $0x10] sm:$0xff]  ;;  %v508_v20 = vand.u32 15, %v476_v13  ;;  %vm6128_vm2 = vcmp.ge.s32.totalorder %v504_v14, 1 }
  0x1d   : > { %v442_v24 = vld [vmem:[%s6117_s22 + $0x18] sm:$0xff]  ;;  %v468_v25 = vld [vmem:[%s6117_s22 + $0xe8] sm:$0xff]  ;;  %v6141_v27 = vmax.f32 %v439_v17, 0.0  ;;  %v6143_v28 = vmax.f32 %v440_v18, 0.0  ;;  %v6145_v29 = vmax.f32 %v441_v19, 0.0  ;;  %v443_v53 = vld [vmem:[%s6117_s22 + $0x20] sm:$0xff] }
  0x1e   : > { %v470_v26 = vld [vmem:[%s6117_s22 + $0xf8] sm:$0xff]  ;;  %5662 = vmatpush3.bf16.msra.mxu0 %v5659_v7  ;;  %v6147_v30 = vmax.f32 %v442_v24, 0.0  ;;  %v6149_v31 = vmax.f32 %v468_v25, 0.0  ;;  %v6153_v33 = vld [vmem:[#allocation2] sm:$0xff]  ;;  %v6155_v34 = vld [vmem:[#allocation2 + $0x8] sm:$0xff]  ;;  %vm6158_vm4 = vcmp.ge.s32.totalorder %v508_v20, 1 }
  0x1f   : > { %v6151_v32 = vmax.f32 %v470_v26, 0.0  ;;  %5664 = vmatprep.subr.bf16.mxu0 %v5663_v15  ;;  %v11400_v36 = vsel %vm6158_vm4, 4294967295, %v11399_v36  ;;  %773 = vst.msk [vmem:[#allocation2 + $0x10] sm:$0xff] %vm11212_vm0, %v6141_v27  ;;  %774 = vst.msk [vmem:[#allocation2 + $0x18] sm:$0xff] %vm11212_vm0, %v6143_v28  ;;  %v6168_v37 = vld [vmem:[#allocation2 + $0x118] sm:$0xff]  ;;  %v841_v38 = vrot.slane %v6141_v27, 7  ;;  %v1043_v41 = vmul.f32 %v6123_v16, %v6141_v27 }
  0x20   : > { %11401 = vst [vmem:[#allocation10_spill] sm:$0xff] %v11400_v36  ;;  %775 = vst.msk [vmem:[#allocation2 + $0x20] sm:$0xff] %vm11212_vm0, %v6145_v29  ;;  %v11134_v39 = vrot.slane %v6141_v27, 1  ;;  %v939_v40 = vrot.slane %v6143_v28, 1  ;;  %v1219_v45 = vrot.slane %v6153_v33, 7  ;;  %v1220_v46 = vrot.slane %v6155_v34, 7 }
  0x21   : > { %776 = vst.msk [vmem:[#allocation2 + $0x28] sm:$0xff] %vm11212_vm0, %v6147_v30  ;;  %802 = vst.msk [vmem:[#allocation2 + $0xf8] sm:$0xff] %vm11212_vm0, %v6149_v31  ;;  %v11135_v43 = vrot.slane %v6151_v32, 7  ;;  %v11133_v47 = vrot.slane %v6153_v33, 1  ;;  %v1316_v49 = vrot.slane %v6155_v34, 1  ;;  %v6202_v50 = vmul.f32 %v6136_v22, %v6153_v33 }
  0x22   : > { %804 = vst.msk [vmem:[#allocation2 + $0x108] sm:$0xff] %vm11212_vm0, %v6151_v32  ;;  %v1001_v48 = vsel %vm11216_vm3, %v11134_v39, %v939_v40  ;;  %v6207_v51 = vld [vmem:[%s11117_s2 + $0x2] ss:$0 sm:$0xff]  ;;  %v11132_v52 = vrot.slane %v6168_v37, 7  ;;  %5666 = vmatpush3.bf16.msra.mxu0 %v5663_v15  ;;  %v505_v56 = vand.u32 15, %v473_v35  ;;  %v6216_v57 = vmax.f32 %v443_v53, 0.0 }
  0x23   : > { %v905_v54 = vsel %vm11215_vm1, %v11135_v43, %v841_v38  ;;  %v1155_v55 = vmul.f32 %v6178_v42, %v1001_v48  ;;  %5668 = vmatprep.subr.bf16.mxu0 %v5667_v23  ;;  %v1377_v59 = vsel %vm11216_vm3, %v11133_v47, %v1316_v49  ;;  %v6229_v60 = vld [vmem:[%s11117_s2] ss:$0 sm:$0xff]  ;;  %v842_v61 = vrot.slane %v6143_v28, 7  ;;  %v6246_v3 = vld [vmem:[%s11117_s2 + $0x7] ss:$0 sm:$0xff] }
  0x24   : > { %v906_v58 = vsel %vm6128_vm2, %v905_v54, 0.0  ;;  %v940_v62 = vrot.slane %v6145_v29, 1  ;;  %v1530_v0 = vmul.f32 %v6207_v51, %v1377_v59  ;;  %vm6235_vm5 = vcmp.le.s32.totalorder %v505_v56, 14  ;;  %777 = vst.msk [vmem:[#allocation2 + $0x30] sm:$0xff] %vm11212_vm0, %v6216_v57  ;;  %v6294_v53 = vld [vmem:[%s11117_s2 + $0x8] ss:$0 sm:$0xff] }
  0x25   : > { %v1083_v63 = vmul.f32 %v6190_v44, %v906_v58  ;;  %v11403_v1 = vsel %vm6235_vm5, 4294967295, %v11402_v1  ;;  %v1044_v2 = vmul.f32 %v6123_v16, %v6143_v28  ;;  %v904_v4 = vsel %vm11215_vm1, %v841_v38, %v842_v61 }
  0x26   : > { %11404 = vst [vmem:[#allocation11_spill] sm:$0xff] %v11403_v1  ;;  %v1000_v5 = vsel %vm11216_vm3, %v939_v40, %v940_v62  ;;  %v1281_v7 = vsel %vm11215_vm1, %v1219_v45, %v1220_v46  ;;  %v1420_v8 = vmul.f32 %v6136_v22, %v6155_v34  ;;  %5670 = vmatpush3.bf16.msra.mxu0 %v5667_v23  ;;  %v6262_v9 = vld [vmem:[#allocation2 + $0x18] sm:$0xff]  ;;  %v6281_v40 = vld [vmem:[%s11117_s2 + $0x6] ss:$0 sm:$0xff] }
  0x27   : > { %v809_v11 = vld [vmem:[#allocation2 + $0x20] sm:$0xff]  ;;  %v1115_v12 = vadd.f32 %v1083_v63, %v1043_v41  ;;  %v1004_v13 = vsel %vm6235_vm5, %v1000_v5, 0.0  ;;  %v1084_v14 = vmul.f32 %v6190_v44, %v904_v4  ;;  %v1459_v15 = vmul.f32 %v6229_v60, %v1281_v7  ;;  %v6307_v4 = vld [vmem:[#allocation2 + $0x10] sm:$0xff] }
  0x28   : > { %v6268_v17 = vld [vmem:[#allocation2 + $0x28] sm:$0xff]  ;;  %v836_v18 = vld [vmem:[#allocation2 + $0xf8] sm:$0xff]  ;;  %v1222_v19 = vrot.slane %v6262_v9, 7  ;;  %v1223_v20 = vrot.slane %v809_v11, 7  ;;  %v6271_v24 = vrot.slane %v809_v11, 1  ;;  %v1423_v23 = vmul.f32 %v6136_v22, %v809_v11 }
  0x29   : > { %v1187_v25 = vadd.f32 %v1155_v55, %v1115_v12  ;;  %v6274_v26 = vrot.slane %v836_v18, 7  ;;  %v1320_v35 = vrot.slane %v6268_v17, 1  ;;  %v1716_v38 = vmul.f32 %v6246_v3, %v809_v11 }
  0x2a   : > { %v1278_v41 = vsel %vm11215_vm1, %v1222_v19, %v1223_v20  ;;  %v1634_v48 = vsel %vm11215_vm1, %v11132_v52, %v1223_v20  ;;  %v1116_v54 = vadd.f32 %v1084_v14, %v1044_v2  ;;  %v1156_v55 = vmul.f32 %v6178_v42, %v1004_v13 }
  0x2b   : > { %v1282_v56 = vsel %vm11215_vm1, %v6274_v26, %v1219_v45  ;;  %v1287_v58 = vsel %vm6158_vm4, %v1278_v41, 0.0  ;;  %v1373_v59 = vsel %vm11216_vm3, %v6271_v24, %v1320_v35  ;;  %v1635_v63 = vsel %vm6128_vm2, %v1634_v48, 0.0  ;;  %v6314_v11 = vld [vmem:[#allocation2 + $0x30] sm:$0xff] }
  0x2c   : > { %v1283_v2 = vsel %vm6128_vm2, %v1282_v56, 0.0  ;;  %v1462_v5 = vmul.f32 %v6229_v60, %v1287_v58  ;;  %v1534_v45 = vmul.f32 %v6207_v51, %v1373_v59  ;;  %v1756_v7 = vmul.f32 %v6281_v40, %v1635_v63 }
  0x2d   : > { %v1458_v12 = vmul.f32 %v6229_v60, %v1283_v2  ;;  %v1828_v13 = vmul.f32 %v6294_v53, %v1373_v59  ;;  %v1188_v14 = vadd.f32 %v1156_v55, %v1116_v54  ;;  %v1224_v18 = vrot.slane %v6268_v17, 7  ;;  %v444_v59 = vld [vmem:[%s6117_s22 + $0x28] sm:$0xff] }
  0x2e   : > { %v1494_v41 = vadd.f32 %v1462_v5, %v1423_v23  ;;  %v1788_v48 = vadd.f32 %v1756_v7, %v1716_v38  ;;  %v1317_v56 = vrot.slane %v6307_v4, 1  ;;  %v1321_v58 = vrot.slane %v6314_v11, 1 }
  0x2f   : > { %v1490_v6 = vadd.f32 %v1458_v12, %v6202_v50  ;;  %v6324_v63 = vsel %vm11215_vm1, %v1223_v20, %v1224_v18  ;;  %v1491_v52 = vadd.f32 %v1459_v15, %v1420_v8  ;;  %v1717_v2 = vmul.f32 %v6246_v3, %v6268_v17 }
  0x30   : > { %v6329_v54 = vadd.f32 %v1534_v45, %v1494_v41  ;;  %v1860_v55 = vadd.f32 %v1828_v13, %v1788_v48  ;;  %v6335_v23 = vsel %vm11216_vm3, %v1320_v35, %v1321_v58  ;;  %v1376_v50 = vsel %vm11216_vm3, %v1316_v49, %v1317_v56 }
  0x31   : > { %v1562_v20 = vadd.f32 %v1530_v0, %v1490_v6  ;;  %v1380_v8 = vsel %vm6235_vm5, %v1376_v50, 0.0  ;;  %v1677_v15 = vsel %vm6235_vm5, %v6335_v23, 0.0  ;;  %v1757_v38 = vmul.f32 %v6281_v40, %v6324_v63 }
  0x32   : > { %v1531_v5 = vmul.f32 %v6207_v51, %v1380_v8  ;;  %v1829_v35 = vmul.f32 %v6294_v53, %v1677_v15  ;;  %v474_v45 = vadd.s32 16, %v6104_v10  ;;  %v6351_v7 = vmax.f32 %v444_v59, 0.0 }
  0x33   : > { %v1594_v49 = vadd.f32 %v1562_v20, %v1187_v25  ;;  %v1789_v6 = vadd.f32 %v1757_v38, %v1717_v2  ;;  %v843_v0 = vrot.slane %v6145_v29, 7  ;;  %v941_v12 = vrot.slane %v6147_v30, 1 }
  0x34   : > { %v1563_v13 = vadd.f32 %v1531_v5, %v1491_v52  ;;  %v506_v41 = vand.u32 15, %v474_v45  ;;  %778 = vst.msk [vmem:[#allocation2 + $0x38] sm:$0xff] %vm11212_vm0, %v6351_v7  ;;  %v1045_v48 = vmul.f32 %v6123_v16, %v6145_v29  ;;  %v1221_v50 = vrot.slane %v6307_v4, 7  ;;  %v445_v45 = vld [vmem:[%s6117_s22 + $0x30] sm:$0xff] }
  0x35   : > { %v1892_v8 = vadd.f32 %v1860_v55, %v1594_v49  ;;  %v1861_v15 = vadd.f32 %v1829_v35, %v1789_v6  ;;  %v903_v25 = vsel %vm11215_vm1, %v842_v61, %v843_v0  ;;  %v999_v52 = vsel %vm11216_vm3, %v940_v62, %v941_v12 }
  0x36   : > { %v1595_v2 = vadd.f32 %v1563_v13, %v1188_v14  ;;  %vm6368_vm6 = vcmp.ge.s32.totalorder %v506_v41, 1  ;;  %v11405_v59 = vmov 0  ;;  %v1157_v20 = vmul.f32 %v6178_v42, %v999_v52 }
  0x37   : > { %v11406_v59 = vsel %vm6368_vm6, 4294967295, %v11405_v59  ;;  %v1225_v55 = vrot.slane %v6314_v11, 7  ;;  %5499 = vmatprep.mubr.msk.f32.mxu0 %vm11212_vm0, %v1892_v8  ;;  %v908_v28 = vsel %vm6368_vm6, %v903_v25, 0.0  ;;  %v1280_v29 = vsel %vm11215_vm1, %v1220_v46, %v1221_v50 }
  0x38   : > { %11407 = vst [vmem:[#allocation12_spill] sm:$0xff] %v11406_v59  ;;  %v1318_v61 = vrot.slane %v6262_v9, 1  ;;  %v1421_v62 = vmul.f32 %v6136_v22, %v6307_v4  ;;  %v1893_v14 = vadd.f32 %v1861_v15, %v1595_v2  ;;  %v1085_v38 = vmul.f32 %v6190_v44, %v908_v28 }
  0x39   : > { %v6387_v5 = vsel %vm11215_vm1, %v1224_v18, %v1225_v55  ;;  %v1285_v35 = vsel %vm6368_vm6, %v1280_v29, 0.0  ;;  %v1718_v49 = vmul.f32 %v6246_v3, %v6314_v11  ;;  %v475_v41 = vadd.s32 24, %v6104_v10 }
  0x3a   : > { %v1375_v34 = vsel %vm11216_vm3, %v1317_v56, %v1318_v61  ;;  %v1460_v46 = vmul.f32 %v6229_v60, %v1285_v35  ;;  %v1637_v4 = vsel %vm6368_vm6, %v6387_v5, 0.0  ;;  %5500 = vmatmul.mubr.msk.f32.vlgmr.msra.gmra.mrb[0].mxu0 %vm11212_vm0, %v1893_v14  ;;  %v1117_v18 = vadd.f32 %v1085_v38, %v1045_v48 }
  0x3b   : > { %v1532_v6 = vmul.f32 %v6207_v51, %v1375_v34  ;;  %v1758_v13 = vmul.f32 %v6281_v40, %v1637_v4  ;;  %v6404_v8 = vld [vmem:[#allocation2 + $0x38] sm:$0xff]  ;;  %v6406_v15 = vmax.f32 %v445_v45, 0.0  ;;  %v844_v25 = vrot.slane %v6147_v30, 7 }
  0x3c   : > { %v1492_v56 = vadd.f32 %v1460_v46, %v1421_v62  ;;  %v942_v52 = vrot.slane %v6216_v57, 1  ;;  %v1189_v2 = vadd.f32 %v1157_v20, %v1117_v18  ;;  %v1322_v28 = vrot.slane %v6404_v8, 1 }
  0x3d   : > { %v1790_v29 = vadd.f32 %v1758_v13, %v1718_v49  ;;  %v507_v48 = vand.u32 15, %v475_v41  ;;  %779 = vst.msk [vmem:[#allocation2 + $0x40] sm:$0xff] %vm11212_vm0, %v6406_v15  ;;  %v902_v38 = vsel %vm11215_vm1, %v843_v0, %v844_v25  ;;  %v1046_v35 = vmul.f32 %v6123_v16, %v6147_v30  ;;  %v446_v13 = vld [vmem:[%s6117_s22 + $0x38] sm:$0xff] }
  0x3e   : > { %v1564_v14 = vadd.f32 %v1532_v6, %v1492_v56  ;;  %v998_v62 = vsel %vm11216_vm3, %v941_v12, %v942_v52  ;;  %v6423_v20 = vsel %vm11216_vm3, %v1321_v58, %v1322_v28  ;;  %v11408_v45 = vmov 0 }
  0x3f   : > { %vm6425_vm7 = vcmp.le.s32.totalorder %v507_v48, 14  ;;  %v1086_v34 = vmul.f32 %v6190_v44, %v902_v38  ;;  %v1226_v0 = vrot.slane %v6404_v8, 7  ;;  %v1830_v12 = vmul.f32 %v6294_v53, %v6423_v20 }
  0x40   : > { %v11409_v45 = vsel %vm6425_vm7, 4294967295, %v11408_v45  ;;  %v1596_v46 = vadd.f32 %v1564_v14, %v1189_v2  ;;  %v1006_v30 = vsel %vm6425_vm7, %v998_v62, 0.0  ;;  %v1279_v58 = vsel %vm11215_vm1, %v1221_v50, %v1222_v19 }
  0x41   : > { %11410 = vst [vmem:[#allocation13_spill] sm:$0xff] %v11409_v45  ;;  %v1118_v4 = vadd.f32 %v1086_v34, %v1046_v35  ;;  %v1158_v49 = vmul.f32 %v6178_v42, %v1006_v30  ;;  %v6442_v18 = vsel %vm11215_vm1, %v1225_v55, %v1226_v0  ;;  %v1374_v6 = vsel %vm11216_vm3, %v1318_v61, %v6271_v24 }
  0x42   : > { %v1862_v41 = vadd.f32 %v1830_v12, %v1790_v29  ;;  %v1382_v56 = vsel %vm6425_vm7, %v1374_v6, 0.0  ;;  %v1422_v2 = vmul.f32 %v6136_v22, %v6262_v9  ;;  %v1461_v19 = vmul.f32 %v6229_v60, %v1279_v58  ;;  %v447_v6 = vld [vmem:[%s6117_s22 + $0x40] sm:$0xff] }
  0x43   : > { %v1190_v50 = vadd.f32 %v1158_v49, %v1118_v4  ;;  %v1533_v48 = vmul.f32 %v6207_v51, %v1382_v56  ;;  %v1719_v55 = vmul.f32 %v6246_v3, %v6404_v8  ;;  %v1759_v14 = vmul.f32 %v6281_v40, %v6442_v18 }
  0x44   : > { %v1894_v61 = vadd.f32 %v1862_v41, %v1596_v46  ;;  %v1493_v29 = vadd.f32 %v1461_v19, %v1422_v2  ;;  %v6458_v38 = vmax.f32 %v446_v13, 0.0  ;;  %v845_v62 = vrot.slane %v6216_v57, 7  ;;  %v6461_v35 = vld [vmem:[#allocation2 + $0x40] sm:$0xff] }
  0x45   : > { %v1791_v9 = vadd.f32 %v1759_v14, %v1719_v55  ;;  %v943_v34 = vrot.slane %v6351_v7, 1  ;;  %v1047_v12 = vmul.f32 %v6123_v16, %v6216_v57  ;;  %v477_v30 = vadd.s32 40, %v6104_v10 }
  0x46   : > { %5502 = vmatprep.mubr.msk.f32.mxu0 %vm11212_vm0, %v1894_v61  ;;  %v1323_v58 = vrot.slane %v6461_v35, 1  ;;  %v1565_v46 = vadd.f32 %v1533_v48, %v1493_v29  ;;  %780 = vst.msk [vmem:[#allocation2 + $0x48] sm:$0xff] %vm11212_vm0, %v6458_v38  ;;  %v901_v4 = vsel %vm11215_vm1, %v844_v25, %v845_v62  ;;  %v1227_v49 = vrot.slane %v6461_v35, 7 }
  0x47   : > { %v910_v13 = vsel %vm6158_vm4, %v901_v4, 0.0  ;;  %v997_v57 = vsel %vm11216_vm3, %v942_v52, %v943_v34  ;;  %v1720_v41 = vmul.f32 %v6246_v3, %v6461_v35  ;;  %v509_v56 = vand.u32 15, %v477_v30 }
  0x48   : > { %v6483_v2 = vsel %vm11216_vm3, %v1322_v28, %v1323_v58  ;;  %v1597_v19 = vadd.f32 %v1565_v46, %v1190_v50  ;;  %v1087_v25 = vmul.f32 %v6190_v44, %v910_v13  ;;  %v1159_v48 = vmul.f32 %v6178_v42, %v997_v57 }
  0x49   : > { %v1679_v55 = vsel %vm6425_vm7, %v6483_v2, 0.0  ;;  %v6492_v52 = vsel %vm11215_vm1, %v1226_v0, %v1227_v49  ;;  %vm6494_vm8 = vcmp.le.s32.totalorder %v509_v56, 14  ;;  %v11411_v14 = vmov 0 }
  0x4a   : > { %v11412_v14 = vsel %vm6494_vm8, 4294967295, %v11411_v14  ;;  %v6498_v61 = vmax.f32 %v447_v6, 0.0  ;;  %v1831_v28 = vmul.f32 %v6294_v53, %v1679_v55  ;;  %v1119_v50 = vadd.f32 %v1087_v25, %v1047_v12 }
  0x4b   : > { %11413 = vst [vmem:[#allocation14_spill] sm:$0xff] %v11412_v14  ;;  %v1639_v29 = vsel %vm6158_vm4, %v6492_v52, 0.0  ;;  %v846_v30 = vrot.slane %v6351_v7, 7  ;;  %v944_v0 = vrot.slane %v6406_v15, 1  ;;  %v1048_v4 = vmul.f32 %v6123_v16, %v6351_v7 }
  0x4c   : > { %v1760_v46 = vmul.f32 %v6281_v40, %v1639_v29  ;;  %781 = vst.msk [vmem:[#allocation2 + $0x50] sm:$0xff] %vm11212_vm0, %v6498_v61  ;;  %v1384_v12 = vsel %vm6494_vm8, %v6335_v23, 0.0  ;;  %v1863_v6 = vadd.f32 %v1831_v28, %v1791_v9  ;;  %v1191_v13 = vadd.f32 %v1159_v48, %v1119_v50 }
  0x4d   : > { %v900_v57 = vsel %vm11215_vm1, %v845_v62, %v846_v30  ;;  %v1424_v56 = vmul.f32 %v6136_v22, %v6268_v17  ;;  %v6518_v25 = vld [vmem:[#allocation2 + $0x48] sm:$0xff]  ;;  %v996_v29 = vsel %vm11216_vm3, %v943_v34, %v944_v0  ;;  %v1463_v47 = vmul.f32 %v6229_v60, %v6324_v63 }
  0x4e   : > { %v1792_v55 = vadd.f32 %v1760_v46, %v1720_v41  ;;  %v1088_v7 = vmul.f32 %v6190_v44, %v900_v57  ;;  %v1895_v23 = vadd.f32 %v1863_v6, %v1597_v19  ;;  %v1324_v9 = vrot.slane %v6518_v25, 1  ;;  %v448_v17 = vld [vmem:[%s6117_s22 + $0x48] sm:$0xff] }
  0x4f   : > { %v1598_v48 = vadd.f32 %v6329_v54, %v1191_v13  ;;  %v1008_v62 = vsel %vm6494_vm8, %v996_v29, 0.0  ;;  %v1228_v50 = vrot.slane %v6518_v25, 7  ;;  %v1495_v34 = vadd.f32 %v1463_v47, %v1424_v56 }
  0x50   : > { %v1120_v28 = vadd.f32 %v1088_v7, %v1048_v4  ;;  %v1160_v41 = vmul.f32 %v6178_v42, %v1008_v62  ;;  %5503 = vmatmul.mubr.msk.f32.gmra.mrb[2].mxu0 %vm11212_vm0, %v1895_v23  ;;  %v6535_v63 = vsel %vm11216_vm3, %v1323_v58, %v1324_v9  ;;  %v1535_v19 = vmul.f32 %v6207_v51, %v1384_v12 }
  0x51   : > { %v1721_v54 = vmul.f32 %v6246_v3, %v6518_v25  ;;  %v478_v46 = vadd.s32 48, %v6104_v10  ;;  %v1832_v4 = vmul.f32 %v6294_v53, %v6535_v63  ;;  %v6545_v47 = vsel %vm11215_vm1, %v1227_v49, %v1228_v50 }
  0x52   : > { %v1192_v6 = vadd.f32 %v1160_v41, %v1120_v28  ;;  %v6547_v13 = vmax.f32 %v448_v17, 0.0  ;;  %v1567_v58 = vadd.f32 %v1535_v19, %v1495_v34  ;;  %v1761_v12 = vmul.f32 %v6281_v40, %v6545_v47 }
  0x53   : > { %v6549_v57 = vld [vmem:[#allocation2 + $0x50] sm:$0xff]  ;;  %v510_v56 = vand.u32 15, %v478_v46  ;;  %v847_v29 = vrot.slane %v6406_v15, 7  ;;  %v1864_v7 = vadd.f32 %v1832_v4, %v1792_v55  ;;  %v945_v49 = vrot.slane %v6458_v38, 1 }
  0x54   : > { %v1325_v23 = vrot.slane %v6549_v57, 1  ;;  %782 = vst.msk [vmem:[#allocation2 + $0x58] sm:$0xff] %vm11212_vm0, %v6547_v13  ;;  %v1049_v62 = vmul.f32 %v6123_v16, %v6406_v15  ;;  %v1599_v17 = vadd.f32 %v1567_v58, %v1192_v6  ;;  %v1793_v28 = vadd.f32 %v1761_v12, %v1721_v54 }
  0x55   : > { %vm6560_vm9 = vcmp.ge.s32.totalorder %v510_v56, 1  ;;  %v11414_v41 = vmov 0  ;;  %v899_v55 = vsel %vm11215_vm1, %v846_v30, %v847_v29  ;;  %v1896_v34 = vadd.f32 %v1864_v7, %v1598_v48  ;;  %v449_v48 = vld [vmem:[%s6117_s22 + $0x50] sm:$0xff] }
  0x56   : > { %v11415_v41 = vsel %vm6560_vm9, 4294967295, %v11414_v41  ;;  %v6568_v19 = vsel %vm11216_vm3, %v1324_v9, %v1325_v23  ;;  %v912_v46 = vsel %vm6560_vm9, %v899_v55, 0.0  ;;  %v995_v15 = vsel %vm11216_vm3, %v944_v0, %v945_v49 }
  0x57   : > { %11416 = vst [vmem:[#allocation15_spill] sm:$0xff] %v11415_v41  ;;  %v1681_v54 = vsel %vm6494_vm8, %v6568_v19, 0.0  ;;  %v1089_v4 = vmul.f32 %v6190_v44, %v912_v46  ;;  %v1161_v6 = vmul.f32 %v6178_v42, %v995_v15  ;;  %v1229_v30 = vrot.slane %v6549_v57, 7  ;;  %5505 = vmatprep.mubr.msk.f32.mxu0 %vm11212_vm0, %v1896_v34 }
  0x58   : > { %v1833_v9 = vmul.f32 %v6294_v53, %v1681_v54  ;;  %v1289_v58 = vsel %vm6560_vm9, %v6387_v5, 0.0  ;;  %v1425_v0 = vmul.f32 %v6136_v22, %v6314_v11  ;;  %v1536_v12 = vmul.f32 %v6207_v51, %v6423_v20 }
  0x59   : > { %v1121_v56 = vadd.f32 %v1089_v4, %v1049_v62  ;;  %v6592_v7 = vsel %vm11215_vm1, %v1228_v50, %v1229_v30  ;;  %v1464_v55 = vmul.f32 %v6229_v60, %v1289_v58  ;;  %v1722_v34 = vmul.f32 %v6246_v3, %v6549_v57 }
  0x5a   : > { %v1865_v46 = vadd.f32 %v1833_v9, %v1793_v28  ;;  %v1641_v5 = vsel %vm6560_vm9, %v6592_v7, 0.0  ;;  %v479_v11 = vadd.s32 56, %v6104_v10  ;;  %v6601_v15 = vmax.f32 %v449_v48, 0.0 }
  0x5b   : > { %v6603_v20 = vld [vmem:[#allocation2 + $0x58] sm:$0xff]  ;;  %v1193_v62 = vadd.f32 %v1161_v6, %v1121_v56  ;;  %v1496_v54 = vadd.f32 %v1464_v55, %v1425_v0  ;;  %v1762_v50 = vmul.f32 %v6281_v40, %v1641_v5  ;;  %v848_v4 = vrot.slane %v6458_v38, 7 }
  0x5c   : > { %v1897_v58 = vadd.f32 %v1865_v46, %v1599_v17  ;;  %v1326_v39 = vrot.slane %v6603_v20, 1  ;;  %v511_v28 = vand.u32 15, %v479_v11  ;;  %783 = vst.msk [vmem:[#allocation2 + $0x60] sm:$0xff] %vm11212_vm0, %v6601_v15  ;;  %v946_v9 = vrot.slane %v6498_v61, 1 }
  0x5d   : > { %v1568_v43 = vadd.f32 %v1536_v12, %v1496_v54  ;;  %v1794_v48 = vadd.f32 %v1762_v50, %v1722_v34  ;;  %v898_v6 = vsel %vm11215_vm1, %v847_v29, %v848_v4  ;;  %v1050_v0 = vmul.f32 %v6123_v16, %v6458_v38  ;;  %v450_v54 = vld [vmem:[%s6117_s22 + $0x58] sm:$0xff] }
  0x5e   : > { %5506 = vmatmul.mubr.msk.f32.gmra.mrb[4].mxu0 %vm11212_vm0, %v1897_v58  ;;  %v6618_v17 = vsel %vm11216_vm3, %v1325_v23, %v1326_v39  ;;  %vm6620_vm10 = vcmp.le.s32.totalorder %v511_v28, 14  ;;  %v11417_v56 = vmov 0  ;;  %v994_v12 = vsel %vm11216_vm3, %v945_v49, %v946_v9 }
  0x5f   : > { %v11418_v56 = vsel %vm6620_vm10, 4294967295, %v11417_v56  ;;  %v1090_v55 = vmul.f32 %v6190_v44, %v898_v6  ;;  %v1600_v34 = vadd.f32 %v1568_v43, %v1193_v62  ;;  %v1834_v29 = vmul.f32 %v6294_v53, %v6618_v17 }
  0x60   : > { %11419 = vst [vmem:[#allocation16_spill] sm:$0xff] %v11418_v56  ;;  %v1010_v38 = vsel %vm6620_vm10, %v994_v12, 0.0  ;;  %v1230_v46 = vrot.slane %v6603_v20, 7  ;;  %v1386_v11 = vsel %vm6620_vm10, %v6483_v2, 0.0  ;;  %v1426_v49 = vmul.f32 %v6136_v22, %v6404_v8 }
  0x61   : > { %v1122_v23 = vadd.f32 %v1090_v55, %v1050_v0  ;;  %v1162_v5 = vmul.f32 %v6178_v42, %v1010_v38  ;;  %v1866_v43 = vadd.f32 %v1834_v29, %v1794_v48  ;;  %v1465_v50 = vmul.f32 %v6229_v60, %v6442_v18 }
  0x62   : > { %v6641_v62 = vsel %vm11215_vm1, %v1229_v30, %v1230_v46  ;;  %v1537_v58 = vmul.f32 %v6207_v51, %v1386_v11  ;;  %v1723_v6 = vmul.f32 %v6246_v3, %v6603_v20  ;;  %v480_v8 = vadd.s32 64, %v6104_v10 }
  0x63   : > { %v1194_v28 = vadd.f32 %v1162_v5, %v1122_v23  ;;  %v1763_v2 = vmul.f32 %v6281_v40, %v6641_v62  ;;  %v1898_v0 = vadd.f32 %v1866_v43, %v1600_v34  ;;  %v6651_v48 = vld [vmem:[#allocation2 + $0x60] sm:$0xff]  ;;  %v1497_v12 = vadd.f32 %v1465_v50, %v1426_v49 }
  0x64   : > { %v6653_v30 = vmax.f32 %v450_v54, 0.0  ;;  %v849_v55 = vrot.slane %v6498_v61, 7  ;;  %v1327_v18 = vrot.slane %v6651_v48, 1  ;;  %v512_v38 = vand.u32 15, %v480_v8 }
  0x65   : > { %v1795_v29 = vadd.f32 %v1763_v2, %v1723_v6  ;;  %v947_v23 = vrot.slane %v6547_v13, 1  ;;  %5508 = vmatprep.mubr.msk.f32.mxu0 %vm11212_vm0, %v1898_v0  ;;  %v1569_v5 = vadd.f32 %v1537_v58, %v1497_v12  ;;  %v1051_v11 = vmul.f32 %v6123_v16, %v6498_v61 }
  0x66   : > { %784 = vst.msk [vmem:[#allocation2 + $0x68] sm:$0xff] %vm11212_vm0, %v6653_v30  ;;  %v897_v34 = vsel %vm11215_vm1, %v848_v4, %v849_v55  ;;  %v1231_v49 = vrot.slane %v6651_v48, 7  ;;  %v6668_v54 = vsel %vm11216_vm3, %v1326_v39, %v1327_v18  ;;  %vm6670_vm11 = vcmp.ge.s32.totalorder %v512_v38, 1 }
  0x67   : > { %v11420_v43 = vmov 0  ;;  %v993_v50 = vsel %vm11216_vm3, %v946_v9, %v947_v23  ;;  %v1427_v58 = vmul.f32 %v6136_v22, %v6461_v35  ;;  %v1601_v4 = vadd.f32 %v1569_v5, %v1194_v28  ;;  %v451_v28 = vld [vmem:[%s6117_s22 + $0x60] sm:$0xff] }
  0x68   : > { %v11421_v43 = vsel %vm6670_vm11, 4294967295, %v11420_v43  ;;  %v1683_v61 = vsel %vm6620_vm10, %v6668_v54, 0.0  ;;  %v914_v6 = vsel %vm6670_vm11, %v897_v34, 0.0  ;;  %v1163_v39 = vmul.f32 %v6178_v42, %v993_v50 }
  0x69   : > { %11422 = vst [vmem:[#allocation17_spill] sm:$0xff] %v11421_v43  ;;  %v1835_v2 = vmul.f32 %v6294_v53, %v1683_v61  ;;  %v1091_v8 = vmul.f32 %v6190_v44, %v914_v6  ;;  %v6688_v9 = vsel %vm11215_vm1, %v1230_v46, %v1231_v49  ;;  %v1291_v35 = vsel %vm6670_vm11, %v6492_v52, 0.0 }
  0x6a   : > { %v1466_v0 = vmul.f32 %v6229_v60, %v1291_v35  ;;  %v1538_v12 = vmul.f32 %v6207_v51, %v6535_v63  ;;  %v1643_v38 = vsel %vm6670_vm11, %v6688_v9, 0.0  ;;  %v1724_v5 = vmul.f32 %v6246_v3, %v6651_v48 }
  0x6b   : > { %v1867_v34 = vadd.f32 %v1835_v2, %v1795_v29  ;;  %v1123_v46 = vadd.f32 %v1091_v8, %v1051_v11  ;;  %v1764_v50 = vmul.f32 %v6281_v40, %v1643_v38  ;;  %v481_v61 = vadd.s32 72, %v6104_v10 }
  0x6c   : > { %v1498_v52 = vadd.f32 %v1466_v0, %v1427_v58  ;;  %v6704_v6 = vmax.f32 %v451_v28, 0.0  ;;  %v850_v35 = vrot.slane %v6547_v13, 7  ;;  %v948_v63 = vrot.slane %v6601_v15, 1 }
  0x6d   : > { %v1899_v56 = vadd.f32 %v1867_v34, %v1601_v4  ;;  %v6708_v41 = vld [vmem:[#allocation2 + $0x68] sm:$0xff]  ;;  %v1195_v43 = vadd.f32 %v1163_v39, %v1123_v46  ;;  %v1796_v14 = vadd.f32 %v1764_v50, %v1724_v5  ;;  %v513_v36 = vand.u32 15, %v481_v61 }
  0x6e   : > { %v1328_v29 = vrot.slane %v6708_v41, 1  ;;  %v1570_v11 = vadd.f32 %v1538_v12, %v1498_v52  ;;  %785 = vst.msk [vmem:[#allocation2 + $0x70] sm:$0xff] %vm11212_vm0, %v6704_v6  ;;  %v896_v58 = vsel %vm11215_vm1, %v849_v55, %v850_v35  ;;  %v992_v2 = vsel %vm11216_vm3, %v947_v23, %v948_v63 }
  0x6f   : > { %5509 = vmatmul.mubr.msk.f32.gmra.mrb[6].mxu0 %vm11212_vm0, %v1899_v56  ;;  %vm6718_vm12 = vcmp.le.s32.totalorder %v513_v36, 14  ;;  %v11423_v4 = vmov 0  ;;  %v1052_v39 = vmul.f32 %v6123_v16, %v6547_v13  ;;  %v1092_v8 = vmul.f32 %v6190_v44, %v896_v58 }
  0x70   : > { %v11424_v4 = vsel %vm6718_vm12, 4294967295, %v11423_v4  ;;  %v1232_v28 = vrot.slane %v6708_v41, 7  ;;  %v6728_v0 = vsel %vm11216_vm3, %v1327_v18, %v1328_v29  ;;  %v1602_v55 = vadd.f32 %v1570_v11, %v1195_v43  ;;  %v452_v18 = vld [vmem:[%s6117_s22 + $0x68] sm:$0xff] }
  0x71   : > { %11425 = vst [vmem:[#allocation18_spill] sm:$0xff] %v11424_v4  ;;  %v1012_v23 = vsel %vm6718_vm12, %v992_v2, 0.0  ;;  %v1388_v36 = vsel %vm6718_vm12, %v6568_v19, 0.0  ;;  %v1836_v56 = vmul.f32 %v6294_v53, %v6728_v0  ;;  %v1124_v13 = vadd.f32 %v1092_v8, %v1052_v39 }
  0x72   : > { %v1164_v12 = vmul.f32 %v6178_v42, %v1012_v23  ;;  %v6740_v38 = vsel %vm11215_vm1, %v1231_v49, %v1232_v28  ;;  %v1428_v43 = vmul.f32 %v6136_v22, %v6518_v25  ;;  %v1467_v5 = vmul.f32 %v6229_v60, %v6545_v47 }
  0x73   : > { %v1539_v34 = vmul.f32 %v6207_v51, %v1388_v36  ;;  %v1725_v19 = vmul.f32 %v6246_v3, %v6708_v41  ;;  %v1868_v46 = vadd.f32 %v1836_v56, %v1796_v14  ;;  %v1765_v61 = vmul.f32 %v6281_v40, %v6740_v38 }
  0x74   : > { %v1196_v50 = vadd.f32 %v1164_v12, %v1124_v13  ;;  %v482_v49 = vadd.s32 80, %v6104_v10  ;;  %v1499_v52 = vadd.f32 %v1467_v5, %v1428_v43  ;;  %v6753_v11 = vmax.f32 %v452_v18, 0.0 }
  0x75   : > { %v851_v25 = vrot.slane %v6601_v15, 7  ;;  %v949_v58 = vrot.slane %v6653_v30, 1  ;;  %v1900_v47 = vadd.f32 %v1868_v46, %v1602_v55  ;;  %v6757_v2 = vld [vmem:[#allocation2 + $0x70] sm:$0xff]  ;;  %v1797_v39 = vadd.f32 %v1765_v61, %v1725_v19 }
  0x76   : > { %v514_v8 = vand.u32 15, %v482_v49  ;;  %v1053_v14 = vmul.f32 %v6123_v16, %v6601_v15  ;;  %v1329_v23 = vrot.slane %v6757_v2, 1  ;;  %v1571_v36 = vadd.f32 %v1539_v34, %v1499_v52  ;;  %786 = vst.msk [vmem:[#allocation2 + $0x78] sm:$0xff] %vm11212_vm0, %v6753_v11  ;;  %v453_v46 = vld [vmem:[%s6117_s22 + $0x70] sm:$0xff] }
  0x77   : > { %v895_v56 = vsel %vm11215_vm1, %v850_v35, %v851_v25  ;;  %v991_v55 = vsel %vm11216_vm3, %v948_v63, %v949_v58  ;;  %5511 = vmatprep.mubr.msk.f32.mxu0 %vm11212_vm0, %v1900_v47  ;;  %v11426_v13 = vmov 0  ;;  %v1233_v12 = vrot.slane %v6757_v2, 7 }
  0x78   : > { %vm6769_vm13 = vcmp.ge.s32.totalorder %v514_v8, 1  ;;  %v1165_v15 = vmul.f32 %v6178_v42, %v991_v55  ;;  %v1429_v18 = vmul.f32 %v6136_v22, %v6549_v57  ;;  %v6779_v43 = vsel %vm11216_vm3, %v1328_v29, %v1329_v23 }
  0x79   : > { %v11427_v13 = vsel %vm6769_vm13, 4294967295, %v11426_v13  ;;  %v1603_v35 = vadd.f32 %v1571_v36, %v1196_v50  ;;  %v916_v63 = vsel %vm6769_vm13, %v895_v56, 0.0  ;;  %v1293_v5 = vsel %vm6769_vm13, %v6592_v7, 0.0 }
  0x7a   : > { %11428 = vst [vmem:[#allocation19_spill] sm:$0xff] %v11427_v13  ;;  %v1685_v34 = vsel %vm6718_vm12, %v6779_v43, 0.0  ;;  %v1093_v19 = vmul.f32 %v6190_v44, %v916_v63  ;;  %v6792_v57 = vsel %vm11215_vm1, %v1232_v28, %v1233_v12  ;;  %v1468_v29 = vmul.f32 %v6229_v60, %v1293_v5 }
  0x7b   : > { %v1837_v50 = vmul.f32 %v6294_v53, %v1685_v34  ;;  %v1540_v61 = vmul.f32 %v6207_v51, %v6618_v17  ;;  %v1645_v7 = vsel %vm6769_vm13, %v6792_v57, 0.0  ;;  %v1726_v49 = vmul.f32 %v6246_v3, %v6757_v2 }
  0x7c   : > { %v1125_v52 = vadd.f32 %v1093_v19, %v1053_v14  ;;  %v1500_v47 = vadd.f32 %v1468_v29, %v1429_v18  ;;  %v1766_v28 = vmul.f32 %v6281_v40, %v1645_v7  ;;  %v483_v8 = vadd.s32 88, %v6104_v10 }
  0x7d   : > { %v1869_v36 = vadd.f32 %v1837_v50, %v1797_v39  ;;  %v6806_v56 = vmax.f32 %v453_v46, 0.0  ;;  %v852_v55 = vrot.slane %v6653_v30, 7  ;;  %v950_v17 = vrot.slane %v6704_v6, 1  ;;  %v6810_v63 = vld [vmem:[#allocation2 + $0x78] sm:$0xff] }
  0x7e   : > { %v1197_v5 = vadd.f32 %v1165_v15, %v1125_v52  ;;  %v1572_v34 = vadd.f32 %v1540_v61, %v1500_v47  ;;  %v1798_v13 = vadd.f32 %v1766_v28, %v1726_v49  ;;  %v515_v4 = vand.u32 15, %v483_v8 }
  0x7f   : > { %v1901_v45 = vadd.f32 %v1869_v36, %v1603_v35  ;;  %v1330_v14 = vrot.slane %v6810_v63, 1  ;;  %787 = vst.msk [vmem:[#allocation2 + $0x80] sm:$0xff] %vm11212_vm0, %v6806_v56  ;;  %v894_v39 = vsel %vm11215_vm1, %v851_v25, %v852_v55  ;;  %v990_v18 = vsel %vm11216_vm3, %v949_v58, %v950_v17 }
  0x80   : > { %v1604_v19 = vadd.f32 %v1572_v34, %v1197_v5  ;;  %vm6819_vm14 = vcmp.le.s32.totalorder %v515_v4, 14  ;;  %v11429_v29 = vmov 0  ;;  %v1054_v15 = vmul.f32 %v6123_v16, %v6653_v30 }
  0x81   : > { %v11430_v29 = vsel %vm6819_vm14, 4294967295, %v11429_v29  ;;  %v1094_v35 = vmul.f32 %v6190_v44, %v894_v39  ;;  %5512 = vmatmul.mubr.msk.f32.gmra.mrb[8].mxu0 %vm11212_vm0, %v1901_v45  ;;  %v6829_v46 = vsel %vm11216_vm3, %v1329_v23, %v1330_v14  ;;  %v1014_v25 = vsel %vm6819_vm14, %v990_v18, 0.0  ;;  %v454_v23 = vld [vmem:[%s6117_s22 + $0x78] sm:$0xff] }
  0x82   : > { %11431 = vst [vmem:[#allocation20_spill] sm:$0xff] %v11430_v29  ;;  %v1234_v58 = vrot.slane %v6810_v63, 7  ;;  %v1390_v4 = vsel %vm6819_vm14, %v6668_v54, 0.0  ;;  %v1838_v30 = vmul.f32 %v6294_v53, %v6829_v46  ;;  %v1166_v61 = vmul.f32 %v6178_v42, %v1014_v25 }
  0x83   : > { %v1126_v50 = vadd.f32 %v1094_v35, %v1054_v15  ;;  %v1430_v45 = vmul.f32 %v6136_v22, %v6603_v20  ;;  %v1469_v49 = vmul.f32 %v6229_v60, %v6641_v62  ;;  %v1541_v52 = vmul.f32 %v6207_v51, %v1390_v4 }
  0x84   : > { %v6845_v7 = vsel %vm11215_vm1, %v1233_v12, %v1234_v58  ;;  %v1727_v54 = vmul.f32 %v6246_v3, %v6810_v63  ;;  %v1870_v47 = vadd.f32 %v1838_v30, %v1798_v13  ;;  %v484_v20 = vadd.s32 96, %v6104_v10 }
  0x85   : > { %v1198_v28 = vadd.f32 %v1166_v61, %v1126_v50  ;;  %v1767_v8 = vmul.f32 %v6281_v40, %v6845_v7  ;;  %v1501_v36 = vadd.f32 %v1469_v49, %v1430_v45  ;;  %v6855_v5 = vmax.f32 %v454_v23, 0.0 }
  0x86   : > { %v853_v12 = vrot.slane %v6704_v6, 7  ;;  %v951_v34 = vrot.slane %v6753_v11, 1  ;;  %v1902_v62 = vadd.f32 %v1870_v47, %v1604_v19  ;;  %v6859_v39 = vld [vmem:[#allocation2 + $0x80] sm:$0xff]  ;;  %v516_v15 = vand.u32 15, %v484_v20 }
  0x87   : > { %v1799_v18 = vadd.f32 %v1767_v8, %v1727_v54  ;;  %v1055_v13 = vmul.f32 %v6123_v16, %v6704_v6  ;;  %v1331_v35 = vrot.slane %v6859_v39, 1  ;;  %v1573_v25 = vadd.f32 %v1541_v52, %v1501_v36  ;;  %788 = vst.msk [vmem:[#allocation2 + $0x88] sm:$0xff] %vm11212_vm0, %v6855_v5 }
  0x88   : > { %v893_v4 = vsel %vm11215_vm1, %v852_v55, %v853_v12  ;;  %v989_v19 = vsel %vm11216_vm3, %v950_v17, %v951_v34  ;;  %5514 = vmatprep.mubr.msk.f32.mxu0 %vm11212_vm0, %v1902_v62  ;;  %vm6871_vm15 = vcmp.ge.s32.totalorder %v516_v15, 1  ;;  %v11432_v30 = vmov 0 }
  0x89   : > { %v11433_v30 = vsel %vm6871_vm15, 4294967295, %v11432_v30  ;;  %v1167_v16 = vmul.f32 %v6178_v42, %v989_v19  ;;  %v1235_v6 = vrot.slane %v6859_v39, 7  ;;  %v1431_v50 = vmul.f32 %v6136_v22, %v6651_v48 }
  0x8a   : > { %11434 = vst [vmem:[#allocation21_spill] sm:$0xff] %v11433_v30  ;;  %v6881_v61 = vsel %vm11216_vm3, %v1330_v14, %v1331_v35  ;;  %v1605_v55 = vadd.f32 %v1573_v25, %v1198_v28  ;;  %v918_v17 = vsel %vm6871_vm15, %v893_v4, 0.0  ;;  %v1295_v45 = vsel %vm6871_vm15, %v6688_v9, 0.0  ;;  %v455_v14 = vld [vmem:[%s6117_s22 + $0x80] sm:$0xff] }
  0x8b   : > { %v1687_v23 = vsel %vm6819_vm14, %v6881_v61, 0.0  ;;  %v1095_v49 = vmul.f32 %v6190_v44, %v918_v17  ;;  %v6894_v22 = vsel %vm11215_vm1, %v1234_v58, %v1235_v6  ;;  %v1470_v48 = vmul.f32 %v6229_v60, %v1295_v45 }
  0x8c   : > { %v1839_v52 = vmul.f32 %v6294_v53, %v1687_v23  ;;  %v1542_v54 = vmul.f32 %v6207_v51, %v6728_v0  ;;  %v1647_v9 = vsel %vm6871_vm15, %v6894_v22, 0.0  ;;  %v1728_v47 = vmul.f32 %v6246_v3, %v6859_v39 }
  0x8d   : > { %v1127_v28 = vadd.f32 %v1095_v49, %v1055_v13  ;;  %v1502_v8 = vadd.f32 %v1470_v48, %v1431_v50  ;;  %v1768_v58 = vmul.f32 %v6281_v40, %v1647_v9  ;;  %v485_v20 = vadd.s32 104, %v6104_v10 }
  0x8e   : > { %v1871_v36 = vadd.f32 %v1839_v52, %v1799_v18  ;;  %v6908_v62 = vmax.f32 %v455_v14, 0.0  ;;  %v854_v15 = vrot.slane %v6753_v11, 7  ;;  %v952_v0 = vrot.slane %v6806_v56, 1  ;;  %v6912_v25 = vld [vmem:[#allocation2 + $0x88] sm:$0xff] }
  0x8f   : > { %v1199_v4 = vadd.f32 %v1167_v16, %v1127_v28  ;;  %v1574_v19 = vadd.f32 %v1542_v54, %v1502_v8  ;;  %v1800_v17 = vadd.f32 %v1768_v58, %v1728_v47  ;;  %v517_v45 = vand.u32 15, %v485_v20  ;;  %v6928_v16 = vld [vmem:[%s11117_s2 + $0x4] ss:$0 sm:$0xff]  ;;  %v456_v28 = vld [vmem:[%s6117_s22 + $0x88] sm:$0xff] }
  0x90   : > { %v1903_v23 = vadd.f32 %v1871_v36, %v1605_v55  ;;  %v1332_v13 = vrot.slane %v6912_v25, 1  ;;  %789 = vst.msk [vmem:[#allocation2 + $0x90] sm:$0xff] %vm11212_vm0, %v6908_v62  ;;  %v892_v18 = vsel %vm11215_vm1, %v853_v12, %v854_v15  ;;  %v988_v50 = vsel %vm11216_vm3, %v951_v34, %v952_v0 }
  0x91   : > { %v1606_v49 = vadd.f32 %v1574_v19, %v1199_v4  ;;  %vm6921_vm15 = vcmp.le.s32.totalorder %v517_v45, 14  ;;  %v11435_v48 = vmov 0  ;;  %v1056_v55 = vmul.f32 %v6928_v16, %v6753_v11 }
  0x92   : > { %v11436_v48 = vsel %vm6921_vm15, 4294967295, %v11435_v48  ;;  %v1096_v14 = vmul.f32 %v6190_v44, %v892_v18  ;;  %5515 = vmatmul.mubr.msk.f32.gmra.mrb[10].mxu0 %vm11212_vm0, %v1903_v23  ;;  %v6936_v12 = vsel %vm11216_vm3, %v1331_v35, %v1332_v13  ;;  %v1016_v34 = vsel %vm6921_vm15, %v988_v50, 0.0  ;;  %v6950_v35 = vld [vmem:[%s11117_s2 + $0x1] ss:$0 sm:$0xff] }
  0x93   : > { %11437 = vst [vmem:[#allocation22_spill] sm:$0xff] %v11436_v48  ;;  %v1236_v52 = vrot.slane %v6912_v25, 7  ;;  %v1392_v54 = vsel %vm6921_vm15, %v6779_v43, 0.0  ;;  %v1840_v11 = vmul.f32 %v6294_v53, %v6936_v12  ;;  %v1168_v44 = vmul.f32 %v6178_v42, %v1016_v34 }
  0x94   : > { %v1128_v9 = vadd.f32 %v1096_v14, %v1056_v55  ;;  %v1432_v47 = vmul.f32 %v6950_v35, %v6708_v41  ;;  %v1471_v43 = vmul.f32 %v6229_v60, %v6740_v38  ;;  %v1543_v58 = vmul.f32 %v6207_v51, %v1392_v54 }
  0x95   : > { %v6957_v8 = vsel %vm11215_vm1, %v1235_v6, %v1236_v52  ;;  %v1729_v42 = vmul.f32 %v6246_v3, %v6912_v25  ;;  %v1872_v20 = vadd.f32 %v1840_v11, %v1800_v17  ;;  %v486_v41 = vadd.s32 112, %v6104_v10 }
  0x96   : > { %v1200_v36 = vadd.f32 %v1168_v44, %v1128_v9  ;;  %v1769_v4 = vmul.f32 %v6281_v40, %v6957_v8  ;;  %v1503_v19 = vadd.f32 %v1471_v43, %v1432_v47  ;;  %v6967_v45 = vmax.f32 %v456_v28, 0.0  ;;  %v7021_v43 = vld [vmem:[%s11117_s2] ss:$0 sm:$0xff] }
  0x97   : > { %v855_v6 = vrot.slane %v6806_v56, 7  ;;  %v953_v23 = vrot.slane %v6855_v5, 1  ;;  %v1904_v60 = vadd.f32 %v1872_v20, %v1606_v49  ;;  %v6971_v38 = vld [vmem:[#allocation2 + $0x90] sm:$0xff]  ;;  %v518_v18 = vand.u32 15, %v486_v41  ;;  %v7029_v20 = vld [vmem:[%s11117_s2 + $0x2] ss:$0 sm:$0xff] }
  0x98   : > { %v1801_v51 = vadd.f32 %v1769_v4, %v1729_v42  ;;  %v1057_v3 = vmul.f32 %v6928_v16, %v6806_v56  ;;  %v1333_v17 = vrot.slane %v6971_v38, 1  ;;  %v1575_v50 = vadd.f32 %v1543_v58, %v1503_v19  ;;  %790 = vst.msk [vmem:[#allocation2 + $0x98] sm:$0xff] %vm11212_vm0, %v6967_v45  ;;  %v6990_v56 = vld [vmem:[%s11117_s2 + $0x5] ss:$0 sm:$0xff]  ;;  %v457_v58 = vld [vmem:[%s6117_s22 + $0x90] sm:$0xff] }
  0x99   : > { %v891_v55 = vsel %vm11215_vm1, %v854_v15, %v855_v6  ;;  %v987_v14 = vsel %vm11216_vm3, %v952_v0, %v953_v23  ;;  %5517 = vmatprep.mubr.msk.f32.mxu0 %vm11212_vm0, %v1904_v60  ;;  %vm6983_vm14 = vcmp.ge.s32.totalorder %v518_v18, 1  ;;  %v11438_v49 = vmov 0  ;;  %v7039_v4 = vld [vmem:[%s11117_s2 + $0x7] ss:$0 sm:$0xff] }
  0x9a   : > { %v11439_v49 = vsel %vm6983_vm14, 4294967295, %v11438_v49  ;;  %v1169_v34 = vmul.f32 %v6990_v56, %v987_v14  ;;  %v1237_v54 = vrot.slane %v6971_v38, 7  ;;  %v1433_v15 = vmul.f32 %v6950_v35, %v6757_v2  ;;  %v7011_v2 = vld [vmem:[%s11117_s2 + $0x3] ss:$0 sm:$0xff] }
  0x9b   : > { %11440 = vst [vmem:[#allocation23_spill] sm:$0xff] %v11439_v49  ;;  %v6998_v0 = vsel %vm11216_vm3, %v1332_v13, %v1333_v17  ;;  %v1607_v11 = vadd.f32 %v1575_v50, %v1200_v36  ;;  %v920_v9 = vsel %vm6983_vm14, %v891_v55, 0.0  ;;  %v1297_v44 = vsel %vm6983_vm14, %v6792_v57, 0.0 }
  0x9c   : > { %v1689_v47 = vsel %vm6921_vm15, %v6998_v0, 0.0  ;;  %v1097_v13 = vmul.f32 %v7011_v2, %v920_v9  ;;  %v7016_v28 = vsel %vm11215_vm1, %v1236_v52, %v1237_v54  ;;  %v1472_v57 = vmul.f32 %v7021_v43, %v1297_v44 }
  0x9d   : > { %v1841_v42 = vmul.f32 %v6294_v53, %v1689_v47  ;;  %v1544_v36 = vmul.f32 %v7029_v20, %v6829_v46  ;;  %v1649_v52 = vsel %vm6983_vm14, %v7016_v28, 0.0  ;;  %v1730_v53 = vmul.f32 %v7039_v4, %v6971_v38 }
  0x9e   : > { %v1129_v41 = vadd.f32 %v1097_v13, %v1057_v3  ;;  %v1504_v19 = vadd.f32 %v1472_v57, %v1433_v15  ;;  %v1770_v60 = vmul.f32 %v6281_v40, %v1649_v52  ;;  %v487_v18 = vadd.s32 120, %v6104_v10 }
  0x9f   : > { %v1873_v50 = vadd.f32 %v1841_v42, %v1801_v51  ;;  %v7045_v46 = vmax.f32 %v457_v58, 0.0  ;;  %v856_v55 = vrot.slane %v6855_v5, 7  ;;  %v954_v14 = vrot.slane %v6908_v62, 1  ;;  %v7049_v9 = vld [vmem:[#allocation2 + $0x98] sm:$0xff] }
  0xa0   : > { %v1201_v44 = vadd.f32 %v1169_v34, %v1129_v41  ;;  %v1576_v47 = vadd.f32 %v1544_v36, %v1504_v19  ;;  %v1802_v49 = vadd.f32 %v1770_v60, %v1730_v53  ;;  %v519_v48 = vand.u32 15, %v487_v18  ;;  %v458_v36 = vld [vmem:[%s6117_s22 + $0x98] sm:$0xff]  ;;  %v7099_v18 = vld [vmem:[%s11117_s2 + $0x6] ss:$0 sm:$0xff] }
  0xa1   : > { %v1905_v30 = vadd.f32 %v1873_v50, %v1607_v11  ;;  %v1334_v3 = vrot.slane %v7049_v9, 1  ;;  %791 = vst.msk [vmem:[#allocation2 + $0xa0] sm:$0xff] %vm11212_vm0, %v7045_v46  ;;  %v890_v40 = vsel %vm11215_vm1, %v855_v6, %v856_v55  ;;  %v986_v51 = vsel %vm11216_vm3, %v953_v23, %v954_v14 }
  0xa2   : > { %v1608_v15 = vadd.f32 %v1576_v47, %v1201_v44  ;;  %vm7058_vm14 = vcmp.le.s32.totalorder %v519_v48, 14  ;;  %v11441_v13 = vmov 0  ;;  %v1058_v34 = vmul.f32 %v6928_v16, %v6855_v5  ;;  %v7079_v5 = vld [vmem:[%s11117_s2 + $0x8] ss:$0 sm:$0xff] }
  0xa3   : > { %v11442_v13 = vsel %vm7058_vm14, 4294967295, %v11441_v13  ;;  %v1098_v11 = vmul.f32 %v7011_v2, %v890_v40  ;;  %5518 = vmatmul.mubr.msk.f32.gmra.mrb[12].mxu0 %vm11212_vm0, %v1905_v30  ;;  %v7068_v57 = vsel %vm11216_vm3, %v1333_v17, %v1334_v3  ;;  %v1018_v6 = vsel %vm7058_vm14, %v986_v51, 0.0 }
  0xa4   : > { %11443 = vst [vmem:[#allocation24_spill] sm:$0xff] %v11442_v13  ;;  %v1238_v23 = vrot.slane %v7049_v9, 7  ;;  %v1394_v48 = vsel %vm7058_vm14, %v6881_v61, 0.0  ;;  %v1842_v30 = vmul.f32 %v7079_v5, %v7068_v57  ;;  %v1170_v17 = vmul.f32 %v6990_v56, %v1018_v6 }
  0xa5   : > { %v1130_v58 = vadd.f32 %v1098_v11, %v1058_v34  ;;  %v1434_v42 = vmul.f32 %v6950_v35, %v6810_v63  ;;  %v1473_v61 = vmul.f32 %v7021_v43, %v6845_v7  ;;  %v1545_v53 = vmul.f32 %v7029_v20, %v1394_v48 }
  0xa6   : > { %v7089_v52 = vsel %vm11215_vm1, %v1237_v54, %v1238_v23  ;;  %v1731_v41 = vmul.f32 %v7039_v4, %v7049_v9  ;;  %v1874_v19 = vadd.f32 %v1842_v30, %v1802_v49  ;;  %v488_v54 = vadd.s32 128, %v6104_v10 }
  0xa7   : > { %v1202_v60 = vadd.f32 %v1170_v17, %v1130_v58  ;;  %v1771_v63 = vmul.f32 %v7099_v18, %v7089_v52  ;;  %v1505_v50 = vadd.f32 %v1473_v61, %v1434_v42  ;;  %v7104_v44 = vmax.f32 %v458_v36, 0.0 }
  0xa8   : > { %v857_v7 = vrot.slane %v6908_v62, 7  ;;  %v955_v47 = vrot.slane %v6967_v45, 1  ;;  %v1906_v40 = vadd.f32 %v1874_v19, %v1608_v15  ;;  %v7108_v49 = vld [vmem:[#allocation2 + $0xa0] sm:$0xff]  ;;  %v520_v34 = vand.u32 15, %v488_v54 }
  0xa9   : > { %v1803_v51 = vadd.f32 %v1771_v63, %v1731_v41  ;;  %v1059_v11 = vmul.f32 %v6928_v16, %v6908_v62  ;;  %v1335_v6 = vrot.slane %v7108_v49, 1  ;;  %v1577_v48 = vadd.f32 %v1545_v53, %v1505_v50  ;;  %792 = vst.msk [vmem:[#allocation2 + $0xa8] sm:$0xff] %vm11212_vm0, %v7104_v44  ;;  %v459_v19 = vld [vmem:[%s6117_s22 + $0xa0] sm:$0xff] }
  0xaa   : > { %v889_v30 = vsel %vm11215_vm1, %v856_v55, %v857_v7  ;;  %v985_v15 = vsel %vm11216_vm3, %v954_v14, %v955_v47  ;;  %5520 = vmatprep.mubr.msk.f32.mxu0 %vm11212_vm0, %v1906_v40  ;;  %vm7120_vm15 = vcmp.ge.s32.totalorder %v520_v34, 1  ;;  %v11444_v58 = vmov 0 }
  0xab   : > { %v11445_v58 = vsel %vm7120_vm15, 4294967295, %v11444_v58  ;;  %v1171_v62 = vmul.f32 %v6990_v56, %v985_v15  ;;  %v1239_v17 = vrot.slane %v7108_v49, 7  ;;  %v1435_v42 = vmul.f32 %v6950_v35, %v6859_v39 }
  0xac   : > { %11446 = vst [vmem:[#allocation25_spill] sm:$0xff] %v11445_v58  ;;  %v7130_v36 = vsel %vm11216_vm3, %v1334_v3, %v1335_v6  ;;  %v1609_v55 = vadd.f32 %v1577_v48, %v1202_v60  ;;  %v922_v14 = vsel %vm7120_vm15, %v889_v30, 0.0  ;;  %v1299_v61 = vsel %vm7120_vm15, %v6894_v22, 0.0 }
  0xad   : > { %v1691_v53 = vsel %vm7058_vm14, %v7130_v36, 0.0  ;;  %v1099_v41 = vmul.f32 %v7011_v2, %v922_v14  ;;  %v7143_v39 = vsel %vm11215_vm1, %v1238_v23, %v1239_v17  ;;  %v1474_v3 = vmul.f32 %v7021_v43, %v1299_v61 }
  0xae   : > { %v1843_v60 = vmul.f32 %v7079_v5, %v1691_v53  ;;  %v1546_v63 = vmul.f32 %v7029_v20, %v6936_v12  ;;  %v1651_v22 = vsel %vm7120_vm15, %v7143_v39, 0.0  ;;  %v1732_v54 = vmul.f32 %v7039_v4, %v7108_v49 }
  0xaf   : > { %v1131_v50 = vadd.f32 %v1099_v41, %v1059_v11  ;;  %v1506_v40 = vadd.f32 %v1474_v3, %v1435_v42  ;;  %v1772_v23 = vmul.f32 %v7099_v18, %v1651_v22  ;;  %v489_v34 = vadd.s32 136, %v6104_v10 }
  0xb0   : > { %v1875_v48 = vadd.f32 %v1843_v60, %v1803_v51  ;;  %v7157_v30 = vmax.f32 %v459_v19, 0.0  ;;  %v858_v15 = vrot.slane %v6967_v45, 7  ;;  %v956_v12 = vrot.slane %v7045_v46, 1  ;;  %v7161_v14 = vld [vmem:[#allocation2 + $0xa8] sm:$0xff] }
  0xb1   : > { %v1203_v61 = vadd.f32 %v1171_v62, %v1131_v50  ;;  %v1578_v53 = vadd.f32 %v1546_v63, %v1506_v40  ;;  %v1804_v58 = vadd.f32 %v1772_v23, %v1732_v54  ;;  %v521_v13 = vand.u32 15, %v489_v34 }
  0xb2   : > { %v1907_v29 = vadd.f32 %v1875_v48, %v1609_v55  ;;  %v1336_v11 = vrot.slane %v7161_v14, 1  ;;  %793 = vst.msk [vmem:[#allocation2 + $0xb0] sm:$0xff] %vm11212_vm0, %v7157_v30  ;;  %v888_v51 = vsel %vm11215_vm1, %v857_v7, %v858_v15  ;;  %v984_v42 = vsel %vm11216_vm3, %v955_v47, %v956_v12 }
  0xb3   : > { %v1610_v41 = vadd.f32 %v1578_v53, %v1203_v61  ;;  %vm7170_vm15 = vcmp.le.s32.totalorder %v521_v13, 14  ;;  %v11447_v3 = vmov 0  ;;  %v1060_v62 = vmul.f32 %v6928_v16, %v6967_v45 }
  0xb4   : > { %v11448_v3 = vsel %vm7170_vm15, 4294967295, %v11447_v3  ;;  %v1100_v55 = vmul.f32 %v7011_v2, %v888_v51  ;;  %5521 = vmatmul.mubr.msk.f32.gmra.mrb[14].mxu0 %vm11212_vm0, %v1907_v29  ;;  %v7180_v19 = vsel %vm11216_vm3, %v1335_v6, %v1336_v11  ;;  %v1020_v7 = vsel %vm7170_vm15, %v984_v42, 0.0  ;;  %v460_v6 = vld [vmem:[%s6117_s22 + $0xa8] sm:$0xff] }
  0xb5   : > { %11449 = vst [vmem:[#allocation26_spill] sm:$0xff] %v11448_v3  ;;  %v1240_v47 = vrot.slane %v7161_v14, 7  ;;  %v1396_v13 = vsel %vm7170_vm15, %v6998_v0, 0.0  ;;  %v1844_v45 = vmul.f32 %v7079_v5, %v7180_v19  ;;  %v1172_v63 = vmul.f32 %v6990_v56, %v1020_v7 }
  0xb6   : > { %v1132_v60 = vadd.f32 %v1100_v55, %v1060_v62  ;;  %v1436_v29 = vmul.f32 %v6950_v35, %v6912_v25  ;;  %v1475_v54 = vmul.f32 %v7021_v43, %v6957_v8  ;;  %v1547_v50 = vmul.f32 %v7029_v20, %v1396_v13 }
  0xb7   : > { %v7196_v22 = vsel %vm11215_vm1, %v1239_v17, %v1240_v47  ;;  %v1733_v0 = vmul.f32 %v7039_v4, %v7161_v14  ;;  %v1876_v40 = vadd.f32 %v1844_v45, %v1804_v58  ;;  %v490_v25 = vadd.s32 144, %v6104_v10 }
  0xb8   : > { %v1204_v23 = vadd.f32 %v1172_v63, %v1132_v60  ;;  %v1773_v34 = vmul.f32 %v7099_v18, %v7196_v22  ;;  %v1507_v48 = vadd.f32 %v1475_v54, %v1436_v29  ;;  %v7206_v61 = vmax.f32 %v460_v6, 0.0 }
  0xb9   : > { %v859_v17 = vrot.slane %v7045_v46, 7  ;;  %v957_v53 = vrot.slane %v7104_v44, 1  ;;  %v1908_v8 = vadd.f32 %v1876_v40, %v1610_v41  ;;  %v7210_v51 = vld [vmem:[#allocation2 + $0xb0] sm:$0xff]  ;;  %v522_v62 = vand.u32 15, %v490_v25 }
  0xba   : > { %v1805_v42 = vadd.f32 %v1773_v34, %v1733_v0  ;;  %v1061_v58 = vmul.f32 %v6928_v16, %v7045_v46  ;;  %v1337_v55 = vrot.slane %v7210_v51, 1  ;;  %v1579_v7 = vadd.f32 %v1547_v50, %v1507_v48  ;;  %794 = vst.msk [vmem:[#allocation2 + $0xb8] sm:$0xff] %vm11212_vm0, %v7206_v61  ;;  %v461_v0 = vld [vmem:[%s6117_s22 + $0xb0] sm:$0xff] }
  0xbb   : > { %v887_v13 = vsel %vm11215_vm1, %v858_v15, %v859_v17  ;;  %v983_v41 = vsel %vm11216_vm3, %v956_v12, %v957_v53  ;;  %5523 = vmatprep.mubr.msk.f32.mxu0 %vm11212_vm0, %v1908_v8  ;;  %vm7222_vm14 = vcmp.ge.s32.totalorder %v522_v62, 1  ;;  %v11450_v45 = vmov 0 }
  0xbc   : > { %v11451_v45 = vsel %vm7222_vm14, 4294967295, %v11450_v45  ;;  %v1173_v46 = vmul.f32 %v6990_v56, %v983_v41  ;;  %v1241_v60 = vrot.slane %v7210_v51, 7  ;;  %v1437_v63 = vmul.f32 %v6950_v35, %v6971_v38 }
  0xbd   : > { %11452 = vst [vmem:[#allocation27_spill] sm:$0xff] %v11451_v45  ;;  %v7232_v29 = vsel %vm11216_vm3, %v1336_v11, %v1337_v55  ;;  %v1611_v15 = vadd.f32 %v1579_v7, %v1204_v23  ;;  %v924_v12 = vsel %vm7222_vm14, %v887_v13, 0.0  ;;  %v1301_v6 = vsel %vm7222_vm14, %v7016_v28, 0.0 }
  0xbe   : > { %v1693_v54 = vsel %vm7170_vm15, %v7232_v29, 0.0  ;;  %v1101_v50 = vmul.f32 %v7011_v2, %v924_v12  ;;  %v7245_v38 = vsel %vm11215_vm1, %v1240_v47, %v1241_v60  ;;  %v1476_v11 = vmul.f32 %v7021_v43, %v1301_v6 }
  0xbf   : > { %v1845_v40 = vmul.f32 %v7079_v5, %v1693_v54  ;;  %v1548_v23 = vmul.f32 %v7029_v20, %v7068_v57  ;;  %v1653_v28 = vsel %vm7222_vm14, %v7245_v38, 0.0  ;;  %v1734_v34 = vmul.f32 %v7039_v4, %v7210_v51 }
  0xc0   : > { %v1133_v25 = vadd.f32 %v1101_v50, %v1061_v58  ;;  %v1508_v48 = vadd.f32 %v1476_v11, %v1437_v63  ;;  %v1774_v47 = vmul.f32 %v7099_v18, %v1653_v28  ;;  %v491_v8 = vadd.s32 152, %v6104_v10 }
  0xc1   : > { %v1877_v62 = vadd.f32 %v1845_v40, %v1805_v42  ;;  %v7259_v7 = vmax.f32 %v461_v0, 0.0  ;;  %v860_v13 = vrot.slane %v7104_v44, 7  ;;  %v958_v57 = vrot.slane %v7157_v30, 1  ;;  %v7263_v41 = vld [vmem:[#allocation2 + $0xb8] sm:$0xff] }
  0xc2   : > { %v1205_v12 = vadd.f32 %v1173_v46, %v1133_v25  ;;  %v1580_v6 = vadd.f32 %v1548_v23, %v1508_v48  ;;  %v1806_v54 = vadd.f32 %v1774_v47, %v1734_v34  ;;  %v523_v45 = vand.u32 15, %v491_v8 }
  0xc3   : > { %v1909_v3 = vadd.f32 %v1877_v62, %v1611_v15  ;;  %v1338_v58 = vrot.slane %v7263_v41, 1  ;;  %795 = vst.msk [vmem:[#allocation2 + $0xc0] sm:$0xff] %vm11212_vm0, %v7259_v7  ;;  %v886_v42 = vsel %vm11215_vm1, %v859_v17, %v860_v13  ;;  %v982_v63 = vsel %vm11216_vm3, %v957_v53, %v958_v57 }
  0xc4   : > { %v1612_v50 = vadd.f32 %v1580_v6, %v1205_v12  ;;  %vm7272_vm14 = vcmp.le.s32.totalorder %v523_v45, 14  ;;  %v11453_v11 = vmov 0  ;;  %v1062_v46 = vmul.f32 %v6928_v16, %v7104_v44 }
  0xc5   : > { %v11454_v11 = vsel %vm7272_vm14, 4294967295, %v11453_v11  ;;  %v1102_v15 = vmul.f32 %v7011_v2, %v886_v42  ;;  %5524 = vmatmul.mubr.msk.f32.gmra.mrb[16].mxu0 %vm11212_vm0, %v1909_v3  ;;  %v7282_v0 = vsel %vm11216_vm3, %v1337_v55, %v1338_v58  ;;  %v1022_v17 = vsel %vm7272_vm14, %v982_v63, 0.0  ;;  %v462_v55 = vld [vmem:[%s6117_s22 + $0xb8] sm:$0xff] }
  0xc6   : > { %11455 = vst [vmem:[#allocation28_spill] sm:$0xff] %v11454_v11  ;;  %v1242_v53 = vrot.slane %v7263_v41, 7  ;;  %v1398_v45 = vsel %vm7272_vm14, %v7130_v36, 0.0  ;;  %v1846_v44 = vmul.f32 %v7079_v5, %v7282_v0  ;;  %v1174_v23 = vmul.f32 %v6990_v56, %v1022_v17 }
  0xc7   : > { %v1134_v40 = vadd.f32 %v1102_v15, %v1062_v46  ;;  %v1438_v3 = vmul.f32 %v6950_v35, %v7049_v9  ;;  %v1477_v34 = vmul.f32 %v7021_v43, %v7089_v52  ;;  %v1549_v25 = vmul.f32 %v7029_v20, %v1398_v45 }
  0xc8   : > { %v7298_v28 = vsel %vm11215_vm1, %v1241_v60, %v1242_v53  ;;  %v1735_v36 = vmul.f32 %v7039_v4, %v7263_v41  ;;  %v1878_v48 = vadd.f32 %v1846_v44, %v1806_v54  ;;  %v492_v9 = vadd.s32 160, %v6104_v10 }
  0xc9   : > { %v1206_v47 = vadd.f32 %v1174_v23, %v1134_v40  ;;  %v1775_v8 = vmul.f32 %v7099_v18, %v7298_v28  ;;  %v1509_v62 = vadd.f32 %v1477_v34, %v1438_v3  ;;  %v7308_v12 = vmax.f32 %v462_v55, 0.0 }
  0xca   : > { %v861_v60 = vrot.slane %v7157_v30, 7  ;;  %v959_v6 = vrot.slane %v7206_v61, 1  ;;  %v1910_v52 = vadd.f32 %v1878_v48, %v1612_v50  ;;  %v7312_v42 = vld [vmem:[#allocation2 + $0xc0] sm:$0xff]  ;;  %v524_v46 = vand.u32 15, %v492_v9 }
  0xcb   : > { %v1807_v63 = vadd.f32 %v1775_v8, %v1735_v36  ;;  %v1063_v54 = vmul.f32 %v6928_v16, %v7157_v30  ;;  %v1339_v15 = vrot.slane %v7312_v42, 1  ;;  %v1581_v17 = vadd.f32 %v1549_v25, %v1509_v62  ;;  %796 = vst.msk [vmem:[#allocation2 + $0xc8] sm:$0xff] %vm11212_vm0, %v7308_v12  ;;  %v463_v36 = vld [vmem:[%s6117_s22 + $0xc0] sm:$0xff] }
  0xcc   : > { %v885_v45 = vsel %vm11215_vm1, %v860_v13, %v861_v60  ;;  %v981_v50 = vsel %vm11216_vm3, %v958_v57, %v959_v6  ;;  %5526 = vmatprep.mubr.msk.f32.mxu0 %vm11212_vm0, %v1910_v52  ;;  %vm7324_vm15 = vcmp.ge.s32.totalorder %v524_v46, 1  ;;  %v11456_v44 = vmov 0 }
  0xcd   : > { %v11457_v44 = vsel %vm7324_vm15, 4294967295, %v11456_v44  ;;  %v1175_v30 = vmul.f32 %v6990_v56, %v981_v50  ;;  %v1243_v40 = vrot.slane %v7312_v42, 7  ;;  %v1439_v23 = vmul.f32 %v6950_v35, %v7108_v49 }
  0xce   : > { %11458 = vst [vmem:[#allocation29_spill] sm:$0xff] %v11457_v44  ;;  %v7334_v3 = vsel %vm11216_vm3, %v1338_v58, %v1339_v15  ;;  %v1613_v13 = vadd.f32 %v1581_v17, %v1206_v47  ;;  %v926_v57 = vsel %vm7324_vm15, %v885_v45, 0.0  ;;  %v1303_v55 = vsel %vm7324_vm15, %v7143_v39, 0.0 }
  0xcf   : > { %v1695_v34 = vsel %vm7272_vm14, %v7334_v3, 0.0  ;;  %v1103_v25 = vmul.f32 %v7011_v2, %v926_v57  ;;  %v7347_v49 = vsel %vm11215_vm1, %v1242_v53, %v1243_v40  ;;  %v1478_v58 = vmul.f32 %v7021_v43, %v1303_v55 }
  0xd0   : > { %v1847_v48 = vmul.f32 %v7079_v5, %v1695_v34  ;;  %v1550_v47 = vmul.f32 %v7029_v20, %v7180_v19  ;;  %v1655_v39 = vsel %vm7324_vm15, %v7347_v49, 0.0  ;;  %v1736_v8 = vmul.f32 %v7039_v4, %v7312_v42 }
  0xd1   : > { %v1135_v9 = vadd.f32 %v1103_v25, %v1063_v54  ;;  %v1510_v62 = vadd.f32 %v1478_v58, %v1439_v23  ;;  %v1776_v53 = vmul.f32 %v7099_v18, %v1655_v39  ;;  %v493_v52 = vadd.s32 168, %v6104_v10 }
  0xd2   : > { %v1879_v46 = vadd.f32 %v1847_v48, %v1807_v63  ;;  %v7361_v17 = vmax.f32 %v463_v36, 0.0  ;;  %v862_v45 = vrot.slane %v7206_v61, 7  ;;  %v960_v19 = vrot.slane %v7259_v7, 1  ;;  %v7365_v50 = vld [vmem:[#allocation2 + $0xc8] sm:$0xff] }
  0xd3   : > { %v1207_v57 = vadd.f32 %v1175_v30, %v1135_v9  ;;  %v1582_v55 = vadd.f32 %v1550_v47, %v1510_v62  ;;  %v1808_v34 = vadd.f32 %v1776_v53, %v1736_v8  ;;  %v525_v44 = vand.u32 15, %v493_v52 }
  0xd4   : > { %v1911_v11 = vadd.f32 %v1879_v46, %v1613_v13  ;;  %v1340_v54 = vrot.slane %v7365_v50, 1  ;;  %797 = vst.msk [vmem:[#allocation2 + $0xd0] sm:$0xff] %vm11212_vm0, %v7361_v17  ;;  %v884_v63 = vsel %vm11215_vm1, %v861_v60, %v862_v45  ;;  %v980_v23 = vsel %vm11216_vm3, %v959_v6, %v960_v19 }
  0xd5   : > { %v1614_v25 = vadd.f32 %v1582_v55, %v1207_v57  ;;  %vm7374_vm15 = vcmp.le.s32.totalorder %v525_v44, 14  ;;  %v11459_v58 = vmov 0  ;;  %v1064_v30 = vmul.f32 %v6928_v16, %v7206_v61 }
  0xd6   : > { %v11460_v58 = vsel %vm7374_vm15, 4294967295, %v11459_v58  ;;  %v1104_v13 = vmul.f32 %v7011_v2, %v884_v63  ;;  %5527 = vmatmul.mubr.msk.f32.gmra.mrb[18].mxu0 %vm11212_vm0, %v1911_v11  ;;  %v7384_v36 = vsel %vm11216_vm3, %v1339_v15, %v1340_v54  ;;  %v1024_v60 = vsel %vm7374_vm15, %v980_v23, 0.0  ;;  %v464_v15 = vld [vmem:[%s6117_s22 + $0xc8] sm:$0xff] }
  0xd7   : > { %11461 = vst [vmem:[#allocation30_spill] sm:$0xff] %v11460_v58  ;;  %v1244_v6 = vrot.slane %v7365_v50, 7  ;;  %v1400_v44 = vsel %vm7374_vm15, %v7232_v29, 0.0  ;;  %v1848_v61 = vmul.f32 %v7079_v5, %v7384_v36  ;;  %v1176_v47 = vmul.f32 %v6990_v56, %v1024_v60 }
  0xd8   : > { %v1136_v48 = vadd.f32 %v1104_v13, %v1064_v30  ;;  %v1440_v11 = vmul.f32 %v6950_v35, %v7161_v14  ;;  %v1479_v8 = vmul.f32 %v7021_v43, %v7196_v22  ;;  %v1551_v9 = vmul.f32 %v7029_v20, %v1400_v44 }
  0xd9   : > { %v7400_v39 = vsel %vm11215_vm1, %v1243_v40, %v1244_v6  ;;  %v1737_v29 = vmul.f32 %v7039_v4, %v7365_v50  ;;  %v1880_v62 = vadd.f32 %v1848_v61, %v1808_v34  ;;  %v494_v14 = vadd.s32 176, %v6104_v10 }
  0xda   : > { %v1208_v53 = vadd.f32 %v1176_v47, %v1136_v48  ;;  %v1777_v52 = vmul.f32 %v7099_v18, %v7400_v39  ;;  %v1511_v46 = vadd.f32 %v1479_v8, %v1440_v11  ;;  %v7410_v57 = vmax.f32 %v464_v15, 0.0 }
  0xdb   : > { %v863_v40 = vrot.slane %v7259_v7, 7  ;;  %v961_v55 = vrot.slane %v7308_v12, 1  ;;  %v1912_v22 = vadd.f32 %v1880_v62, %v1614_v25  ;;  %v7414_v63 = vld [vmem:[#allocation2 + $0xd0] sm:$0xff]  ;;  %v526_v30 = vand.u32 15, %v494_v14 }
  0xdc   : > { %v1809_v23 = vadd.f32 %v1777_v52, %v1737_v29  ;;  %v1065_v34 = vmul.f32 %v6928_v16, %v7259_v7  ;;  %v1341_v13 = vrot.slane %v7414_v63, 1  ;;  %v1583_v60 = vadd.f32 %v1551_v9, %v1511_v46  ;;  %798 = vst.msk [vmem:[#allocation2 + $0xd8] sm:$0xff] %vm11212_vm0, %v7410_v57  ;;  %v465_v29 = vld [vmem:[%s6117_s22 + $0xd0] sm:$0xff] }
  0xdd   : > { %v883_v44 = vsel %vm11215_vm1, %v862_v45, %v863_v40  ;;  %v979_v25 = vsel %vm11216_vm3, %v960_v19, %v961_v55  ;;  %5529 = vmatprep.mubr.msk.f32.mxu0 %vm11212_vm0, %v1912_v22  ;;  %vm7426_vm14 = vcmp.ge.s32.totalorder %v526_v30, 1  ;;  %v11462_v61 = vmov 0 }
  0xde   : > { %v11463_v61 = vsel %vm7426_vm14, 4294967295, %v11462_v61  ;;  %v1177_v7 = vmul.f32 %v6990_v56, %v979_v25  ;;  %v1245_v48 = vrot.slane %v7414_v63, 7  ;;  %v1441_v47 = vmul.f32 %v6950_v35, %v7210_v51 }
  0xdf   : > { %11464 = vst [vmem:[#allocation31_spill] sm:$0xff] %v11463_v61  ;;  %v7436_v11 = vsel %vm11216_vm3, %v1340_v54, %v1341_v13  ;;  %v1615_v45 = vadd.f32 %v1583_v60, %v1208_v53  ;;  %v928_v19 = vsel %vm7426_vm14, %v883_v44, 0.0  ;;  %v1305_v15 = vsel %vm7426_vm14, %v7245_v38, 0.0 }
  0xe0   : > { %v1697_v8 = vsel %vm7374_vm15, %v7436_v11, 0.0  ;;  %v1105_v9 = vmul.f32 %v7011_v2, %v928_v19  ;;  %v7449_v51 = vsel %vm11215_vm1, %v1244_v6, %v1245_v48  ;;  %v1480_v54 = vmul.f32 %v7021_v43, %v1305_v15 }
  0xe1   : > { %v1849_v62 = vmul.f32 %v7079_v5, %v1697_v8  ;;  %v1552_v53 = vmul.f32 %v7029_v20, %v7282_v0  ;;  %v1657_v38 = vsel %vm7426_vm14, %v7449_v51, 0.0  ;;  %v1738_v52 = vmul.f32 %v7039_v4, %v7414_v63 }
  0xe2   : > { %v1137_v14 = vadd.f32 %v1105_v9, %v1065_v34  ;;  %v1512_v46 = vadd.f32 %v1480_v54, %v1441_v47  ;;  %v1778_v6 = vmul.f32 %v7099_v18, %v1657_v38  ;;  %v495_v22 = vadd.s32 184, %v6104_v10 }
  0xe3   : > { %v1881_v30 = vadd.f32 %v1849_v62, %v1809_v23  ;;  %v7463_v60 = vmax.f32 %v465_v29, 0.0  ;;  %v864_v44 = vrot.slane %v7308_v12, 7  ;;  %v962_v0 = vrot.slane %v7361_v17, 1  ;;  %v7467_v25 = vld [vmem:[#allocation2 + $0xd8] sm:$0xff] }
  0xe4   : > { %v1209_v19 = vadd.f32 %v1177_v7, %v1137_v14  ;;  %v1584_v15 = vadd.f32 %v1552_v53, %v1512_v46  ;;  %v1810_v8 = vadd.f32 %v1778_v6, %v1738_v52  ;;  %v527_v61 = vand.u32 15, %v495_v22 }
  0xe5   : > { %v1913_v58 = vadd.f32 %v1881_v30, %v1615_v45  ;;  %v1342_v34 = vrot.slane %v7467_v25, 1  ;;  %799 = vst.msk [vmem:[#allocation2 + $0xe0] sm:$0xff] %vm11212_vm0, %v7463_v60  ;;  %v882_v23 = vsel %vm11215_vm1, %v863_v40, %v864_v44  ;;  %v978_v47 = vsel %vm11216_vm3, %v961_v55, %v962_v0 }
  0xe6   : > { %v1616_v9 = vadd.f32 %v1584_v15, %v1209_v19  ;;  %vm7476_vm14 = vcmp.le.s32.totalorder %v527_v61, 14  ;;  %v11465_v54 = vmov 0  ;;  %v1066_v7 = vmul.f32 %v6928_v16, %v7308_v12 }
  0xe7   : > { %v11466_v54 = vsel %vm7476_vm14, 4294967295, %v11465_v54  ;;  %v1106_v45 = vmul.f32 %v7011_v2, %v882_v23  ;;  %5530 = vmatmul.mubr.msk.f32.gmra.mrb[20].mxu0 %vm11212_vm0, %v1913_v58  ;;  %v7486_v29 = vsel %vm11216_vm3, %v1341_v13, %v1342_v34  ;;  %v1026_v40 = vsel %vm7476_vm14, %v978_v47, 0.0  ;;  %v466_v13 = vld [vmem:[%s6117_s22 + $0xd8] sm:$0xff] }
  0xe8   : > { %11467 = vst [vmem:[#allocation32_spill] sm:$0xff] %v11466_v54  ;;  %v1246_v55 = vrot.slane %v7467_v25, 7  ;;  %v1402_v61 = vsel %vm7476_vm14, %v7334_v3, 0.0  ;;  %v1850_v12 = vmul.f32 %v7079_v5, %v7486_v29  ;;  %v1178_v53 = vmul.f32 %v6990_v56, %v1026_v40 }
  0xe9   : > { %v1138_v62 = vadd.f32 %v1106_v45, %v1066_v7  ;;  %v1442_v58 = vmul.f32 %v6950_v35, %v7263_v41  ;;  %v1481_v52 = vmul.f32 %v7021_v43, %v7298_v28  ;;  %v1553_v14 = vmul.f32 %v7029_v20, %v1402_v61 }
  0xea   : > { %v7502_v38 = vsel %vm11215_vm1, %v1245_v48, %v1246_v55  ;;  %v1739_v3 = vmul.f32 %v7039_v4, %v7467_v25  ;;  %v1882_v46 = vadd.f32 %v1850_v12, %v1810_v8  ;;  %v496_v41 = vadd.s32 192, %v6104_v10 }
  0xeb   : > { %v1210_v6 = vadd.f32 %v1178_v53, %v1138_v62  ;;  %v1779_v22 = vmul.f32 %v7099_v18, %v7502_v38  ;;  %v1513_v30 = vadd.f32 %v1481_v52, %v1442_v58  ;;  %v7512_v19 = vmax.f32 %v466_v13, 0.0 }
  0xec   : > { %v865_v48 = vrot.slane %v7361_v17, 7  ;;  %v963_v15 = vrot.slane %v7410_v57, 1  ;;  %v1914_v28 = vadd.f32 %v1882_v46, %v1616_v9  ;;  %v7516_v23 = vld [vmem:[#allocation2 + $0xe0] sm:$0xff]  ;;  %v528_v7 = vand.u32 15, %v496_v41 }
  0xed   : > { %v1811_v47 = vadd.f32 %v1779_v22, %v1739_v3  ;;  %v1067_v8 = vmul.f32 %v6928_v16, %v7361_v17  ;;  %v1343_v45 = vrot.slane %v7516_v23, 1  ;;  %v1585_v40 = vadd.f32 %v1553_v14, %v1513_v30  ;;  %800 = vst.msk [vmem:[#allocation2 + $0xe8] sm:$0xff] %vm11212_vm0, %v7512_v19  ;;  %v467_v3 = vld [vmem:[%s6117_s22 + $0xe0] sm:$0xff] }
  0xee   : > { %v881_v61 = vsel %vm11215_vm1, %v864_v44, %v865_v48  ;;  %v977_v9 = vsel %vm11216_vm3, %v962_v0, %v963_v15  ;;  %5532 = vmatprep.mubr.msk.f32.mxu0 %vm11212_vm0, %v1914_v28  ;;  %vm7528_vm15 = vcmp.ge.s32.totalorder %v528_v7, 1  ;;  %v11468_v12 = vmov 0 }
  0xef   : > { %v11469_v12 = vsel %vm7528_vm15, 4294967295, %v11468_v12  ;;  %v1179_v17 = vmul.f32 %v6990_v56, %v977_v9  ;;  %v1247_v62 = vrot.slane %v7516_v23, 7  ;;  %v1443_v53 = vmul.f32 %v6950_v35, %v7312_v42 }
  0xf0   : > { %11470 = vst [vmem:[#allocation33_spill] sm:$0xff] %v11469_v12  ;;  %v7538_v58 = vsel %vm11216_vm3, %v1342_v34, %v1343_v45  ;;  %v1617_v44 = vadd.f32 %v1585_v40, %v1210_v6  ;;  %v930_v0 = vsel %vm7528_vm15, %v881_v61, 0.0  ;;  %v1307_v13 = vsel %vm7528_vm15, %v7347_v49, 0.0 }
  0xf1   : > { %v1699_v52 = vsel %vm7476_vm14, %v7538_v58, 0.0  ;;  %v1107_v14 = vmul.f32 %v7011_v2, %v930_v0  ;;  %v7551_v42 = vsel %vm11215_vm1, %v1246_v55, %v1247_v62  ;;  %v1482_v34 = vmul.f32 %v7021_v43, %v1307_v13 }
  0xf2   : > { %v1851_v46 = vmul.f32 %v7079_v5, %v1699_v52  ;;  %v1554_v6 = vmul.f32 %v7029_v20, %v7384_v36  ;;  %v1659_v49 = vsel %vm7528_vm15, %v7551_v42, 0.0  ;;  %v1740_v22 = vmul.f32 %v7039_v4, %v7516_v23 }
  0xf3   : > { %v1139_v41 = vadd.f32 %v1107_v14, %v1067_v8  ;;  %v1514_v30 = vadd.f32 %v1482_v34, %v1443_v53  ;;  %v1780_v55 = vmul.f32 %v7099_v18, %v1659_v49  ;;  %v497_v28 = vadd.s32 200, %v6104_v10 }
  0xf4   : > { %v1883_v7 = vadd.f32 %v1851_v46, %v1811_v47  ;;  %v7565_v40 = vmax.f32 %v467_v3, 0.0  ;;  %v866_v61 = vrot.slane %v7410_v57, 7  ;;  %v964_v36 = vrot.slane %v7463_v60, 1  ;;  %v7569_v9 = vld [vmem:[#allocation2 + $0xe8] sm:$0xff] }
  0xf5   : > { %v1211_v0 = vadd.f32 %v1179_v17, %v1139_v41  ;;  %v1586_v13 = vadd.f32 %v1554_v6, %v1514_v30  ;;  %v1812_v52 = vadd.f32 %v1780_v55, %v1740_v22  ;;  %v529_v12 = vand.u32 15, %v497_v28 }
  0xf6   : > { %v1915_v54 = vadd.f32 %v1883_v7, %v1617_v44  ;;  %v1344_v8 = vrot.slane %v7569_v9, 1  ;;  %801 = vst.msk [vmem:[#allocation2 + $0xf0] sm:$0xff] %vm11212_vm0, %v7565_v40  ;;  %v880_v47 = vsel %vm11215_vm1, %v865_v48, %v866_v61  ;;  %v976_v53 = vsel %vm11216_vm3, %v963_v15, %v964_v36 }
  0xf7   : > { %v1618_v14 = vadd.f32 %v1586_v13, %v1211_v0  ;;  %vm7578_vm15 = vcmp.le.s32.totalorder %v529_v12, 14  ;;  %v11471_v34 = vmov 0  ;;  %v1068_v17 = vmul.f32 %v6928_v16, %v7410_v57 }
  0xf8   : > { %v11472_v34 = vsel %vm7578_vm15, 4294967295, %v11471_v34  ;;  %v1108_v44 = vmul.f32 %v7011_v2, %v880_v47  ;;  %5533 = vmatmul.mubr.msk.f32.gmra.mrb[22].mxu0 %vm11212_vm0, %v1915_v54  ;;  %v7588_v3 = vsel %vm11216_vm3, %v1343_v45, %v1344_v8  ;;  %v1028_v48 = vsel %vm7578_vm15, %v976_v53, 0.0 }
  0xf9   : > { %11473 = vst [vmem:[#allocation34_spill] sm:$0xff] %v11472_v34  ;;  %v1248_v15 = vrot.slane %v7569_v9, 7  ;;  %v1404_v12 = vsel %vm7578_vm15, %v7436_v11, 0.0  ;;  %v1852_v57 = vmul.f32 %v7079_v5, %v7588_v3  ;;  %v1180_v6 = vmul.f32 %v6990_v56, %v1028_v48 }
  0xfa   : > { %v1140_v46 = vadd.f32 %v1108_v44, %v1068_v17  ;;  %v1444_v54 = vmul.f32 %v6950_v35, %v7365_v50  ;;  %v1483_v49 = vmul.f32 %v7021_v43, %v7400_v39  ;;  %v1555_v22 = vmul.f32 %v7029_v20, %v1404_v12 }
  0xfb   : > { %v7603_v45 = vsel %vm11215_vm1, %v1247_v62, %v1248_v15  ;;  %v1741_v11 = vmul.f32 %v7039_v4, %v7569_v9  ;;  %v1884_v41 = vadd.f32 %v1852_v57, %v1812_v52  ;;  %v498_v28 = vadd.s32 208, %v6104_v10  ;;  %v7619_v52 = vld [vmem:[#allocation2 + $0xf8] sm:$0xff] }
  0xfc   : > { %v1212_v30 = vadd.f32 %v1180_v6, %v1140_v46  ;;  %v1781_v55 = vmul.f32 %v7099_v18, %v7603_v45  ;;  %v1515_v50 = vadd.f32 %v1483_v49, %v1444_v54  ;;  %v867_v7 = vrot.slane %v7463_v60, 7 }
  0xfd   : > { %v965_v62 = vrot.slane %v7512_v19, 1  ;;  %v1069_v39 = vmul.f32 %v6928_v16, %v7463_v60  ;;  %v1916_v0 = vadd.f32 %v1884_v41, %v1618_v14  ;;  %v7617_v13 = vld [vmem:[#allocation2 + $0xf0] sm:$0xff]  ;;  %v530_v53 = vand.u32 15, %v498_v28 }
  0xfe   : > { %v1813_v47 = vadd.f32 %v1781_v55, %v1741_v11  ;;  %v7622_v17 = vrot.slane %v7619_v52, 1  ;;  %v1345_v44 = vrot.slane %v7617_v13, 1  ;;  %v1587_v48 = vadd.f32 %v1555_v22, %v1515_v50  ;;  %v469_v41 = vld [vmem:[%s6117_s22 + $0xf0] sm:$0xff] }
  0xff   : > { %v879_v12 = vsel %vm11215_vm1, %v866_v61, %v867_v7  ;;  %v975_v60 = vsel %vm11216_vm3, %v964_v36, %v965_v62  ;;  %5535 = vmatprep.mubr.msk.f32.mxu0 %vm11212_vm0, %v1916_v0  ;;  %vm7630_vm14 = vcmp.ge.s32.totalorder %v530_v53, 1  ;;  %v11474_v14 = vmov 0 }
 0x100   : > { %v11475_v14 = vsel %vm7630_vm14, 4294967295, %v11474_v14  ;;  %v1181_v57 = vmul.f32 %v6990_v56, %v975_v60  ;;  %v1249_v46 = vrot.slane %v7617_v13, 7  ;;  %v1445_v6 = vmul.f32 %v6950_v35, %v7414_v63 }
 0x101   : > { %11476 = vst [vmem:[#allocation35_spill] sm:$0xff] %v11475_v14  ;;  %v7640_v54 = vsel %vm11216_vm3, %v1344_v8, %v1345_v44  ;;  %v1619_v61 = vadd.f32 %v1587_v48, %v1212_v30  ;;  %v932_v36 = vsel %vm7630_vm14, %v879_v12, 0.0  ;;  %v1309_v49 = vsel %vm7630_vm14, %v7449_v51, 0.0 }
 0x102   : > { %v1701_v22 = vsel %vm7578_vm15, %v7640_v54, 0.0  ;;  %v1109_v11 = vmul.f32 %v7011_v2, %v932_v36  ;;  %v7653_v63 = vsel %vm11215_vm1, %v1248_v15, %v1249_v46  ;;  %v7658_v8 = vsel %vm11216_vm3, %v1345_v44, %v7622_v17 }
 0x103   : > { %v1853_v30 = vmul.f32 %v7079_v5, %v1701_v22  ;;  %v1484_v51 = vmul.f32 %v7021_v43, %v1309_v49  ;;  %v1556_v55 = vmul.f32 %v7029_v20, %v7486_v29  ;;  %v1661_v28 = vsel %vm7630_vm14, %v7653_v63, 0.0 }
 0x104   : > { %v1141_v50 = vadd.f32 %v1109_v11, %v1069_v39  ;;  %v1742_v15 = vmul.f32 %v7039_v4, %v7617_v13  ;;  %v1782_v0 = vmul.f32 %v7099_v18, %v1661_v28  ;;  %v1854_v53 = vmul.f32 %v7079_v5, %v7658_v8 }
 0x105   : > { %v1885_v44 = vadd.f32 %v1853_v30, %v1813_v47  ;;  %v1516_v48 = vadd.f32 %v1484_v51, %v1445_v6  ;;  %v499_v12 = vadd.s32 216, %v6104_v10  ;;  %v7674_v60 = vmax.f32 %v469_v41, 0.0 }
 0x106   : > { %v1213_v29 = vadd.f32 %v1181_v57, %v1141_v50  ;;  %v1814_v36 = vadd.f32 %v1782_v0, %v1742_v15  ;;  %v868_v49 = vrot.slane %v7512_v19, 7  ;;  %v966_v39 = vrot.slane %v7565_v40, 1 }
 0x107   : > { %v1917_v22 = vadd.f32 %v1885_v44, %v1619_v61  ;;  %v1588_v11 = vadd.f32 %v1556_v55, %v1516_v48  ;;  %v531_v14 = vand.u32 15, %v499_v12  ;;  %803 = vst.msk [vmem:[#allocation2 + $0x100] sm:$0xff] %vm11212_vm0, %v7674_v60  ;;  %v1070_v47 = vmul.f32 %v6928_v16, %v7512_v19  ;;  %v7721_v48 = vld [vmem:[%s11117_s2 + $0x4] ss:$0 sm:$0xff] }
 0x108   : > { %v1886_v6 = vadd.f32 %v1854_v53, %v1814_v36  ;;  %v878_v41 = vsel %vm11215_vm1, %v867_v7, %v868_v49  ;;  %v974_v57 = vsel %vm11216_vm3, %v965_v62, %v966_v39  ;;  %v7689_v30 = vsel %vm11215_vm1, %v1249_v46, %v6274_v26  ;;  %v7715_v53 = vld [vmem:[#allocation2 + $0x108] sm:$0xff] }
 0x109   : > { %5536 = vmatmul.mubr.msk.f32.gmra.mrb[24].mxu0 %vm11212_vm0, %v1917_v22  ;;  %v1620_v61 = vadd.f32 %v1588_v11, %v1213_v29  ;;  %vm7692_vm14 = vcmp.le.s32.totalorder %v531_v14, 14  ;;  %v11477_v51 = vmov 0  ;;  %v1110_v16 = vmul.f32 %v7011_v2, %v878_v41  ;;  %v7728_v29 = vld [vmem:[%s11117_s2 + $0x1] ss:$0 sm:$0xff] }
 0x10a   : > { %v11478_v51 = vsel %vm7692_vm14, 4294967295, %v11477_v51  ;;  %v1446_v19 = vmul.f32 %v6950_v35, %v7467_v25  ;;  %v1030_v7 = vsel %vm7692_vm14, %v974_v57, 0.0  ;;  %v1406_v62 = vsel %vm7692_vm14, %v7538_v58, 0.0 }
 0x10b   : > { %11479 = vst [vmem:[#allocation36_spill] sm:$0xff] %v11478_v51  ;;  %v1485_v46 = vmul.f32 %v7021_v43, %v7502_v38  ;;  %v1743_v14 = vmul.f32 %v7619_v52, %v7039_v4  ;;  %v1918_v55 = vadd.f32 %v1886_v6, %v1620_v61  ;;  %v1142_v28 = vadd.f32 %v1110_v16, %v1070_v47 }
 0x10c   : > { %v1182_v50 = vmul.f32 %v6990_v56, %v1030_v7  ;;  %v1557_v15 = vmul.f32 %v7029_v20, %v1406_v62  ;;  %v1783_v25 = vmul.f32 %v7099_v18, %v7689_v30  ;;  %v500_v0 = vadd.s32 224, %v6104_v10 }
 0x10d   : > { %v1517_v35 = vadd.f32 %v1485_v46, %v1446_v19  ;;  %v869_v58 = vrot.slane %v7565_v40, 7  ;;  %5538 = vmatprep.mubr.msk.f32.mxu0 %vm11212_vm0, %v1918_v55  ;;  %v967_v44 = vrot.slane %v6149_v31, 1  ;;  %v1071_v12 = vmul.f32 %v7721_v48, %v7565_v40 }
 0x10e   : > { %v1214_v38 = vadd.f32 %v1182_v50, %v1142_v28  ;;  %v1447_v36 = vmul.f32 %v7728_v29, %v7516_v23  ;;  %v7732_v22 = vld [vmem:[#allocation2 + $0x100] sm:$0xff]  ;;  %v1815_v47 = vadd.f32 %v1783_v25, %v1743_v14  ;;  %v532_v6 = vand.u32 15, %v500_v0 }
 0x10f   : > { %v1589_v11 = vadd.f32 %v1557_v15, %v1517_v35  ;;  %v877_v41 = vsel %vm11215_vm1, %v868_v49, %v869_v58  ;;  %v1667_v57 = vrot.slane %v7732_v22, 1  ;;  %v973_v40 = vsel %vm11216_vm3, %v966_v39, %v967_v44 }
 0x110   : > { %v1558_v61 = vmul.f32 %v7029_v20, %v7588_v3  ;;  %v1626_v16 = vrot.slane %v7732_v22, 7  ;;  %vm7742_vm0 = vcmp.ge.s32.totalorder %v532_v6, 1  ;;  %v11480_v23 = vmov 0 }
 0x111   : > { %v1621_v19 = vadd.f32 %v1589_v11, %v1214_v38  ;;  %v11481_v23 = vsel %vm7742_vm0, 4294967295, %v11480_v23  ;;  %v1183_v7 = vmul.f32 %v6990_v56, %v973_v40  ;;  %v1668_v62 = vrot.slane %v7715_v53, 1 }
 0x112   : > { %v1674_v49 = vsel %vm11216_vm3, %v7622_v17, %v1667_v57  ;;  %v934_v39 = vsel %vm7742_vm0, %v877_v41, 0.0  ;;  %v1311_v20 = vsel %vm7742_vm0, %v7551_v42, 0.0  ;;  %v1633_v3 = vsel %vm11215_vm1, %v6274_v26, %v1626_v16 }
 0x113   : > { %v1703_v56 = vsel %vm7692_vm14, %v1674_v49, 0.0  ;;  %v1111_v46 = vmul.f32 %v7011_v2, %v934_v39  ;;  %v1486_v14 = vmul.f32 %v7021_v43, %v1311_v20  ;;  %v1663_v55 = vsel %vm7742_vm0, %v1633_v3, 0.0  ;;  %v7785_v49 = vld [vmem:[#allocation2 + $0x110] sm:$0xff] }
 0x114   : > { %v1855_v28 = vmul.f32 %v7079_v5, %v1703_v56  ;;  %v1673_v50 = vsel %vm11216_vm3, %v1667_v57, %v1668_v62  ;;  %v1744_v42 = vmul.f32 %v7039_v4, %v7732_v22  ;;  %v1784_v26 = vmul.f32 %v7099_v18, %v1663_v55 }
 0x115   : > { %v1143_v15 = vadd.f32 %v1111_v46, %v1071_v12  ;;  %v1518_v35 = vadd.f32 %v1486_v14, %v1447_v36  ;;  %v1856_v25 = vmul.f32 %v7079_v5, %v1673_v50  ;;  %v501_v2 = vadd.s32 232, %v6104_v10  ;;  %v7814_v46 = vld [vmem:[%s11117_s2 + $0x5] ss:$0 sm:$0xff]  ;;  %v7820_v14 = vld [vmem:[%s11117_s2 + $0x2] ss:$0 sm:$0xff] }
 0x116   : > { %v1887_v43 = vadd.f32 %v1855_v28, %v1815_v47  ;;  %v1816_v0 = vadd.f32 %v1784_v26, %v1744_v42  ;;  %v870_v38 = vrot.slane %v6149_v31, 7  ;;  %v968_v11 = vrot.slane %v7674_v60, 1  ;;  %v7831_v26 = vld [vmem:[%s11117_s2 + $0x7] ss:$0 sm:$0xff] }
 0x117   : > { %v1215_v6 = vadd.f32 %v1183_v7, %v1143_v15  ;;  %v1590_v41 = vadd.f32 %v1558_v61, %v1518_v35  ;;  %v533_v57 = vand.u32 15, %v501_v2  ;;  %v1072_v4 = vmul.f32 %v7721_v48, %v6149_v31  ;;  %v7790_v61 = vld [vmem:[%s11117_s2 + $0x3] ss:$0 sm:$0xff]  ;;  %v7804_v7 = vld [vmem:[%s11117_s2] ss:$0 sm:$0xff] }
 0x118   : > { %v1919_v22 = vadd.f32 %v1887_v43, %v1621_v19  ;;  %v1888_v40 = vadd.f32 %v1856_v25, %v1816_v0  ;;  %v876_v12 = vsel %vm11215_vm1, %v869_v58, %v870_v38  ;;  %v972_v5 = vsel %vm11216_vm3, %v967_v44, %v968_v11 }
 0x119   : > { %v1622_v36 = vadd.f32 %v1590_v41, %v1215_v6  ;;  %vm7781_vm0 = vcmp.le.s32.totalorder %v533_v57, 14  ;;  %v11482_v47 = vmov 0  ;;  %v1112_v31 = vmul.f32 %v7790_v61, %v876_v12 }
 0x11a   : > { %v11483_v47 = vsel %vm7781_vm0, 4294967295, %v11482_v47  ;;  %v1448_v58 = vmul.f32 %v7728_v29, %v7569_v9  ;;  %vm11484_vm1 = vcmask 523264   ;;  %v1032_v44 = vsel %vm7781_vm0, %v972_v5, 0.0  ;;  %v7809_v9 = vpop.f32.mrb[0].mxu0 }
 0x11b   : > { %5539 = vmatmul.mubr.msk.f32.gmra.mrb[26].mxu0 %vm11484_vm1, %v1919_v22  ;;  %v1408_v19 = vsel %vm7781_vm0, %v7640_v54, 0.0  ;;  %v1487_v39 = vmul.f32 %v7804_v7, %v7603_v45  ;;  %v1627_v20 = vrot.slane %v7715_v53, 7  ;;  %v1920_v3 = vadd.f32 %v1888_v40, %v1622_v36  ;;  %v7823_v55 = vpop.f32.mrb[1].mxu0  ;;  %v5843_v40 = vld [vmem:[%s11117_s2 + $0x8] ss:$0 sm:$0xff] }
 0x11c   : > { %v1144_v56 = vadd.f32 %v1112_v31, %v1072_v4  ;;  %v1184_v54 = vmul.f32 %v7814_v46, %v1032_v44  ;;  %v1559_v45 = vmul.f32 %v7820_v14, %v1408_v19  ;;  %vm11485_vm1 = vcmp.lt.s32.totalorder %v6104_v10, 1 }
 0x11d   : > { %v1519_v28 = vadd.f32 %v1487_v39, %v1448_v58  ;;  %v1632_v50 = vsel %vm11485_vm1, %v1626_v16, %v1627_v20  ;;  %v1669_v42 = vrot.slane %v7785_v49, 1  ;;  %v1745_v15 = vmul.f32 %v7831_v26, %v7715_v53 }
 0x11e   : > { %vm11486_vm3 = vcmask 523264   ;;  %v1216_v35 = vadd.f32 %v1184_v54, %v1144_v56  ;;  %v1785_v25 = vmul.f32 %v7099_v18, %v1632_v50  ;;  %v502_v2 = vadd.s32 240, %v6104_v10 }
 0x11f   : > { %5541 = vmatprep.mubr.msk.f32.mxu0 %vm11486_vm3, %v1920_v3  ;;  %v871_v43 = vrot.slane %v7674_v60, 7  ;;  %v1591_v16 = vadd.f32 %v1559_v45, %v1519_v28  ;;  %vm11487_vm1 = vcmp.lt.s32.totalorder %v6104_v10, 7  ;;  %v969_v6 = vrot.slane %v6151_v32, 1 }
 0x120   : > { %v1672_v0 = vsel %vm11487_vm1, %v1668_v62, %v1669_v42  ;;  %v1073_v41 = vmul.f32 %v7721_v48, %v7674_v60  ;;  %v1817_v57 = vadd.f32 %v1785_v25, %v1745_v15  ;;  %v534_v4 = vand.u32 15, %v502_v2 }
 0x121   : > { %v1705_v53 = vsel %vm7781_vm0, %v1672_v0, 0.0  ;;  %vm11488_vm3 = vcmp.lt.s32.totalorder %v6104_v10, 1  ;;  %v1623_v22 = vadd.f32 %v1591_v16, %v1216_v35  ;;  %v971_v62 = vsel %vm11487_vm1, %v968_v11, %v969_v6  ;;  %v5845_v35 = vld [vmem:[%s11117_s2 + $0x6] ss:$0 sm:$0xff] }
 0x122   : > { %v875_v18 = vsel %vm11488_vm3, %v870_v38, %v871_v43  ;;  %v1857_v12 = vmul.f32 %v5843_v40, %v1705_v53  ;;  %v1449_v60 = vmul.f32 %v7728_v29, %v7617_v13  ;;  %vm7855_vm14 = vcmp.ge.s32.totalorder %v534_v4, 1  ;;  %v5844_v13 = vld [vmem:[#allocation2 + $0x118] sm:$0xff] }
 0x123   : > { %v11489_v5 = vmov 0  ;;  %v1185_v36 = vmul.f32 %v7814_v46, %v971_v62  ;;  %v1560_v38 = vmul.f32 %v7820_v14, %v7658_v8  ;;  %v1628_v31 = vrot.slane %v7785_v49, 7 }
 0x124   : > { %v11490_v5 = vsel %vm7855_vm14, 4294967295, %v11489_v5  ;;  %v1889_v58 = vadd.f32 %v1857_v12, %v1817_v57  ;;  %v936_v44 = vsel %vm7855_vm14, %v875_v18, 0.0  ;;  %v1313_v11 = vsel %vm7855_vm14, %v7653_v63, 0.0 }
 0x125   : > { %11491 = vst [vmem:[#allocation37_spill] sm:$0xff] %v11490_v5  ;;  %v1670_v19 = vrot.slane %v5844_v13, 1  ;;  %v1113_v39 = vmul.f32 %v7790_v61, %v936_v44  ;;  %v1488_v3 = vmul.f32 %v7804_v7, %v1313_v11  ;;  %v1631_v56 = vsel %vm11488_vm3, %v1627_v20, %v1628_v31 }
 0x126   : > { %v1746_v8 = vmul.f32 %v7831_v26, %v7785_v49  ;;  %v1921_v54 = vadd.f32 %v1889_v58, %v1623_v22  ;;  %v1665_v45 = vsel %vm7855_vm14, %v1631_v56, 0.0  ;;  %v503_v63 = vadd.s32 248, %v6104_v10 }
 0x127   : > { %v1671_v28 = vsel %vm11487_vm1, %v1669_v42, %v1670_v19  ;;  %v1145_v50 = vadd.f32 %v1113_v39, %v1073_v41  ;;  %v1520_v15 = vadd.f32 %v1488_v3, %v1449_v60  ;;  %v1786_v25 = vmul.f32 %v5845_v35, %v1665_v45  ;;  %v5504_v3 = vpop.f32.mrb[2].mxu0 }
 0x128   : > { %v1858_v20 = vmul.f32 %v5843_v40, %v1671_v28  ;;  %vm11492_vm3 = vcmask 523264   ;;  %v535_v49 = vand.u32 15, %v503_v63  ;;  %v11493_v2 = vrot.slane %v6151_v32, 7 }
 0x129   : > { %5542 = vmatmul.mubr.msk.f32.gmra.mrb[28].mxu0 %vm11492_vm3, %v1921_v54  ;;  %vm11494_vm14 = vcmp.lt.s32.totalorder %v6104_v10, 1  ;;  %v11495_v42 = vrot.slane %v6141_v27, 1  ;;  %v1074_v41 = vmul.f32 %v7721_v48, %v6151_v32  ;;  %v1217_v53 = vadd.f32 %v1185_v36, %v1145_v50 }
 0x12a   : > { %v874_v16 = vsel %vm11494_vm14, %v871_v43, %v11493_v2  ;;  %v1592_v57 = vadd.f32 %v1560_v38, %v1520_v15  ;;  %v1818_v4 = vadd.f32 %v1786_v25, %v1746_v8  ;;  %vm7894_vm3 = vcmp.le.s32.totalorder %v535_v49, 14  ;;  %vm11500_vm14 = vmmov %vm11487_vm1  ;;  %v7953_v2 = vld [vmem:[%s11121_s6 + $0x4] ss:$0 sm:$0xff] }
 0x12b   : > { %v1002_v0 = vsel %vm11487_vm1, %v969_v6, %v11495_v42  ;;  %v1114_v18 = vmul.f32 %v7790_v61, %v874_v16  ;;  %v11496_v22 = vmov 0  ;;  %v11499_v12 = vrot.slane %v6153_v33, 1  ;;  %v7958_v16 = vld [vmem:[%s11121_s6 + $0x1] ss:$0 sm:$0xff] }
 0x12c   : > { %v11497_v22 = vsel %vm7894_vm3, 4294967295, %v11496_v22  ;;  %v1450_v43 = vmul.f32 %v7728_v29, %v7619_v52  ;;  %v1489_v32 = vmul.f32 %v7804_v7, %v7689_v30  ;;  %v1624_v48 = vadd.f32 %v1592_v57, %v1217_v53 }
 0x12d   : > { %11498 = vst [vmem:[#allocation38_spill] sm:$0xff] %v11497_v22  ;;  %v1378_v27 = vsel %vm11500_vm14, %v7622_v17, %v11499_v12  ;;  %v1890_v6 = vadd.f32 %v1858_v20, %v1818_v4  ;;  %v1034_v61 = vsel %vm7894_vm3, %v1002_v0, 0.0  ;;  %v1146_v62 = vadd.f32 %v1114_v18, %v1074_v41 }
 0x12e   : > { %v1186_v60 = vmul.f32 %v7814_v46, %v1034_v61  ;;  %v1410_v33 = vsel %vm7894_vm3, %v1378_v27, 0.0  ;;  %v1521_v36 = vadd.f32 %v1489_v32, %v1450_v43  ;;  %v11501_v17 = vrot.slane %v6168_v37, 7 }
 0x12f   : > { %vm11502_vm1 = vcmp.lt.s32.totalorder %v6104_v10, 1  ;;  %v1922_v29 = vadd.f32 %v1890_v6, %v1624_v48  ;;  %v1561_v30 = vmul.f32 %v7820_v14, %v1410_v33  ;;  %v1675_v7 = vsel %vm11500_vm14, %v1670_v19, %v6271_v24  ;;  %v2104_v14 = vpop.f32.mrb[3].mxu0 }
 0x130   : > { %v1630_v52 = vsel %vm11502_vm1, %v1628_v31, %v11501_v17  ;;  %v1747_v38 = vmul.f32 %v5844_v13, %v7831_v26  ;;  %v1218_v58 = vadd.f32 %v1186_v60, %v1146_v62  ;;  %v1707_v46 = vsel %vm7894_vm3, %v1675_v7, 0.0  ;;  %v7928_v26 = vld [vmem:[%s11119_s4] ss:$0 sm:$0xff] }
 0x131   : > { %v1787_v44 = vmul.f32 %v5845_v35, %v1630_v52  ;;  %vm11503_vm0 = vcmask 523264   ;;  %v1593_v37 = vadd.f32 %v1561_v30, %v1521_v36  ;;  %v1859_v11 = vmul.f32 %v5843_v40, %v1707_v46  ;;  %v5507_v24 = vpop.f32.mrb[4].mxu0  ;;  %v7935_v40 = vld [vmem:[%s11120_s5] ss:$0 sm:$0xff] }
 0x132   : > { %5544 = vmatprep.mubr.msk.f32.mxu0 %vm11503_vm0, %v1922_v29  ;;  %vm11504_vm1 = vmmov %vm11503_vm0  ;;  %v2114_v19 = vpop.f32.mrb[5].mxu0  ;;  %v2261_v13 = vmul.f32 %v7809_v9, %v7928_v26  ;;  %v2260_v54 = vmul.f32 %v7928_v26, %v7823_v55  ;;  %v2263_v45 = vmul.f32 %v5504_v3, %v7928_v26  ;;  %v2265_v28 = vmul.f32 %v5507_v24, %v7928_v26  ;;  %v8011_v3 = vld [vmem:[%s11121_s6] ss:$0 sm:$0xff] }
 0x133   : > { %v1819_v39 = vadd.f32 %v1787_v44, %v1747_v38  ;;  %v1625_v31 = vadd.f32 %v1593_v37, %v1218_v58  ;;  %v2264_v50 = vmul.f32 %v7928_v26, %v2114_v19  ;;  %v2262_v35 = vmul.f32 %v7928_v26, %v2104_v14  ;;  %vm11508_vm0 = vmmov %vm11500_vm14  ;;  %v8019_v14 = vld [vmem:[%s11121_s6 + $0x3] ss:$0 sm:$0xff] }
 0x134   : > { %v2300_v63 = vadd.f32 %v7935_v40, %v2261_v13  ;;  %v2299_v15 = vadd.f32 %v7935_v40, %v2260_v54  ;;  %v2302_v9 = vadd.f32 %v7935_v40, %v2263_v45  ;;  %v2304_v25 = vadd.f32 %v7935_v40, %v2265_v28  ;;  %v8045_v28 = vld [vmem:[%s11121_s6 + $0x2] ss:$0 sm:$0xff]  ;;  %vm11513_vm3 = vmmov %vm11508_vm0 }
 0x135   : > { %v1891_v56 = vadd.f32 %v1859_v11, %v1819_v39  ;;  %v2303_v55 = vadd.f32 %v7935_v40, %v2264_v50  ;;  %v2301_v57 = vadd.f32 %v7935_v40, %v2262_v35  ;;  %v11506_v46 = vmov 0.0  }
 0x136   : > { %v7947_v20 = vmax.f32 %v2300_v63, 0.0  ;;  %v2331_v42 = vmax.f32 %v2299_v15, 0.0  ;;  %v7961_v53 = vmax.f32 %v2302_v9, 0.0  ;;  %v7964_v4 = vmax.f32 %v2304_v25, 0.0  ;;  %v8050_v63 = vld [vmem:[%s11121_s6 + $0x7] ss:$0 sm:$0xff] }
 0x137   : > { %v1923_v8 = vadd.f32 %v1891_v56, %v1625_v31  ;;  %v7968_v27 = vmax.f32 %v2303_v55, 0.0  ;;  %v7989_v52 = vmax.f32 %v2301_v57, 0.0  ;;  %v7998_v44 = vrot.slane %v11506_v46, 1  ;;  %v8068_v55 = vld [vmem:[%s11121_s6 + $0x6] ss:$0 sm:$0xff] }
 0x138   : > { %v2460_v12 = vrot.slane %v7947_v20, 7  ;;  %v2556_v32 = vrot.slane %v7947_v20, 1  ;;  %v2660_v48 = vmul.f32 %v7953_v2, %v7947_v20  ;;  %v7976_v6 = vmul.f32 %v7958_v16, %v7947_v20 }
 0x139   : > { %5545 = vmatmul.mubr.msk.f32.gmra.mrb[30].mxu0 %vm11504_vm1, %v1923_v8  ;;  %v7979_v62 = vrot.slane %v2331_v42, 7  ;;  %v7981_v60 = vrot.slane %v2331_v42, 1  ;;  %v7984_v33 = vmul.f32 %v7958_v16, %v2331_v42  ;;  %v2462_v17 = vrot.slane %v7961_v53, 7  ;;  %11507 = vst [vmem:[#allocation40_spill] sm:$0xff] %v7998_v44  ;;  %v8024_v8 = vld [vmem:[%s11121_s6 + $0x5] ss:$0 sm:$0xff]  ;;  %vm11510_vm1 = vmmov %vm11508_vm0 }
 0x13a   : > { %v2559_v38 = vrot.slane %v7968_v27, 1  ;;  %v8003_v39 = vmul.f32 %v7953_v2, %v2331_v42  ;;  %v8006_v31 = vrot.slane %v11506_v46, 7  ;;  %v8027_v24 = vmul.f32 0.0, %v7958_v16 }
 0x13b   : > { %11505 = vst [vmem:[#allocation39_spill] sm:$0xff] %v7981_v60  ;;  %v2617_v56 = vsel %vm11508_vm0, %v7981_v60, %v2556_v32  ;;  %vm11509_vm14 = vcmp.lt.s32.totalorder %v6104_v10, 1  ;;  %v2992_v13 = vsel %vm11510_vm1, %v7998_v44, %v7981_v60  ;;  %v2558_v54 = vrot.slane %v7961_v53, 1 }
 0x13c   : > { %v8032_v19 = vsel %vm11509_vm14, %v7979_v62, %v2460_v12  ;;  %v8040_v45 = vmul.f32 %v8024_v8, %v2617_v56  ;;  %v2996_v15 = vsel %vm6235_vm5, %v2992_v13, 0.0  ;;  %v2461_v9 = vrot.slane %v7989_v52, 7  ;;  %vm11512_vm1 = vmmov %vm11509_vm14 }
 0x13d   : > { %v2700_v50 = vmul.f32 %v8019_v14, %v8032_v19  ;;  %v8058_v35 = vrot.slane %v7989_v52, 1  ;;  %v8061_v25 = vmul.f32 %v8045_v28, %v2617_v56  ;;  %v3442_v20 = vmul.f32 %v8050_v63, %v7989_v52 }
 0x13e   : > { %v3075_v42 = vmul.f32 %v8011_v3, %v8006_v31  ;;  %v11515_v5 = vrot.slane %v7968_v27, 7 }
 0x13f   : > { %11511 = vst [vmem:[#allocation41_spill] sm:$0xff] %v8058_v35  ;;  %v2615_v57 = vsel %vm11508_vm0, %v8058_v35, %v2558_v54 }
 0x140   : > { %v2773_v46 = vmul.f32 %v8024_v8, %v2615_v57  ;;  %v8097_v56 = vmul.f32 %v8045_v28, %v2615_v57  ;;  %v3107_v37 = vadd.f32 %v3075_v42, %v8027_v24  ;;  %v8121_v42 = vsel %vm11508_vm0, %v2558_v54, %v2559_v38 }
 0x142   : > { %v5510_v49 = vpop.f32.mrb[6].mxu0 }
 0x143   : > { %v2267_v0 = vmul.f32 %v5510_v49, %v7928_v26  ;;  %v2124_v41 = vpop.f32.mrb[7].mxu0  ;;  %v2732_v49 = vadd.f32 %v2700_v50, %v2660_v48  ;;  %v8088_v48 = vsel %vm11512_vm1, %v2461_v9, %v2462_v17 }
 0x144   : > { %v2266_v18 = vmul.f32 %v7928_v26, %v2124_v41  ;;  %v3443_v41 = vmul.f32 %v8050_v63, %v7961_v53 }
 0x145   : > { %v2306_v43 = vadd.f32 %v7935_v40, %v2267_v0  ;;  %v3147_v0 = vmul.f32 %v8045_v28, %v2996_v15 }
 0x146   : > { %v2305_v61 = vadd.f32 %v7935_v40, %v2266_v18  ;;  %v3305_v18 = vsel %vm11509_vm14, %v8006_v31, %v2461_v9  ;;  %vm11516_vm14 = vmmov %vm11512_vm1 }
 0x147   : > { %v7986_v36 = vmax.f32 %v2306_v43, 0.0  ;;  %v8084_v43 = vld [vmem:[%s11121_s6 + $0x8] ss:$0 sm:$0xff]  ;;  %v3306_v13 = vsel %vm6128_vm2, %v3305_v18, 0.0  ;;  %v2560_v18 = vrot.slane %v7964_v4, 1 }
 0x148   : > { %v7992_v30 = vmax.f32 %v2305_v61, 0.0  ;;  %v8093_v61 = vsel %vm11513_vm3, %v2556_v32, %v8058_v35  ;;  %v3554_v50 = vmul.f32 %v8084_v43, %v2615_v57  ;;  %v3482_v15 = vmul.f32 %v8068_v55, %v3306_v13  ;;  %vm11514_vm3 = vmmov %vm11512_vm1 }
 0x149   : > { %v2620_v58 = vsel %vm6235_vm5, %v8093_v61, 0.0  ;;  %v3483_v32 = vmul.f32 %v8068_v55, %v8088_v48  ;;  %v8112_v29 = vsel %vm11514_vm3, %v2460_v12, %v2461_v9  ;;  %v2661_v57 = vmul.f32 %v7953_v2, %v7989_v52  ;;  %vm11518_vm1 = vmmov %vm11508_vm0 }
 0x14a   : > { %v2772_v11 = vmul.f32 %v8024_v8, %v2620_v58  ;;  %v3514_v7 = vadd.f32 %v3482_v15, %v3442_v20  ;;  %v3179_v35 = vadd.f32 %v3147_v0, %v3107_v37  ;;  %v3403_v9 = vsel %vm6235_vm5, %v8121_v42, 0.0  ;;  %vm11522_vm0 = vmmov %vm11514_vm3 }
 0x14b   : > { %v3515_v22 = vadd.f32 %v3483_v32, %v3443_v41  ;;  %v8131_v20 = vsel %vm11516_vm14, %v2462_v17, %v11515_v5  ;;  %v3555_v37 = vmul.f32 %v8084_v43, %v3403_v9  ;;  %v8145_v41 = vsel %vm11518_vm1, %v2559_v38, %v2560_v18  ;;  %vm11524_vm14 = vmmov %vm11518_vm1 }
 0x14c   : > { %v2804_v12 = vadd.f32 %v2772_v11, %v2732_v49  ;;  %v8134_v54 = vadd.f32 %v3554_v50, %v3514_v7  ;;  %v2525_v11 = vsel %vm6368_vm6, %v8112_v29, 0.0  ;;  %v2896_v7 = vsel %vm11514_vm3, %v8006_v31, %v7979_v62  ;;  %vm11528_vm1 = vmmov %vm11522_vm0 }
 0x14d   : > { %v2701_v5 = vmul.f32 %v8019_v14, %v2525_v11  ;;  %v3587_v17 = vadd.f32 %v3555_v37, %v3515_v22  ;;  %v2901_v38 = vsel %vm6368_vm6, %v2896_v7, 0.0  ;;  %v11520_v11 = vrot.slane %v7964_v4, 7  ;;  %vm11532_vm3 = vmmov %vm11524_vm14 }
 0x14e   : > { %11517 = vst [vmem:[#allocation42_spill] sm:$0xff] %v8134_v54  ;;  %v3211_v0 = vadd.f32 %v3179_v35, %v2804_v12  ;;  %v3308_v35 = vsel %vm6368_vm6, %v8131_v20, 0.0  ;;  %v3076_v12 = vmul.f32 %v8011_v3, %v2901_v38  ;;  %v11523_v38 = vrot.slane %v7992_v30, 1 }
 0x14f   : > { %v2733_v32 = vadd.f32 %v2701_v5, %v2661_v57  ;;  %v3484_v9 = vmul.f32 %v8068_v55, %v3308_v35  ;;  %v3556_v57 = vmul.f32 %v8084_v43, %v8145_v41  ;;  %v11531_v59 = vrot.slane %v7992_v30, 1 }
 0x150   : > { %v8164_v22 = vadd.f32 %v3587_v17, %v3211_v0  ;;  %v3650_v17 = vld [vmem:[%s11122_s7] sm:$0xff]  ;;  %v3108_v7 = vadd.f32 %v3076_v12, %v7984_v33  ;;  %v2662_v0 = vmul.f32 %v7953_v2, %v7961_v53  ;;  %v2702_v33 = vmul.f32 %v8019_v14, %v8088_v48 }
 0x151   : > { %v2805_v37 = vadd.f32 %v2773_v46, %v2733_v32  ;;  %v3651_v46 = vld [vmem:[%s11122_s7 + $0x8] sm:$0xff]  ;;  %v3077_v12 = vmul.f32 %v8011_v3, %v8032_v19  ;;  %v11526_v19 = vrot.slane %v7992_v30, 7 }
 0x152   : > { %11519 = vst [vmem:[#allocation43_spill] sm:$0xff] %v8164_v22  ;;  %v5671_v32 = vpack.c.bf16 %v3651_v46, %v3650_v17  ;;  %v2734_v17 = vadd.f32 %v2702_v33, %v2662_v0  ;;  %v2527_v0 = vsel %vm6158_vm4, %v8131_v20, 0.0 }
 0x154   : > { %v5513_v13 = vpop.f32.mrb[8].mxu0  ;;  %5672 = vmatprep.subr.bf16.mxu1 %v5671_v32 }
 0x155   : > { %v2269_v58 = vmul.f32 %v5513_v13, %v7928_v26  ;;  %v2134_v60 = vpop.f32.mrb[9].mxu0  ;;  %v3444_v13 = vmul.f32 %v8050_v63, %v7968_v27  ;;  %5674 = vmatpush3.bf16.msra.mxu1 %v5671_v32 }
 0x156   : > { %v2268_v15 = vmul.f32 %v7928_v26, %v2134_v60 }
 0x157   : > { %v2308_v49 = vadd.f32 %v7935_v40, %v2269_v58  ;;  %v3516_v35 = vadd.f32 %v3484_v9, %v3444_v13 }
 0x158   : > { %v2307_v60 = vadd.f32 %v7935_v40, %v2268_v15  ;;  %v2622_v15 = vsel %vm6425_vm7, %v8121_v42, 0.0 }
 0x159   : > { %v8156_v50 = vmax.f32 %v2308_v49, 0.0  ;;  %v11521_v49 = vrot.slane %v7968_v27, 7  ;;  %v3588_v1 = vadd.f32 %v3556_v57, %v3516_v35  ;;  %v2774_v13 = vmul.f32 %v8024_v8, %v2622_v15 }
 0x15a   : > { %v8162_v58 = vmax.f32 %v2307_v60, 0.0  ;;  %v3180_v60 = vadd.f32 %v8061_v25, %v3108_v7  ;;  %v3445_v25 = vmul.f32 %v8050_v63, %v7964_v4  ;;  %v11527_v35 = vrot.slane %v7964_v4, 7 }
 0x15b   : > { %v8177_v5 = vsel %vm11522_vm0, %v11521_v49, %v11520_v11  ;;  %v8192_v11 = vsel %vm11524_vm14, %v2560_v18, %v11523_v38  ;;  %v2998_v18 = vsel %vm6425_vm7, %v8093_v61, 0.0  ;;  %v3109_v61 = vadd.f32 %v3077_v12, %v7976_v6  ;;  %vm11537_vm14 = vmmov %vm11532_vm3 }
 0x15c   : > { %v3405_v9 = vsel %vm6425_vm7, %v8192_v11, 0.0  ;;  %v3212_v57 = vadd.f32 %v3180_v60, %v2805_v37  ;;  %v3149_v15 = vmul.f32 %v8045_v28, %v2998_v18  ;;  %v3485_v46 = vmul.f32 %v8068_v55, %v8177_v5 }
 0x15d   : > { %v3557_v7 = vmul.f32 %v8084_v43, %v3405_v9  ;;  %v8224_v38 = vsel %vm11528_vm1, %v11527_v35, %v11526_v19  ;;  %v2806_v32 = vadd.f32 %v2774_v13, %v2734_v17  ;;  %v2562_v6 = vrot.slane %v7986_v36, 1  ;;  %vm11542_vm1 = vmmov %vm11522_vm0 }
 0x15e   : > { %v8229_v60 = vadd.f32 %v3588_v1, %v3212_v57  ;;  %v3517_v33 = vadd.f32 %v3485_v46, %v3445_v25  ;;  %v3181_v18 = vadd.f32 %v3149_v15, %v3109_v61  ;;  %v2663_v12 = vmul.f32 %v7953_v2, %v7968_v27 }
 0x15f   : > { %v2703_v9 = vmul.f32 %v8019_v14, %v2527_v0  ;;  %v2775_v19 = vmul.f32 %v8024_v8, %v8145_v41  ;;  %v8241_v1 = vsel %vm11532_vm3, %v11531_v59, %v2562_v6  ;;  %v2903_v13 = vsel %vm6158_vm4, %v8112_v29, 0.0 }
 0x160   : > { %11530 = vst [vmem:[#allocation44_spill] sm:$0xff] %v8229_v60  ;;  %v3589_v49 = vadd.f32 %v3557_v7, %v3517_v33  ;;  %v3039_v25 = vmul.f32 %v7958_v16, %v7989_v52  ;;  %v3213_v15 = vadd.f32 %v3181_v18, %v2806_v32  ;;  %v3078_v61 = vmul.f32 %v8011_v3, %v2903_v13 }
 0x161   : > { %v2735_v46 = vadd.f32 %v2703_v9, %v2663_v12  ;;  %v3310_v59 = vsel %vm6158_vm4, %v8224_v38, 0.0  ;;  %v3446_v0 = vmul.f32 %v8050_v63, %v7992_v30  ;;  %v3558_v29 = vmul.f32 %v8084_v43, %v8241_v1 }
 0x162   : > { %v8259_v33 = vadd.f32 %v3589_v49, %v3213_v15  ;;  %v3110_v18 = vadd.f32 %v3078_v61, %v3039_v25  ;;  %v3486_v9 = vmul.f32 %v8068_v55, %v3310_v59  ;;  %v11535_v13 = vrot.slane %v7992_v30, 7 }
 0x163   : > { %v2807_v32 = vadd.f32 %v2775_v19, %v2735_v46  ;;  %v11536_v37 = vrot.slane %v8162_v58, 1  ;;  %v2624_v15 = vsel %vm6494_vm8, %v8192_v11, 0.0  ;;  %v2664_v46 = vmul.f32 %v7953_v2, %v7964_v4 }
 0x164   : > { %11533 = vst [vmem:[#allocation45_spill] sm:$0xff] %v8259_v33  ;;  %v3182_v25 = vadd.f32 %v8097_v56, %v3110_v18  ;;  %v2704_v59 = vmul.f32 %v8019_v14, %v8177_v5  ;;  %v3000_v56 = vsel %vm6494_vm8, %v8121_v42, 0.0  ;;  %v3040_v18 = vmul.f32 %v7958_v16, %v7961_v53 }
 0x165   : > { %v5516_v35 = vpop.f32.mrb[10].mxu0  ;;  %v8275_v49 = vsel %vm11537_vm14, %v2562_v6, %v11536_v37  ;;  %v2776_v37 = vmul.f32 %v8024_v8, %v2624_v15  ;;  %v3079_v42 = vmul.f32 %v8011_v3, %v8088_v48  ;;  %v3151_v53 = vmul.f32 %v8045_v28, %v3000_v56  ;;  %vm11549_vm14 = vmmov %vm11532_vm3 }
 0x166   : > { %v2271_v57 = vmul.f32 %v5516_v35, %v7928_v26  ;;  %v2144_v17 = vpop.f32.mrb[11].mxu0  ;;  %v11534_v35 = vrot.slane %v7986_v36, 7  ;;  %v3407_v15 = vsel %vm6494_vm8, %v8275_v49, 0.0  ;;  %v11540_v48 = vrot.slane %v8162_v58, 7 }
 0x167   : > { %v2270_v7 = vmul.f32 %v7928_v26, %v2144_v17  ;;  %v3081_v60 = vmul.f32 %v8011_v3, %v8177_v5 }
 0x168   : > { %v2310_v52 = vadd.f32 %v7935_v40, %v2271_v57  ;;  %v8269_v17 = vsel %vm11522_vm0, %v11535_v13, %v11534_v35  ;;  %v2736_v13 = vadd.f32 %v2704_v59, %v2664_v46  ;;  %v3111_v46 = vadd.f32 %v3079_v42, %v3040_v18 }
 0x169   : > { %v2309_v12 = vadd.f32 %v7935_v40, %v2270_v7  ;;  %v3518_v7 = vadd.f32 %v3486_v9, %v3446_v0  ;;  %v3652_v0 = vld [vmem:[%s11122_s7 + $0x10] sm:$0xff]  ;;  %v3653_v9 = vld [vmem:[%s11122_s7 + $0x18] sm:$0xff]  ;;  %v11541_v59 = vrot.slane %v7986_v36, 7  ;;  %v2665_v18 = vmul.f32 %v7953_v2, %v7992_v30 }
 0x16a   : > { %v8277_v19 = vmax.f32 %v2310_v52, 0.0  ;;  %v3214_v52 = vadd.f32 %v3182_v25, %v2807_v32  ;;  %v5675_v25 = vpack.c.bf16 %v3653_v9, %v3652_v0  ;;  %v2808_v35 = vadd.f32 %v2776_v37, %v2736_v13 }
 0x16b   : > { %v8285_v61 = vmax.f32 %v2309_v12, 0.0  ;;  %v3590_v32 = vadd.f32 %v3558_v29, %v3518_v7  ;;  %v3447_v12 = vmul.f32 %v8050_v63, %v7986_v36  ;;  %v3487_v29 = vmul.f32 %v8068_v55, %v8269_v17 }
 0x16c   : > { %5676 = vmatprep.subr.bf16.mxu1 %v5675_v25  ;;  %v3559_v7 = vmul.f32 %v8084_v43, %v3407_v15  ;;  %v8323_v56 = vsel %vm11542_vm1, %v11541_v59, %v11540_v48  ;;  %v2564_v9 = vrot.slane %v8156_v50, 1  ;;  %v3183_v13 = vadd.f32 %v3151_v53, %v3111_v46  ;;  %vm11554_vm1 = vmmov %vm11522_vm0 }
 0x16d   : > { %v8310_v6 = vadd.f32 %v3590_v32, %v3214_v52  ;;  %v2529_v52 = vsel %vm6560_vm9, %v8224_v38, 0.0  ;;  %5678 = vmatpush3.bf16.msra.mxu1 %v5675_v25  ;;  %v3519_v0 = vadd.f32 %v3487_v29, %v3447_v12  ;;  %v2777_v42 = vmul.f32 %v8024_v8, %v8241_v1 }
 0x16e   : > { %v2705_v32 = vmul.f32 %v8019_v14, %v2529_v52  ;;  %v2905_v15 = vsel %vm6560_vm9, %v8131_v20, 0.0  ;;  %v3041_v48 = vmul.f32 %v7958_v16, %v7968_v27  ;;  %v11544_v12 = vrot.slane %v8162_v58, 1 }
 0x16f   : > { %11539 = vst [vmem:[#allocation46_spill] sm:$0xff] %v8310_v6  ;;  %v3591_v25 = vadd.f32 %v3559_v7, %v3519_v0  ;;  %v3080_v53 = vmul.f32 %v8011_v3, %v2905_v15  ;;  %v3215_v46 = vadd.f32 %v3183_v13, %v2808_v35  ;;  %v3152_v52 = vmul.f32 %v8045_v28, %v8145_v41 }
 0x170   : > { %v8343_v29 = vsel %vm11532_vm3, %v11544_v12, %v2564_v9  ;;  %v2737_v59 = vadd.f32 %v2705_v32, %v2665_v18  ;;  %v3312_v20 = vsel %vm6560_vm9, %v8323_v56, 0.0  ;;  %v3448_v27 = vmul.f32 %v8050_v63, %v8162_v58 }
 0x171   : > { %v3112_v57 = vadd.f32 %v3080_v53, %v3041_v48  ;;  %v3488_v12 = vmul.f32 %v8068_v55, %v3312_v20  ;;  %v3560_v18 = vmul.f32 %v8084_v43, %v8343_v29  ;;  %v8357_v13 = vadd.f32 %v3591_v25, %v3215_v46 }
 0x172   : > { %v2809_v0 = vadd.f32 %v2777_v42, %v2737_v59  ;;  %v11546_v41 = vrot.slane %v8156_v50, 7  ;;  %v11547_v15 = vrot.slane %v8162_v58, 7  ;;  %v11548_v42 = vrot.slane %v8285_v61, 1 }
 0x173   : > { %11545 = vst [vmem:[#allocation47_spill] sm:$0xff] %v8357_v13  ;;  %v3184_v53 = vadd.f32 %v3152_v52, %v3112_v57  ;;  %v3520_v20 = vadd.f32 %v3488_v12, %v3448_v27  ;;  %v2626_v46 = vsel %vm6620_vm10, %v8275_v49, 0.0  ;;  %v3654_v57 = vld [vmem:[%s11122_s7 + $0x20] sm:$0xff]  ;;  %v3655_v52 = vld [vmem:[%s11122_s7 + $0x28] sm:$0xff] }
 0x174   : > { %v8365_v37 = vsel %vm11522_vm0, %v11547_v15, %v11546_v41  ;;  %v8371_v48 = vsel %vm11549_vm14, %v2564_v9, %v11548_v42  ;;  %v2666_v41 = vmul.f32 %v7953_v2, %v7986_v36  ;;  %v2706_v15 = vmul.f32 %v8019_v14, %v8269_v17  ;;  %vm11561_vm14 = vmmov %vm11532_vm3 }
 0x175   : > { %v2778_v13 = vmul.f32 %v8024_v8, %v2626_v46  ;;  %v3216_v27 = vadd.f32 %v3184_v53, %v2809_v0  ;;  %v3592_v12 = vadd.f32 %v3560_v18, %v3520_v20  ;;  %v5679_v42 = vpack.c.bf16 %v3655_v52, %v3654_v57 }
 0x176   : > { %v5519_v7 = vpop.f32.mrb[12].mxu0  ;;  %v2738_v46 = vadd.f32 %v2706_v15, %v2666_v41  ;;  %v3409_v53 = vsel %vm6620_vm10, %v8371_v48, 0.0  ;;  %v3489_v5 = vmul.f32 %v8068_v55, %v8365_v37  ;;  %v3657_v15 = vld [vmem:[%s11122_s7 + $0x38] sm:$0xff]  ;;  %v11552_v57 = vrot.slane %v8285_v61, 7 }
 0x177   : > { %v2273_v35 = vmul.f32 %v5519_v7, %v7928_v26  ;;  %v2154_v32 = vpop.f32.mrb[13].mxu0  ;;  %v8399_v33 = vadd.f32 %v3592_v12, %v3216_v27  ;;  %5680 = vmatprep.subr.bf16.mxu1 %v5679_v42  ;;  %v11553_v52 = vrot.slane %v8156_v50, 7  ;;  %v2531_v12 = vsel %vm6670_vm11, %v8323_v56, 0.0 }
 0x178   : > { %v2272_v59 = vmul.f32 %v7928_v26, %v2154_v32  ;;  %5682 = vmatpush3.bf16.msra.mxu1 %v5679_v42  ;;  %v11556_v18 = vrot.slane %v8285_v61, 1 }
 0x179   : > { %v2312_v7 = vadd.f32 %v7935_v40, %v2273_v35  ;;  %v3002_v35 = vsel %vm6620_vm10, %v8192_v11, 0.0  ;;  %11551 = vst [vmem:[#allocation48_spill] sm:$0xff] %v8399_v33  ;;  %v2810_v11 = vadd.f32 %v2778_v13, %v2738_v46  ;;  %v3656_v13 = vld [vmem:[%s11122_s7 + $0x30] sm:$0xff]  ;;  %vm11614_vm10 = vcmp.lt.s32.totalorder %v6104_v10, 1 }
 0x17a   : > { %v2311_v9 = vadd.f32 %v7935_v40, %v2272_v59  ;;  %v3042_v59 = vmul.f32 %v7958_v16, %v7964_v4  ;;  %v3153_v0 = vmul.f32 %v8045_v28, %v3002_v35  ;;  %v3449_v4 = vmul.f32 %v8050_v63, %v8156_v50 }
 0x17b   : > { %v8393_v32 = vmax.f32 %v2312_v7, 0.0  ;;  %v2566_v35 = vrot.slane %v8277_v19, 1  ;;  %v5683_v42 = vpack.c.bf16 %v3657_v15, %v3656_v13  ;;  %v2907_v13 = vsel %vm6670_vm11, %v8224_v38, 0.0  ;;  %v3659_v15 = vld [vmem:[%s11122_s7 + $0x48] sm:$0xff] }
 0x17c   : > { %v8397_v6 = vmax.f32 %v2311_v9, 0.0  ;;  %v3113_v41 = vadd.f32 %v3081_v60, %v3042_v59  ;;  %v3561_v9 = vmul.f32 %v8084_v43, %v3409_v53  ;;  %v8427_v60 = vsel %vm11554_vm1, %v11553_v52, %v11552_v57  ;;  %vm11566_vm1 = vmmov %vm11522_vm0 }
 0x17d   : > { %v3521_v59 = vadd.f32 %v3489_v5, %v3449_v4  ;;  %v2667_v53 = vmul.f32 %v7953_v2, %v8162_v58  ;;  %v8439_v20 = vsel %vm11532_vm3, %v11556_v18, %v2566_v35  ;;  %v2707_v57 = vmul.f32 %v8019_v14, %v2531_v12  ;;  %5684 = vmatprep.subr.bf16.mxu1 %v5683_v42  ;;  %v3658_v18 = vld [vmem:[%s11122_s7 + $0x40] sm:$0xff] }
 0x17e   : > { %v3185_v46 = vadd.f32 %v3153_v0, %v3113_v41  ;;  %v2779_v52 = vmul.f32 %v8024_v8, %v8343_v29  ;;  %v3043_v41 = vmul.f32 %v7958_v16, %v7992_v30  ;;  %v3082_v5 = vmul.f32 %v8011_v3, %v2907_v13  ;;  %5686 = vmatpush3.bf16.msra.mxu1 %v5683_v42 }
 0x17f   : > { %v3593_v4 = vadd.f32 %v3561_v9, %v3521_v59  ;;  %v2739_v12 = vadd.f32 %v2707_v57, %v2667_v53  ;;  %v3154_v38 = vmul.f32 %v8045_v28, %v8241_v1  ;;  %v3450_v30 = vmul.f32 %v8050_v63, %v8285_v61 }
 0x180   : > { %v3217_v0 = vadd.f32 %v3185_v46, %v2810_v11  ;;  %v3314_v11 = vsel %vm6670_vm11, %v8427_v60, 0.0  ;;  %v5687_v9 = vpack.c.bf16 %v3659_v15, %v3658_v18  ;;  %v3114_v46 = vadd.f32 %v3082_v5, %v3043_v41 }
 0x181   : > { %v3490_v59 = vmul.f32 %v8068_v55, %v3314_v11  ;;  %v2811_v13 = vadd.f32 %v2779_v52, %v2739_v12  ;;  %v3562_v53 = vmul.f32 %v8084_v43, %v8439_v20  ;;  %v11558_v57 = vrot.slane %v8277_v19, 7 }
 0x182   : > { %v8463_v42 = vadd.f32 %v3593_v4, %v3217_v0  ;;  %v11559_v1 = vrot.slane %v8285_v61, 7  ;;  %v11560_v25 = vrot.slane %v8397_v6, 1  ;;  %5688 = vmatprep.subr.bf16.mxu1 %v5687_v9  ;;  %v3186_v52 = vadd.f32 %v3154_v38, %v3114_v46 }
 0x183   : > { %v3522_v41 = vadd.f32 %v3490_v59, %v3450_v30  ;;  %v2628_v18 = vsel %vm6718_vm12, %v8371_v48, 0.0  ;;  %v2668_v15 = vmul.f32 %v7953_v2, %v8156_v50  ;;  %5690 = vmatpush3.bf16.msra.mxu1 %v5687_v9  ;;  %v2708_v38 = vmul.f32 %v8019_v14, %v8365_v37 }
 0x184   : > { %11557 = vst [vmem:[#allocation49_spill] sm:$0xff] %v8463_v42  ;;  %v8474_v7 = vsel %vm11522_vm0, %v11559_v1, %v11558_v57  ;;  %v8480_v0 = vsel %vm11561_vm14, %v2566_v35, %v11560_v25  ;;  %v3660_v25 = vld [vmem:[%s11122_s7 + $0x50] sm:$0xff]  ;;  %v3661_v35 = vld [vmem:[%s11122_s7 + $0x58] sm:$0xff]  ;;  %v2780_v30 = vmul.f32 %v8024_v8, %v2628_v18  ;;  %v3004_v46 = vsel %vm6718_vm12, %v8275_v49, 0.0  ;;  %v3662_v57 = vld [vmem:[%s11122_s7 + $0x60] sm:$0xff] }
 0x185   : > { %v5691_v9 = vpack.c.bf16 %v3661_v35, %v3660_v25  ;;  %v3663_v1 = vld [vmem:[%s11122_s7 + $0x68] sm:$0xff]  ;;  %v3218_v18 = vadd.f32 %v3186_v52, %v2811_v13  ;;  %v3594_v27 = vadd.f32 %v3562_v53, %v3522_v41  ;;  %v8516_v25 = vmul.f32 %v8045_v28, %v7998_v44  ;;  %vm11572_vm14 = vmmov %vm11532_vm3 }
 0x186   : > { %v5695_v49 = vpack.c.bf16 %v3663_v1, %v3662_v57  ;;  %v2740_v35 = vadd.f32 %v2708_v38, %v2668_v15  ;;  %v3044_v13 = vmul.f32 %v7958_v16, %v7986_v36  ;;  %v3083_v41 = vmul.f32 %v8011_v3, %v8269_v17 }
 0x187   : > { %v5522_v4 = vpop.f32.mrb[14].mxu0  ;;  %5692 = vmatprep.subr.bf16.mxu1 %v5691_v9  ;;  %v8519_v54 = vadd.f32 %v3594_v27, %v3218_v18  ;;  %v3411_v27 = vsel %vm6718_vm12, %v8480_v0, 0.0  ;;  %v3451_v15 = vmul.f32 %v8050_v63, %v8277_v19  ;;  %v3491_v36 = vmul.f32 %v8068_v55, %v8474_v7 }
 0x188   : > { %v2275_v12 = vmul.f32 %v5522_v4, %v7928_v26  ;;  %v2164_v11 = vpop.f32.mrb[15].mxu0  ;;  %v3664_v4 = vld [vmem:[%s11122_s7 + $0x70] sm:$0xff]  ;;  %5694 = vmatpush3.bf16.msra.mxu1 %v5691_v9  ;;  %v2812_v52 = vadd.f32 %v2780_v30, %v2740_v35  ;;  %v3115_v38 = vadd.f32 %v3083_v41, %v3044_v13  ;;  %v3563_v17 = vmul.f32 %v8084_v43, %v3411_v27 }
 0x189   : > { %v2274_v59 = vmul.f32 %v7928_v26, %v2164_v11  ;;  %v3665_v11 = vld [vmem:[%s11122_s7 + $0x78] sm:$0xff]  ;;  %11563 = vst [vmem:[#allocation50_spill] sm:$0xff] %v8519_v54  ;;  %5696 = vmatprep.subr.bf16.mxu1 %v5695_v49  ;;  %v11564_v30 = vrot.slane %v8397_v6, 7  ;;  %v3523_v1 = vadd.f32 %v3491_v36, %v3451_v15  ;;  %v2533_v18 = vsel %vm6769_vm13, %v8427_v60, 0.0 }
 0x18a   : > { %v2314_v42 = vadd.f32 %v7935_v40, %v2275_v12  ;;  %v5699_v22 = vpack.c.bf16 %v3665_v11, %v3664_v4  ;;  %v3155_v12 = vmul.f32 %v8045_v28, %v3004_v46  ;;  %v2568_v35 = vrot.slane %v8393_v32, 1 }
 0x18b   : > { %v2313_v33 = vadd.f32 %v7935_v40, %v2274_v59  ;;  %v2669_v13 = vmul.f32 %v7953_v2, %v8285_v61  ;;  %v2709_v41 = vmul.f32 %v8019_v14, %v2533_v18  ;;  %v3595_v27 = vadd.f32 %v3563_v17, %v3523_v1 }
 0x18c   : > { %v8523_v53 = vmax.f32 %v2314_v42, 0.0  ;;  %5698 = vmatpush3.bf16.msra.mxu1 %v5695_v49  ;;  %v3187_v11 = vadd.f32 %v3155_v12, %v3115_v38  ;;  %v2909_v15 = vsel %vm6769_vm13, %v8323_v56, 0.0  ;;  %v3045_v49 = vmul.f32 %v7958_v16, %v8162_v58 }
 0x18d   : > { %v8528_v57 = vmax.f32 %v2313_v33, 0.0  ;;  %v11565_v33 = vrot.slane %v8277_v19, 7  ;;  %5700 = vmatprep.subr.bf16.mxu1 %v5699_v22  ;;  %v11568_v36 = vrot.slane %v8397_v6, 1  ;;  %v3084_v17 = vmul.f32 %v8011_v3, %v2909_v15 }
 0x18e   : > { %v3219_v12 = vadd.f32 %v3187_v11, %v2812_v52  ;;  %v3156_v1 = vmul.f32 %v8045_v28, %v8343_v29  ;;  %v3452_v58 = vmul.f32 %v8050_v63, %v8397_v6  ;;  %v11570_v15 = vrot.slane %v8393_v32, 7 }
 0x18f   : > { %v8545_v46 = vsel %vm11566_vm1, %v11565_v33, %v11564_v30  ;;  %v11241_v9 = vrot.slane %v8528_v57, 1  ;;  %v2781_v30 = vmul.f32 %v8024_v8, %v8439_v20  ;;  %v8567_v38 = vsel %vm11532_vm3, %v11568_v36, %v2568_v35  ;;  %vm11578_vm3 = vmmov %vm11522_vm0 }
 0x190   : > { %v2741_v33 = vadd.f32 %v2709_v41, %v2669_v13  ;;  %v3316_v56 = vsel %vm6769_vm13, %v8545_v46, 0.0  ;;  %v3564_v52 = vmul.f32 %v8084_v43, %v8567_v38  ;;  %5702 = vmatpush3.bf16.msra.mxu1 %v5699_v22  ;;  %v8579_v18 = vadd.f32 %v3595_v27, %v3219_v12  ;;  %v11573_v22 = vld [vmem:[#allocation20_spill] sm:$0xff] }
 0x191   : > { %v3116_v13 = vadd.f32 %v3084_v17, %v3045_v49  ;;  %v3492_v41 = vmul.f32 %v8068_v55, %v3316_v56  ;;  %v11571_v29 = vrot.slane %v8397_v6, 7  ;;  %v8594_v42 = vsel %vm11572_vm14, %v2568_v35, %v11241_v9 }
 0x192   : > { %11569 = vst [vmem:[#allocation51_spill] sm:$0xff] %v8579_v18  ;;  %v2813_v11 = vadd.f32 %v2781_v30, %v2741_v33  ;;  %vm11574_vm1 = vnez %v11573_v22  ;;  %v2670_v30 = vmul.f32 %v7953_v2, %v8277_v19  ;;  %v2710_v33 = vmul.f32 %v8019_v14, %v8474_v7 }
 0x193   : > { %v8588_v36 = vsel %vm11522_vm0, %v11571_v29, %v11570_v15  ;;  %v2630_v27 = vsel %vm11574_vm1, %v8480_v0, 0.0  ;;  %v3188_v49 = vadd.f32 %v3156_v1, %v3116_v13  ;;  %v3524_v12 = vadd.f32 %v3492_v41, %v3452_v58 }
 0x194   : > { %v2782_v17 = vmul.f32 %v8024_v8, %v2630_v27  ;;  %v3006_v35 = vsel %vm11574_vm1, %v8371_v48, 0.0  ;;  %v3046_v15 = vmul.f32 %v7958_v16, %v8156_v50  ;;  %v3085_v29 = vmul.f32 %v8011_v3, %v8365_v37 }
 0x195   : > { %v3413_v1 = vsel %vm11574_vm1, %v8594_v42, 0.0  ;;  %v3220_v41 = vadd.f32 %v3188_v49, %v2813_v11  ;;  %v3596_v27 = vadd.f32 %v3564_v52, %v3524_v12  ;;  %v2742_v9 = vadd.f32 %v2710_v33, %v2670_v30 }
 0x196   : > { %v3117_v5 = vadd.f32 %v3085_v29, %v3046_v15  ;;  %v3157_v48 = vmul.f32 %v8045_v28, %v3006_v35  ;;  %v3453_v50 = vmul.f32 %v8050_v63, %v8393_v32  ;;  %v3565_v30 = vmul.f32 %v8084_v43, %v3413_v1 }
 0x197   : > { %v8620_v4 = vadd.f32 %v3596_v27, %v3220_v41  ;;  %v2814_v22 = vadd.f32 %v2782_v17, %v2742_v9  ;;  %v11576_v49 = vrot.slane %v8528_v57, 7  ;;  %v11577_v12 = vrot.slane %v8393_v32, 7  ;;  %v11579_v9 = vld [vmem:[#allocation21_spill] sm:$0xff] }
 0x198   : > { %v5525_v56 = vpop.f32.mrb[16].mxu0  ;;  %v3189_v52 = vadd.f32 %v3157_v48, %v3117_v5  ;;  %vm11580_vm0 = vnez %v11579_v9  ;;  %v2671_v1 = vmul.f32 %v7953_v2, %v8397_v6  ;;  %v11581_v27 = vrot.slane %v8528_v57, 1 }
 0x199   : > { %v2277_v58 = vmul.f32 %v5525_v56, %v7928_v26  ;;  %v2174_v13 = vpop.f32.mrb[17].mxu0  ;;  %11575 = vst [vmem:[#allocation52_spill] sm:$0xff] %v8620_v4  ;;  %v3493_v56 = vmul.f32 %v8068_v55, %v8588_v36  ;;  %v8632_v33 = vsel %vm11578_vm3, %v11577_v12, %v11576_v49  ;;  %v2535_v17 = vsel %vm11580_vm0, %v8545_v46, 0.0 }
 0x19a   : > { %v2276_v59 = vmul.f32 %v7928_v26, %v2174_v13  ;;  %v3221_v29 = vadd.f32 %v3189_v52, %v2814_v22  ;;  %v3158_v12 = vmul.f32 %v8045_v28, %v8439_v20  ;;  %vm11599_vm12 = vcmp.lt.s32.totalorder %v6104_v10, 7 }
 0x19b   : > { %v2316_v37 = vadd.f32 %v7935_v40, %v2277_v58  ;;  %v3525_v15 = vadd.f32 %v3493_v56, %v3453_v50  ;;  %v2711_v58 = vmul.f32 %v8019_v14, %v2535_v17  ;;  %v2783_v50 = vmul.f32 %v8024_v8, %v8567_v38 }
 0x19c   : > { %v2315_v11 = vadd.f32 %v7935_v40, %v2276_v59  ;;  %v2570_v59 = vrot.slane %v8523_v53, 1  ;;  %v3318_v17 = vsel %vm11580_vm0, %v8632_v33, 0.0 }
 0x19d   : > { %v8634_v35 = vmax.f32 %v2316_v37, 0.0  ;;  %v3597_v41 = vadd.f32 %v3565_v30, %v3525_v15  ;;  %v2743_v56 = vadd.f32 %v2711_v58, %v2671_v1  ;;  %v3047_v30 = vmul.f32 %v7958_v16, %v8285_v61 }
 0x19e   : > { %v8640_v5 = vmax.f32 %v2315_v11, 0.0  ;;  %v8650_v48 = vsel %vm11572_vm14, %v11581_v27, %v2570_v59  ;;  %v2911_v11 = vsel %vm11580_vm0, %v8427_v60, 0.0  ;;  %v3454_v1 = vmul.f32 %v8050_v63, %v8528_v57 }
 0x19f   : > { %v8659_v52 = vadd.f32 %v3597_v41, %v3221_v29  ;;  %v3086_v49 = vmul.f32 %v8011_v3, %v2911_v11  ;;  %v2815_v15 = vadd.f32 %v2783_v50, %v2743_v56  ;;  %v3566_v60 = vmul.f32 %v8084_v43, %v8650_v48  ;;  %v11585_v50 = vld [vmem:[#allocation22_spill] sm:$0xff] }
 0x1a0   : > { %v2571_v22 = vrot.slane %v8640_v5, 1  ;;  %v3494_v58 = vmul.f32 %v8068_v55, %v3318_v17  ;;  %v11583_v61 = vrot.slane %v8523_v53, 7  ;;  %v11584_v41 = vrot.slane %v8528_v57, 7 }
 0x1a1   : > { %11582 = vst [vmem:[#allocation53_spill] sm:$0xff] %v8659_v52  ;;  %v3118_v29 = vadd.f32 %v3086_v49, %v3047_v30  ;;  %vm11586_vm1 = vnez %v11585_v50  ;;  %v2672_v11 = vmul.f32 %v7953_v2, %v8393_v32  ;;  %v2712_v30 = vmul.f32 %v8019_v14, %v8588_v36 }
 0x1a2   : > { %v8680_v20 = vsel %vm11578_vm3, %v11584_v41, %v11583_v61  ;;  %v8684_v27 = vsel %vm11572_vm14, %v2570_v59, %v2571_v22  ;;  %v2632_v56 = vsel %vm11586_vm1, %v8594_v42, 0.0  ;;  %v3008_v49 = vsel %vm11586_vm1, %v8480_v0, 0.0 }
 0x1a3   : > { %v3190_v17 = vadd.f32 %v3158_v12, %v3118_v29  ;;  %v3526_v61 = vadd.f32 %v3494_v58, %v3454_v1  ;;  %v2784_v41 = vmul.f32 %v8024_v8, %v2632_v56  ;;  %v3048_v59 = vmul.f32 %v7958_v16, %v8277_v19 }
 0x1a4   : > { %v2744_v13 = vadd.f32 %v2712_v30, %v2672_v11  ;;  %v3087_v37 = vmul.f32 %v8011_v3, %v8474_v7  ;;  %v3159_v9 = vmul.f32 %v8045_v28, %v3008_v49  ;;  %v3415_v52 = vsel %vm11586_vm1, %v8684_v27, 0.0 }
 0x1a5   : > { %v3222_v4 = vadd.f32 %v3190_v17, %v2815_v15  ;;  %v3598_v18 = vadd.f32 %v3566_v60, %v3526_v61  ;;  %v3455_v0 = vmul.f32 %v8050_v63, %v8523_v53  ;;  %v3495_v12 = vmul.f32 %v8068_v55, %v8680_v20  ;;  %v11590_v17 = vld [vmem:[#allocation23_spill] sm:$0xff] }
 0x1a6   : > { %v2816_v19 = vadd.f32 %v2784_v41, %v2744_v13  ;;  %v3119_v29 = vadd.f32 %v3087_v37, %v3048_v59  ;;  %v3567_v58 = vmul.f32 %v8084_v43, %v3415_v52  ;;  %v11587_v7 = vrot.slane %v8640_v5, 7 }
 0x1a7   : > { %v11588_v56 = vrot.slane %v8523_v53, 7  ;;  %v8719_v30 = vadd.f32 %v3598_v18, %v3222_v4  ;;  %v3527_v49 = vadd.f32 %v3495_v12, %v3455_v0  ;;  %vm11591_vm14 = vnez %v11590_v17 }
 0x1a8   : > { %v2537_v13 = vsel %vm11591_vm14, %v8632_v33, 0.0  ;;  %v3191_v52 = vadd.f32 %v3159_v9, %v3119_v29  ;;  %v2572_v61 = vrot.slane %v8634_v35, 1  ;;  %v2673_v41 = vmul.f32 %v7953_v2, %v8528_v57 }
 0x1a9   : > { %v5528_v1 = vpop.f32.mrb[18].mxu0  ;;  %v8716_v11 = vsel %vm11578_vm3, %v11588_v56, %v11587_v7  ;;  %11589 = vst [vmem:[#allocation54_spill] sm:$0xff] %v8719_v30  ;;  %v3599_v7 = vadd.f32 %v3567_v58, %v3527_v49  ;;  %v2785_v4 = vmul.f32 %v8024_v8, %v8650_v48  ;;  %vm11592_vm3 = vcmp.lt.s32.totalorder %v6104_v10, 7 }
 0x1aa   : > { %v2279_v15 = vmul.f32 %v5528_v1, %v7928_v26  ;;  %v2184_v60 = vpop.f32.mrb[19].mxu0  ;;  %v2713_v1 = vmul.f32 %v8019_v14, %v2537_v13  ;;  %v3223_v0 = vadd.f32 %v3191_v52, %v2816_v19  ;;  %v2913_v9 = vsel %vm11591_vm14, %v8545_v46, 0.0 }
 0x1ab   : > { %v2278_v37 = vmul.f32 %v7928_v26, %v2184_v60  ;;  %v8735_v26 = vsel %vm11592_vm3, %v2571_v22, %v2572_v61  ;;  %v3049_v58 = vmul.f32 %v7958_v16, %v8397_v6  ;;  %v3088_v56 = vmul.f32 %v8011_v3, %v2913_v9 }
 0x1ac   : > { %v2318_v59 = vadd.f32 %v7935_v40, %v2279_v15  ;;  %v2745_v29 = vadd.f32 %v2713_v1, %v2673_v41  ;;  %v3160_v22 = vmul.f32 %v8045_v28, %v8567_v38  ;;  %v3320_v19 = vsel %vm11591_vm14, %v8716_v11, 0.0 }
 0x1ad   : > { %v2317_v18 = vadd.f32 %v7935_v40, %v2278_v37  ;;  %v8747_v40 = vadd.f32 %v3599_v7, %v3223_v0  ;;  %v3120_v49 = vadd.f32 %v3088_v56, %v3049_v58  ;;  %v3456_v6 = vmul.f32 %v8050_v63, %v8640_v5 }
 0x1ae   : > { %v8740_v12 = vmax.f32 %v2318_v59, 0.0  ;;  %v2817_v60 = vadd.f32 %v2785_v4, %v2745_v29  ;;  %v3496_v52 = vmul.f32 %v8068_v55, %v3320_v19  ;;  %v3568_v38 = vmul.f32 %v8084_v43, %v8735_v26  ;;  %v11597_v4 = vld [vmem:[#allocation24_spill] sm:$0xff] }
 0x1af   : > { %v8745_v15 = vmax.f32 %v2317_v18, 0.0  ;;  %11593 = vst [vmem:[#allocation55_spill] sm:$0xff] %v8747_v40  ;;  %v3192_v41 = vadd.f32 %v3160_v22, %v3120_v49  ;;  %v11594_v59 = vrot.slane %v8634_v35, 7  ;;  %v11595_v7 = vrot.slane %v8640_v5, 7 }
 0x1b0   : > { %vm11596_vm3 = vcmp.lt.s32.totalorder %v6104_v10, 1  ;;  %vm11598_vm1 = vnez %v11597_v4  ;;  %v2674_v0 = vmul.f32 %v7953_v2, %v8523_v53  ;;  %v3528_v9 = vadd.f32 %v3496_v52, %v3456_v6 }
 0x1b1   : > { %v2477_v13 = vrot.slane %v8745_v15, 7  ;;  %v2573_v37 = vrot.slane %v8745_v15, 1  ;;  %v8768_v1 = vsel %vm11596_vm3, %v11595_v7, %v11594_v59  ;;  %v2634_v18 = vsel %vm11598_vm1, %v8684_v27, 0.0 }
 0x1b2   : > { %v2714_v58 = vmul.f32 %v8019_v14, %v8680_v20  ;;  %v2786_v56 = vmul.f32 %v8024_v8, %v2634_v18  ;;  %v3224_v22 = vadd.f32 %v3192_v41, %v2817_v60  ;;  %v3010_v19 = vsel %vm11598_vm1, %v8594_v42, 0.0 }
 0x1b3   : > { %v8777_v29 = vsel %vm11599_vm12, %v2572_v61, %v2573_v37  ;;  %v3050_v49 = vmul.f32 %v7958_v16, %v8393_v32  ;;  %v3089_v6 = vmul.f32 %v8011_v3, %v8588_v36  ;;  %v3600_v52 = vadd.f32 %v3568_v38, %v3528_v9  ;;  %vm11602_vm12 = vmmov %vm11596_vm3  ;;  %v11603_v9 = vld [vmem:[#allocation25_spill] sm:$0xff] }
 0x1b4   : > { %v2746_v59 = vadd.f32 %v2714_v58, %v2674_v0  ;;  %v3161_v61 = vmul.f32 %v8045_v28, %v3010_v19  ;;  %v3417_v7 = vsel %vm11598_vm1, %v8777_v29, 0.0  ;;  %v3457_v60 = vmul.f32 %v8050_v63, %v8634_v35 }
 0x1b5   : > { %v3121_v18 = vadd.f32 %v3089_v6, %v3050_v49  ;;  %v3497_v42 = vmul.f32 %v8068_v55, %v8768_v1  ;;  %v3569_v32 = vmul.f32 %v8084_v43, %v3417_v7  ;;  %v8798_v41 = vadd.f32 %v3600_v52, %v3224_v22 }
 0x1b6   : > { %v2818_v36 = vadd.f32 %v2786_v56, %v2746_v59  ;;  %v11601_v38 = vrot.slane %v8634_v35, 7  ;;  %vm11604_vm3 = vnez %v11603_v9  ;;  %v2574_v6 = vrot.slane %v8740_v12, 1  ;;  %v8983_v9 = vld [vmem:[%s11121_s6 + $0x6] ss:$0 sm:$0xff] }
 0x1b7   : > { %11600 = vst [vmem:[#allocation56_spill] sm:$0xff] %v8798_v41  ;;  %v2539_v58 = vsel %vm11604_vm3, %v8716_v11, 0.0  ;;  %v3193_v19 = vadd.f32 %v3161_v61, %v3121_v18  ;;  %v3529_v49 = vadd.f32 %v3497_v42, %v3457_v60  ;;  %v2675_v7 = vmul.f32 %v7953_v2, %v8640_v5  ;;  %v8823_v61 = vld [vmem:[%s11119_s4] ss:$0 sm:$0xff] }
 0x1b8   : > { %v8804_v0 = vsel %vm11602_vm12, %v11601_v38, %v2477_v13  ;;  %v2715_v56 = vmul.f32 %v8019_v14, %v2539_v58  ;;  %v2787_v52 = vmul.f32 %v8024_v8, %v8735_v26  ;;  %v2915_v59 = vsel %vm11604_vm3, %v8632_v33, 0.0 }
 0x1b9   : > { %v3051_v38 = vmul.f32 %v7958_v16, %v8528_v57  ;;  %v3225_v60 = vadd.f32 %v3193_v19, %v2818_v36  ;;  %v3601_v42 = vadd.f32 %v3569_v32, %v3529_v49  ;;  %vm11605_vm12 = vcmp.lt.s32.totalorder %v6104_v10, 7  ;;  %v8837_v57 = vld [vmem:[%s11120_s5] ss:$0 sm:$0xff] }
 0x1ba   : > { %v5531_v22 = vpop.f32.mrb[20].mxu0  ;;  %v8828_v58 = vsel %vm11605_vm12, %v2573_v37, %v2574_v6  ;;  %v2747_v33 = vadd.f32 %v2715_v56, %v2675_v7  ;;  %v3090_v4 = vmul.f32 %v8011_v3, %v2915_v59  ;;  %v3162_v16 = vmul.f32 %v8045_v28, %v8650_v48 }
 0x1bb   : > { %v2281_v2 = vmul.f32 %v8823_v61, %v5531_v22  ;;  %v2194_v18 = vpop.f32.mrb[21].mxu0  ;;  %v8840_v32 = vadd.f32 %v3601_v42, %v3225_v60  ;;  %v3322_v37 = vsel %vm11604_vm3, %v8804_v0, 0.0  ;;  %v3458_v19 = vmul.f32 %v8050_v63, %v8745_v15  ;;  %v11609_v60 = vld [vmem:[#allocation26_spill] sm:$0xff] }
 0x1bc   : > { %v2280_v46 = vmul.f32 %v8823_v61, %v2194_v18  ;;  %v2819_v7 = vadd.f32 %v2787_v52, %v2747_v33  ;;  %v3122_v48 = vadd.f32 %v3090_v4, %v3051_v38  ;;  %v3498_v22 = vmul.f32 %v8068_v55, %v3322_v37  ;;  %v8867_v38 = vld [vmem:[%s11121_s6 + $0x4] ss:$0 sm:$0xff] }
 0x1bd   : > { %v2320_v36 = vadd.f32 %v8837_v57, %v2281_v2  ;;  %11606 = vst [vmem:[#allocation57_spill] sm:$0xff] %v8840_v32  ;;  %v3570_v59 = vmul.f32 %v8084_v43, %v8828_v58  ;;  %v11607_v2 = vrot.slane %v8740_v12, 7  ;;  %vm11608_vm12 = vcmp.lt.s32.totalorder %v6104_v10, 1 }
 0x1be   : > { %v2319_v49 = vadd.f32 %v8837_v57, %v2280_v46  ;;  %vm11610_vm1 = vnez %v11609_v60  ;;  %v3194_v4 = vadd.f32 %v3162_v16, %v3122_v48  ;;  %v3530_v52 = vadd.f32 %v3498_v22, %v3458_v19 }
 0x1bf   : > { %v8849_v56 = vmax.f32 %v2320_v36, 0.0  ;;  %v8857_v18 = vsel %vm11608_vm12, %v2477_v13, %v11607_v2  ;;  %v2636_v42 = vsel %vm11610_vm1, %v8777_v29, 0.0  ;;  %v2676_v33 = vmul.f32 %v8867_v38, %v8634_v35  ;;  %v8883_v36 = vld [vmem:[%s11121_s6 + $0x1] ss:$0 sm:$0xff] }
 0x1c0   : > { %v8862_v46 = vmax.f32 %v2319_v49, 0.0  ;;  %v2716_v13 = vmul.f32 %v8019_v14, %v8768_v1  ;;  %v2788_v37 = vmul.f32 %v8024_v8, %v2636_v42  ;;  %v3012_v16 = vsel %vm11610_vm1, %v8684_v27, 0.0 }
 0x1c1   : > { %v3226_v48 = vadd.f32 %v3194_v4, %v2819_v7  ;;  %v3602_v22 = vadd.f32 %v3570_v59, %v3530_v52  ;;  %v3052_v14 = vmul.f32 %v8883_v36, %v8523_v53  ;;  %v3091_v8 = vmul.f32 %v8011_v3, %v8680_v20 }
 0x1c2   : > { %v2479_v19 = vrot.slane %v8862_v46, 7  ;;  %v2575_v49 = vrot.slane %v8862_v46, 1  ;;  %v2748_v2 = vadd.f32 %v2716_v13, %v2676_v33  ;;  %v3163_v27 = vmul.f32 %v8045_v28, %v3012_v16 }
 0x1c3   : > { %v8890_v42 = vadd.f32 %v3602_v22, %v3226_v48  ;;  %vm11612_vm12 = vcmp.lt.s32.totalorder %v6104_v10, 7  ;;  %v3459_v59 = vmul.f32 %v8050_v63, %v8740_v12  ;;  %v3499_v4 = vmul.f32 %v8068_v55, %v8857_v18  ;;  %v11615_v63 = vld [vmem:[#allocation27_spill] sm:$0xff]  ;;  %v8919_v48 = vld [vmem:[%s11121_s6 + $0x3] ss:$0 sm:$0xff] }
 0x1c4   : > { %v8894_v7 = vsel %vm11612_vm12, %v2574_v6, %v2575_v49  ;;  %v2820_v52 = vadd.f32 %v2788_v37, %v2748_v2  ;;  %v3123_v33 = vadd.f32 %v3091_v8, %v3052_v14  ;;  %v11613_v28 = vrot.slane %v8740_v12, 7 }
 0x1c5   : > { %11611 = vst [vmem:[#allocation58_spill] sm:$0xff] %v8890_v42  ;;  %v3419_v3 = vsel %vm11610_vm1, %v8894_v7, 0.0  ;;  %v3531_v20 = vadd.f32 %v3499_v4, %v3459_v59  ;;  %vm11616_vm12 = vnez %v11615_v63  ;;  %v11254_v55 = vrot.slane %v8849_v56, 1  ;;  %v11621_v42 = vld [vmem:[#allocation28_spill] sm:$0xff] }
 0x1c6   : > { %v8907_v53 = vsel %vm11614_vm10, %v11613_v28, %v2479_v19  ;;  %v3571_v6 = vmul.f32 %v8084_v43, %v3419_v3  ;;  %v2541_v13 = vsel %vm11616_vm12, %v8804_v0, 0.0  ;;  %v3195_v37 = vadd.f32 %v3163_v27, %v3123_v33  ;;  %v8925_v43 = vld [vmem:[%s11121_s6 + $0x5] ss:$0 sm:$0xff]  ;;  %v8943_v3 = vld [vmem:[%s11121_s6] ss:$0 sm:$0xff] }
 0x1c7   : > { %v2677_v16 = vmul.f32 %v8867_v38, %v8745_v15  ;;  %v2717_v22 = vmul.f32 %v8919_v48, %v2541_v13  ;;  %v2789_v2 = vmul.f32 %v8925_v43, %v8828_v58  ;;  %vm11617_vm10 = vcmp.lt.s32.totalorder %v6104_v10, 7  ;;  %v8966_v13 = vld [vmem:[%s11121_s6 + $0x8] ss:$0 sm:$0xff] }
 0x1c8   : > { %v3603_v14 = vadd.f32 %v3571_v6, %v3531_v20  ;;  %v8933_v8 = vsel %vm11617_vm10, %v2575_v49, %v11254_v55  ;;  %v2917_v27 = vsel %vm11616_vm12, %v8716_v11, 0.0  ;;  %v3053_v59 = vmul.f32 %v8883_v36, %v8640_v5  ;;  %v8949_v49 = vld [vmem:[%s11121_s6 + $0x2] ss:$0 sm:$0xff] }
 0x1c9   : > { %v3227_v4 = vadd.f32 %v3195_v37, %v2820_v52  ;;  %v2749_v33 = vadd.f32 %v2717_v22, %v2677_v16  ;;  %v3092_v28 = vmul.f32 %v8943_v3, %v2917_v27  ;;  %v3164_v11 = vmul.f32 %v8949_v49, %v8735_v26  ;;  %v8959_v52 = vld [vmem:[%s11121_s6 + $0x7] ss:$0 sm:$0xff] }
 0x1ca   : > { %v3324_v5 = vsel %vm11616_vm12, %v8907_v53, 0.0  ;;  %v3460_v6 = vmul.f32 %v8959_v52, %v8862_v46  ;;  %v3572_v26 = vmul.f32 %v8966_v13, %v8933_v8  ;;  %v11618_v37 = vrot.slane %v8849_v56, 7 }
 0x1cb   : > { %v5534_v20 = vpop.f32.mrb[22].mxu0  ;;  %vm11619_vm10 = vcmp.lt.s32.totalorder %v6104_v10, 1  ;;  %v8977_v55 = vadd.f32 %v3603_v14, %v3227_v4  ;;  %v2821_v60 = vadd.f32 %v2789_v2, %v2749_v33  ;;  %v3124_v50 = vadd.f32 %v3092_v28, %v3053_v59 }
 0x1cc   : > { %v8974_v16 = vsel %vm11619_vm10, %v2479_v19, %v11618_v37  ;;  %v2283_v22 = vmul.f32 %v8823_v61, %v5534_v20  ;;  %v2204_v27 = vpop.f32.mrb[23].mxu0  ;;  %v3500_v17 = vmul.f32 %v8983_v9, %v3324_v5  ;;  %vm11622_vm10 = vnez %v11621_v42 }
 0x1cd   : > { %11620 = vst [vmem:[#allocation59_spill] sm:$0xff] %v8977_v55  ;;  %v2282_v63 = vmul.f32 %v8823_v61, %v2204_v27  ;;  %v2638_v19 = vsel %vm11622_vm10, %v8894_v7, 0.0  ;;  %v2678_v20 = vmul.f32 %v8867_v38, %v8740_v12  ;;  %v3196_v2 = vadd.f32 %v3164_v11, %v3124_v50 }
 0x1ce   : > { %v2322_v14 = vadd.f32 %v8837_v57, %v2283_v22  ;;  %v2718_v59 = vmul.f32 %v8919_v48, %v8857_v18  ;;  %v2790_v4 = vmul.f32 %v8925_v43, %v2638_v19  ;;  %v3532_v28 = vadd.f32 %v3500_v17, %v3460_v6 }
 0x1cf   : > { %v2321_v33 = vadd.f32 %v8837_v57, %v2282_v63  ;;  %v3014_v5 = vsel %vm11622_vm10, %v8777_v29, 0.0  ;;  %v3054_v37 = vmul.f32 %v8883_v36, %v8634_v35  ;;  %v3228_v55 = vadd.f32 %v3196_v2, %v2821_v60 }
 0x1d0   : > { %v9001_v27 = vmax.f32 %v2322_v14, 0.0  ;;  %v2750_v22 = vadd.f32 %v2718_v59, %v2678_v20  ;;  %v3093_v50 = vmul.f32 %v8943_v3, %v8768_v1  ;;  %v3604_v19 = vadd.f32 %v3572_v26, %v3532_v28  ;;  %v11624_v26 = vld [vmem:[#allocation29_spill] sm:$0xff] }
 0x1d1   : > { %v9005_v11 = vmax.f32 %v2321_v33, 0.0  ;;  %v3165_v63 = vmul.f32 %v8949_v49, %v3014_v5  ;;  %v3461_v17 = vmul.f32 %v8959_v52, %v8849_v56  ;;  %v3501_v35 = vmul.f32 %v8983_v9, %v8974_v16 }
 0x1d2   : > { %v11265_v29 = vrot.slane %v9001_v27, 7  ;;  %v2822_v6 = vadd.f32 %v2790_v4, %v2750_v22  ;;  %v3125_v32 = vadd.f32 %v3093_v50, %v3054_v37  ;;  %v9015_v1 = vadd.f32 %v3604_v19, %v3228_v55 }
 0x1d3   : > { %v2481_v60 = vrot.slane %v9005_v11, 7  ;;  %v2577_v20 = vrot.slane %v9005_v11, 1  ;;  %vm11625_vm1 = vnez %v11624_v26  ;;  %v3533_v59 = vadd.f32 %v3501_v35, %v3461_v17 }
 0x1d4   : > { %11623 = vst [vmem:[#allocation60_spill] sm:$0xff] %v9015_v1  ;;  %v2543_v14 = vsel %vm11625_vm1, %v8907_v53, 0.0  ;;  %v3197_v2 = vadd.f32 %v3165_v63, %v3125_v32  ;;  %v11263_v33 = vrot.slane %v9001_v27, 1  ;;  %v2679_v4 = vmul.f32 %v8867_v38, %v8862_v46 }
 0x1d5   : > { %v11626_v28 = vrot.slane %v8849_v56, 1  ;;  %vm11627_vm12 = vcmp.lt.s32.totalorder %v6104_v10, 7  ;;  %v11628_v55 = vrot.slane %v8849_v56, 7  ;;  %vm11629_vm3 = vcmp.lt.s32.totalorder %v6104_v10, 1 }
 0x1d6   : > { %v2719_v32 = vmul.f32 %v8919_v48, %v2543_v14  ;;  %v2791_v22 = vmul.f32 %v8925_v43, %v8933_v8  ;;  %v3229_v50 = vadd.f32 %v3197_v2, %v2822_v6  ;;  %v9045_v63 = vsel %vm11627_vm12, %v2577_v20, %v11263_v33 }
 0x1d7   : > { %v9027_v5 = vsel %vm11627_vm12, %v11626_v28, %v2577_v20  ;;  %v9033_v37 = vsel %vm11629_vm3, %v11628_v55, %v2481_v60  ;;  %v2919_v17 = vsel %vm11625_vm1, %v8804_v0, 0.0  ;;  %v3055_v6 = vmul.f32 %v8883_v36, %v8745_v15 }
 0x1d8   : > { %v3421_v19 = vsel %vm11622_vm10, %v9027_v5, 0.0  ;;  %v2751_v14 = vadd.f32 %v2719_v32, %v2679_v4  ;;  %v3094_v2 = vmul.f32 %v8943_v3, %v2919_v17  ;;  %v3166_v28 = vmul.f32 %v8949_v49, %v8828_v58  ;;  %v11630_v17 = vld [vmem:[#allocation30_spill] sm:$0xff] }
 0x1d9   : > { %v3573_v35 = vmul.f32 %v8966_v13, %v3421_v19  ;;  %v3326_v20 = vsel %vm11625_vm1, %v9033_v37, 0.0  ;;  %v3462_v55 = vmul.f32 %v8959_v52, %v9005_v11  ;;  %v3574_v0 = vmul.f32 %v8966_v13, %v9045_v63 }
 0x1da   : > { %v2823_v4 = vadd.f32 %v2791_v22, %v2751_v14  ;;  %v3126_v32 = vadd.f32 %v3094_v2, %v3055_v6  ;;  %v3502_v15 = vmul.f32 %v8983_v9, %v3326_v20  ;;  %v9068_v58 = vsel %vm11629_vm3, %v2481_v60, %v11265_v29 }
 0x1db   : > { %v3605_v19 = vadd.f32 %v3573_v35, %v3533_v59  ;;  %vm11631_vm12 = vnez %v11630_v17  ;;  %v2680_v42 = vmul.f32 %v8867_v38, %v8849_v56  ;;  %v2720_v59 = vmul.f32 %v8919_v48, %v8974_v16 }
 0x1dc   : > { %v2640_v33 = vsel %vm11631_vm12, %v9027_v5, 0.0  ;;  %v5537_v22 = vpop.f32.mrb[24].mxu0  ;;  %v3198_v14 = vadd.f32 %v3166_v28, %v3126_v32  ;;  %v3534_v6 = vadd.f32 %v3502_v15, %v3462_v55  ;;  %v3016_v26 = vsel %vm11631_vm12, %v8894_v7, 0.0 }
 0x1dd   : > { %v9077_v35 = vadd.f32 %v3605_v19, %v3229_v50  ;;  %v2792_v2 = vmul.f32 %v8925_v43, %v2640_v33  ;;  %v2285_v60 = vmul.f32 %v8823_v61, %v5537_v22  ;;  %v2214_v20 = vpop.f32.mrb[25].mxu0  ;;  %v2752_v29 = vadd.f32 %v2720_v59, %v2680_v42 }
 0x1de   : > { %v3056_v1 = vmul.f32 %v8883_v36, %v8740_v12  ;;  %v2284_v41 = vmul.f32 %v8823_v61, %v2214_v20  ;;  %v3230_v40 = vadd.f32 %v3198_v14, %v2823_v4  ;;  %v3606_v50 = vadd.f32 %v3574_v0, %v3534_v6 }
 0x1df   : > { %11632 = vst [vmem:[#allocation61_spill] sm:$0xff] %v9077_v35  ;;  %v3095_v28 = vmul.f32 %v8943_v3, %v8857_v18  ;;  %v2324_v33 = vadd.f32 %v8837_v57, %v2285_v60  ;;  %v2824_v55 = vadd.f32 %v2792_v2, %v2752_v29  ;;  %v3167_v19 = vmul.f32 %v8949_v49, %v3016_v26  ;;  %v11634_v18 = vld [vmem:[#allocation31_spill] sm:$0xff] }
 0x1e0   : > { %v3463_v42 = vmul.f32 %v8959_v52, %v9001_v27  ;;  %v2323_v7 = vadd.f32 %v8837_v57, %v2284_v41  ;;  %v9094_v32 = vadd.f32 %v3606_v50, %v3230_v40  ;;  %v3503_v4 = vmul.f32 %v8983_v9, %v9068_v58 }
 0x1e1   : > { %v3127_v12 = vadd.f32 %v3095_v28, %v3056_v1  ;;  %v9098_v0 = vmax.f32 %v2324_v33, 0.0  ;;  %vm11635_vm3 = vnez %v11634_v18  ;;  %v2681_v29 = vmul.f32 %v8867_v38, %v9005_v11 }
 0x1e2   : > { %11633 = vst [vmem:[#allocation62_spill] sm:$0xff] %v9094_v32  ;;  %v2545_v15 = vsel %vm11635_vm3, %v9033_v37, 0.0  ;;  %v2793_v26 = vmul.f32 %v8925_v43, %v9045_v63  ;;  %v9107_v59 = vmax.f32 %v2323_v7, 0.0  ;;  %v3535_v41 = vadd.f32 %v3503_v4, %v3463_v42 }
 0x1e3   : > { %v3199_v40 = vadd.f32 %v3167_v19, %v3127_v12  ;;  %v2721_v1 = vmul.f32 %v8919_v48, %v2545_v15  ;;  %v11271_v22 = vrot.slane %v9098_v0, 7  ;;  %v11270_v14 = vrot.slane %v9098_v0, 1 }
 0x1e4   : > { %v2921_v6 = vsel %vm11635_vm3, %v8907_v53, 0.0  ;;  %v3057_v2 = vmul.f32 %v8883_v36, %v8862_v46  ;;  %v2483_v60 = vrot.slane %v9107_v59, 7  ;;  %v2579_v20 = vrot.slane %v9107_v59, 1 }
 0x1e5   : > { %v3231_v50 = vadd.f32 %v3199_v40, %v2824_v55  ;;  %v2753_v28 = vadd.f32 %v2721_v1, %v2681_v29  ;;  %v3096_v33 = vmul.f32 %v8943_v3, %v2921_v6  ;;  %v3168_v19 = vmul.f32 %v8949_v49, %v8933_v8 }
 0x1e6   : > { %v3464_v42 = vmul.f32 %v8959_v52, %v9107_v59  ;;  %v2682_v53 = vmul.f32 %v8867_v38, %v9001_v27  ;;  %v11636_v7 = vrot.slane %v9001_v27, 1  ;;  %vm11637_vm10 = vcmp.lt.s32.totalorder %v6104_v10, 7 }
 0x1e7   : > { %v11638_v55 = vrot.slane %v9001_v27, 7  ;;  %vm11639_vm1 = vcmp.lt.s32.totalorder %v6104_v10, 1  ;;  %vm11640_vm14 = vmmov %vm11637_vm10  ;;  %v2825_v4 = vadd.f32 %v2793_v26, %v2753_v28  ;;  %v3128_v29 = vadd.f32 %v3096_v33, %v3057_v2 }
 0x1e8   : > { %v9130_v46 = vsel %vm11637_vm10, %v11636_v7, %v2579_v20  ;;  %v9142_v8 = vsel %vm11640_vm14, %v2579_v20, %v11270_v14  ;;  %v9158_v26 = vsel %vm11639_vm1, %v2483_v60, %v11271_v22  ;;  %v11641_v20 = vld [vmem:[#allocation32_spill] sm:$0xff]  ;;  %v2722_v33 = vmul.f32 %v8919_v48, %v9068_v58 }
 0x1e9   : > { %v9136_v12 = vsel %vm11639_vm1, %v11638_v55, %v2483_v60  ;;  %v3423_v15 = vsel %vm11631_vm12, %v9130_v46, 0.0  ;;  %v3576_v1 = vmul.f32 %v8966_v13, %v9142_v8  ;;  %vm11642_vm14 = vnez %v11641_v20 }
 0x1ea   : > { %v3328_v40 = vsel %vm11635_vm3, %v9136_v12, 0.0  ;;  %v3575_v6 = vmul.f32 %v8966_v13, %v3423_v15  ;;  %v2642_v2 = vsel %vm11642_vm14, %v9130_v46, 0.0  ;;  %v3200_v28 = vadd.f32 %v3168_v19, %v3128_v29 }
 0x1eb   : > { %v3504_v7 = vmul.f32 %v8983_v9, %v3328_v40  ;;  %v2794_v55 = vmul.f32 %v8925_v43, %v2642_v2  ;;  %v3018_v15 = vsel %vm11642_vm14, %v9027_v5, 0.0  ;;  %v3058_v60 = vmul.f32 %v8883_v36, %v8849_v56 }
 0x1ec   : > { %v3607_v40 = vadd.f32 %v3575_v6, %v3535_v41  ;;  %v3097_v22 = vmul.f32 %v8943_v3, %v8974_v16  ;;  %v3232_v17 = vadd.f32 %v3200_v28, %v2825_v4  ;;  %v2754_v18 = vadd.f32 %v2722_v33, %v2682_v53  ;;  %v11644_v16 = vld [vmem:[#allocation33_spill] sm:$0xff] }
 0x1ed   : > { %v3536_v14 = vadd.f32 %v3504_v7, %v3464_v42  ;;  %v3169_v19 = vmul.f32 %v8949_v49, %v3018_v15  ;;  %v3465_v29 = vmul.f32 %v8959_v52, %v9098_v0  ;;  %v3505_v41 = vmul.f32 %v8983_v9, %v9158_v26 }
 0x1ee   : > { %v5540_v2 = vpop.f32.mrb[26].mxu0  ;;  %v9176_v32 = vadd.f32 %v3607_v40, %v3231_v50  ;;  %v3129_v5 = vadd.f32 %v3097_v22, %v3058_v60  ;;  %v2826_v6 = vadd.f32 %v2794_v55, %v2754_v18  ;;  %vm11645_vm10 = vnez %v11644_v16 }
 0x1ef   : > { %v3608_v35 = vadd.f32 %v3576_v1, %v3536_v14  ;;  %v2287_v56 = vmul.f32 %v8823_v61, %v5540_v2  ;;  %v2224_v42 = vpop.f32.mrb[27].mxu0  ;;  %v2547_v53 = vsel %vm11645_vm10, %v9136_v12, 0.0  ;;  %v2683_v4 = vmul.f32 %v8867_v38, %v9107_v59 }
 0x1f0   : > { %11643 = vst [vmem:[#allocation63_spill] sm:$0xff] %v9176_v32  ;;  %v2286_v7 = vmul.f32 %v8823_v61, %v2224_v42  ;;  %v3201_v14 = vadd.f32 %v3169_v19, %v3129_v5  ;;  %v3537_v22 = vadd.f32 %v3505_v41, %v3465_v29  ;;  %v2723_v28 = vmul.f32 %v8919_v48, %v2547_v53 }
 0x1f1   : > { %v9187_v50 = vadd.f32 %v3608_v35, %v3232_v17  ;;  %v2326_v1 = vadd.f32 %v8837_v57, %v2287_v56  ;;  %v2795_v18 = vmul.f32 %v8925_v43, %v9142_v8  ;;  %v2923_v33 = vsel %vm11645_vm10, %v9033_v37, 0.0 }
 0x1f2   : > { %v2325_v55 = vadd.f32 %v8837_v57, %v2286_v7  ;;  %v3233_v15 = vadd.f32 %v3201_v14, %v2826_v6  ;;  %v3059_v17 = vmul.f32 %v8883_v36, %v9005_v11  ;;  %v3098_v35 = vmul.f32 %v8943_v3, %v2923_v33 }
 0x1f3   : > { %11646 = vst [vmem:[#allocation64_spill] sm:$0xff] %v9187_v50  ;;  %v9200_v40 = vmax.f32 %v2326_v1, 0.0  ;;  %v2755_v60 = vadd.f32 %v2723_v28, %v2683_v4  ;;  %v3170_v19 = vmul.f32 %v8949_v49, %v9045_v63  ;;  %v2684_v29 = vmul.f32 %v8867_v38, %v9098_v0 }
 0x1f4   : > { %v9206_v2 = vmax.f32 %v2325_v55, 0.0  ;;  %v3130_v37 = vadd.f32 %v3098_v35, %v3059_v17  ;;  %v2724_v5 = vmul.f32 %v8919_v48, %v9158_v26  ;;  %v3020_v11 = vsel %vm7578_vm15, %v9130_v46, 0.0 }
 0x1f5   : > { %v11277_v41 = vrot.slane %v9200_v40, 7  ;;  %v11276_v56 = vrot.slane %v9200_v40, 1  ;;  %v2827_v42 = vadd.f32 %v2795_v18, %v2755_v60  ;;  %v3060_v63 = vmul.f32 %v8883_v36, %v9001_v27 }
 0x1f6   : > { %v2485_v6 = vrot.slane %v9206_v2, 7  ;;  %v2581_v53 = vrot.slane %v9206_v2, 1  ;;  %v3202_v4 = vadd.f32 %v3170_v19, %v3130_v37  ;;  %v3466_v7 = vmul.f32 %v8959_v52, %v9206_v2 }
 0x1f7   : > { %v2756_v14 = vadd.f32 %v2724_v5, %v2684_v29  ;;  %v3099_v46 = vmul.f32 %v8943_v3, %v9068_v58  ;;  %v3171_v1 = vmul.f32 %v8949_v49, %v3020_v11  ;;  %v3467_v28 = vmul.f32 %v8959_v52, %v9200_v40 }
 0x1f8   : > { %v11647_v18 = vrot.slane %v9098_v0, 1  ;;  %vm11648_vm1 = vcmp.lt.s32.totalorder %v6104_v10, 7  ;;  %v11649_v33 = vrot.slane %v9098_v0, 7  ;;  %vm11650_vm12 = vcmp.lt.s32.totalorder %v6104_v10, 1 }
 0x1f9   : > { %vm11651_vm3 = vmmov %vm11648_vm1  ;;  %v3234_v17 = vadd.f32 %v3202_v4, %v2827_v42  ;;  %v9256_v29 = vsel %vm11650_vm12, %v2485_v6, %v11277_v41 }
 0x1fa   : > { %v9230_v27 = vsel %vm11648_vm1, %v11647_v18, %v2581_v53  ;;  %v9236_v55 = vsel %vm11650_vm12, %v11649_v33, %v2485_v6  ;;  %v9242_v58 = vsel %vm11651_vm3, %v2581_v53, %v11276_v56  ;;  %v3131_v53 = vadd.f32 %v3099_v46, %v3060_v63  ;;  %v11652_v6 = vld [vmem:[#allocation35_spill] sm:$0xff]  ;;  %vm11654_vm1 = vmmov %vm11650_vm12 }
 0x1fb   : > { %v3425_v35 = vsel %vm11642_vm14, %v9230_v27, 0.0  ;;  %v3330_v60 = vsel %vm11645_vm10, %v9236_v55, 0.0  ;;  %v3578_v19 = vmul.f32 %v8966_v13, %v9242_v58  ;;  %v2644_v42 = vsel %vm7578_vm15, %v9230_v27, 0.0 }
 0x1fc   : > { %v5543_v37 = vpop.f32.mrb[28].mxu0  ;;  %v3577_v5 = vmul.f32 %v8966_v13, %v3425_v35  ;;  %v3506_v11 = vmul.f32 %v8983_v9, %v3330_v60  ;;  %v2796_v33 = vmul.f32 %v8925_v43, %v2644_v42  ;;  %v3507_v56 = vmul.f32 %v8983_v9, %v9256_v29 }
 0x1fd   : > { %v2289_v4 = vmul.f32 %v8823_v61, %v5543_v37  ;;  %v2234_v18 = vpop.f32.mrb[29].mxu0  ;;  %vm11653_vm3 = vnez %v11652_v6  ;;  %v3203_v16 = vadd.f32 %v3171_v1, %v3131_v53  ;;  %v2685_v37 = vmul.f32 %v8867_v38, %v9206_v2 }
 0x1fe   : > { %v2549_v41 = vsel %vm11653_vm3, %v9236_v55, 0.0  ;;  %v2288_v35 = vmul.f32 %v8823_v61, %v2234_v18  ;;  %v3609_v60 = vadd.f32 %v3577_v5, %v3537_v22  ;;  %v3538_v20 = vadd.f32 %v3506_v11, %v3466_v7 }
 0x1ff   : > { %v2328_v50 = vadd.f32 %v8837_v57, %v2289_v4  ;;  %v2828_v63 = vadd.f32 %v2796_v33, %v2756_v14  ;;  %v3539_v46 = vadd.f32 %v3507_v56, %v3467_v28  ;;  %v2725_v54 = vmul.f32 %v8919_v48, %v2549_v41 }
 0x200   : > { %v2327_v42 = vadd.f32 %v8837_v57, %v2288_v35  ;;  %v9275_v32 = vadd.f32 %v3609_v60, %v3233_v15  ;;  %v3610_v30 = vadd.f32 %v3578_v19, %v3538_v20  ;;  %v2797_v22 = vmul.f32 %v8925_v43, %v9242_v58 }
 0x201   : > { %v9278_v44 = vmax.f32 %v2328_v50, 0.0  ;;  %v3235_v18 = vadd.f32 %v3203_v16, %v2828_v63  ;;  %v2925_v56 = vsel %vm11653_vm3, %v9136_v12, 0.0  ;;  %v2757_v1 = vadd.f32 %v2725_v54, %v2685_v37 }
 0x202   : > { %v9285_v7 = vmax.f32 %v2327_v42, 0.0  ;;  %v9287_v14 = vadd.f32 %v3610_v30, %v3234_v17  ;;  %v3061_v20 = vmul.f32 %v8883_v36, %v9107_v59  ;;  %v3100_v50 = vmul.f32 %v8943_v3, %v2925_v56 }
 0x203   : > { %v9292_v15 = vrot.slane %v9278_v44, 7  ;;  %v9295_v16 = vrot.slane %v9278_v44, 1  ;;  %v3172_v41 = vmul.f32 %v8949_v49, %v9142_v8  ;;  %v2829_v28 = vadd.f32 %v2797_v22, %v2757_v1 }
 0x204   : > { %v2487_v12 = vrot.slane %v9285_v7, 7  ;;  %v2583_v30 = vrot.slane %v9285_v7, 1  ;;  %v3468_v54 = vmul.f32 %v8959_v52, %v9285_v7  ;;  %v3132_v17 = vadd.f32 %v3100_v50, %v3061_v20 }
 0x205   : > { %v2898_v59 = vsel %vm11654_vm1, %v9292_v15, %v8006_v31  ;;  %v2686_v19 = vmul.f32 %v8867_v38, %v9200_v40  ;;  %v2726_v8 = vmul.f32 %v8919_v48, %v9256_v29  ;;  %v11655_v11 = vrot.slane %v9200_v40, 1 }
 0x206   : > { %v2899_v5 = vsel %vm6128_vm2, %v2898_v59, 0.0  ;;  %vm11656_vm12 = vcmp.lt.s32.totalorder %v6104_v10, 7  ;;  %v11657_v4 = vrot.slane %v9200_v40, 7  ;;  %v3204_v37 = vadd.f32 %v3172_v41, %v3132_v17 }
 0x207   : > { %v9318_v53 = vsel %vm11656_vm12, %v11655_v11, %v2583_v30  ;;  %vm11658_vm14 = vmmov %vm11656_vm12  ;;  %v3074_v60 = vmul.f32 %v8943_v3, %v2899_v5  ;;  %vm11660_vm12 = vnez %v11478_v51  ;;  %v2758_v59 = vadd.f32 %v2726_v8, %v2686_v19 }
 0x208   : > { %v9324_v33 = vsel %vm11654_vm1, %v11657_v4, %v2487_v12  ;;  %v9329_v35 = vsel %vm11658_vm14, %v2583_v30, %v9295_v16  ;;  %v3427_v63 = vsel %vm7578_vm15, %v9318_v53, 0.0  ;;  %vm11659_vm14 = vmmov %vm11654_vm1  ;;  %v3236_v30 = vadd.f32 %v3204_v37, %v2829_v28 }
 0x209   : > { %v3332_v42 = vsel %vm11653_vm3, %v9324_v33, 0.0  ;;  %v3579_v22 = vmul.f32 %v8966_v13, %v3427_v63  ;;  %v3580_v1 = vmul.f32 %v8966_v13, %v9329_v35  ;;  %v9345_v20 = vsel %vm11659_vm14, %v2487_v12, %v9292_v15  ;;  %vm11663_vm3 = vmmov %vm11659_vm14 }
 0x20a   : > { %v3508_v56 = vmul.f32 %v8983_v9, %v3332_v42  ;;  %v3106_v50 = vadd.f32 %v3074_v60, %v8027_v24  ;;  %v2646_v41 = vsel %vm11660_vm12, %v9318_v53, 0.0  ;;  %v3022_v63 = vsel %vm11660_vm12, %v9230_v27, 0.0 }
 0x20b   : > { %v3611_v5 = vadd.f32 %v3579_v22, %v3539_v46  ;;  %v2798_v4 = vmul.f32 %v8925_v43, %v2646_v41  ;;  %v3062_v28 = vmul.f32 %v8883_v36, %v9098_v0  ;;  %v3101_v19 = vmul.f32 %v8943_v3, %v9158_v26 }
 0x20c   : > { %v5546_v17 = vpop.f32.mrb[30].mxu0  ;;  %v3540_v11 = vadd.f32 %v3508_v56, %v3468_v54  ;;  %v9357_v24 = vadd.f32 %v8516_v25, %v3106_v50  ;;  %v3173_v22 = vmul.f32 %v8949_v49, %v3022_v63  ;;  %v3469_v25 = vmul.f32 %v8959_v52, %v9278_v44 }
 0x20d   : > { %v2291_v12 = vmul.f32 %v8823_v61, %v5546_v17  ;;  %v2244_v42 = vpop.f32.mrb[31].mxu0  ;;  %v9364_v54 = vadd.f32 %v3611_v5, %v3235_v18  ;;  %v2830_v60 = vadd.f32 %v2798_v4, %v2758_v59  ;;  %v3133_v37 = vadd.f32 %v3101_v19, %v3062_v28 }
 0x20e   : > { %v2290_v46 = vmul.f32 %v8823_v61, %v2244_v42  ;;  %v3612_v8 = vadd.f32 %v3580_v1, %v3540_v11  ;;  %v3509_v26 = vmul.f32 %v8983_v9, %v9345_v20  ;;  %vm11661_vm1 = vnez %v11481_v23 }
 0x20f   : > { %v2330_v27 = vadd.f32 %v8837_v57, %v2291_v12  ;;  %v2551_v61 = vsel %vm11661_vm1, %v9324_v33, 0.0  ;;  %v3205_v1 = vadd.f32 %v3173_v22, %v3133_v37  ;;  %v2687_v50 = vmul.f32 %v8867_v38, %v9285_v7 }
 0x210   : > { %v2329_v56 = vadd.f32 %v8837_v57, %v2290_v46  ;;  %v9371_v0 = vadd.f32 %v3612_v8, %v3236_v30  ;;  %v2727_v41 = vmul.f32 %v8919_v48, %v2551_v61  ;;  %v3541_v17 = vadd.f32 %v3509_v26, %v3469_v25 }
 0x211   : > { %v2362_v18 = vmax.f32 %v2330_v27, 0.0  ;;  %v2799_v57 = vmul.f32 %v8925_v43, %v9329_v35  ;;  %v2927_v30 = vsel %vm11661_vm1, %v9236_v55, 0.0  ;;  %v3237_v63 = vadd.f32 %v3205_v1, %v2830_v60 }
 0x212   : > { %v2361_v59 = vmax.f32 %v2329_v56, 0.0  ;;  %v2759_v19 = vadd.f32 %v2727_v41, %v2687_v50  ;;  %v3063_v55 = vmul.f32 %v8883_v36, %v9206_v2  ;;  %v3102_v8 = vmul.f32 %v8943_v3, %v2927_v30 }
 0x213   : > { %v9386_v5 = vrot.slane %v2362_v18, 7  ;;  %v9388_v11 = vrot.slane %v2362_v18, 1  ;;  %v9391_v4 = vmul.f32 %v8867_v38, %v2362_v18  ;;  %v3174_v27 = vmul.f32 %v8949_v49, %v9242_v58 }
 0x214   : > { %v2489_v12 = vrot.slane %v2361_v59, 7  ;;  %v2585_v42 = vrot.slane %v2361_v59, 1  ;;  %v2689_v28 = vmul.f32 %v8867_v38, %v2361_v59  ;;  %vm11662_vm15 = vcmp.lt.s32.totalorder %v6104_v10, 7 }
 0x215   : > { %v2522_v46 = vsel %vm11659_vm14, %v9386_v5, %v7979_v62  ;;  %vm11664_vm14 = vmmov %vm11662_vm15  ;;  %v2831_v25 = vadd.f32 %v2799_v57, %v2759_v19  ;;  %v3134_v56 = vadd.f32 %v3102_v8, %v3063_v55  ;;  %v3470_v1 = vmul.f32 %v8959_v52, %v2361_v59 }
 0x216   : > { %v2523_v60 = vsel %vm6128_vm2, %v2522_v46, 0.0  ;;  %v2588_v37 = vsel %vm11662_vm15, %v9295_v16, %v2585_v42  ;;  %v2492_v22 = vsel %vm11663_vm3, %v9292_v15, %v2489_v12  ;;  %v2587_v62 = vsel %vm11664_vm14, %v2585_v42, %v9388_v11  ;;  %vm11665_vm15 = vmmov %vm11663_vm3 }
 0x217   : > { %v2699_v2 = vmul.f32 %v8919_v48, %v2523_v60  ;;  %v3429_v58 = vsel %vm11660_vm12, %v2588_v37, 0.0  ;;  %v3334_v61 = vsel %vm11661_vm1, %v2492_v22, 0.0  ;;  %v3582_v15 = vmul.f32 %v8966_v13, %v2587_v62 }
 0x218   : > { %v3581_v26 = vmul.f32 %v8966_v13, %v3429_v58  ;;  %v3206_v41 = vadd.f32 %v3174_v27, %v3134_v56  ;;  %v3510_v30 = vmul.f32 %v8983_v9, %v3334_v61  ;;  %v2491_v42 = vsel %vm11665_vm15, %v2489_v12, %v9386_v5  ;;  %v11667_v56 = vld [vmem:[#allocation40_spill] sm:$0xff]  ;;  %v11668_v61 = vld [vmem:[#allocation42_spill] sm:$0xff] }
 0x219   : > { %v2731_v50 = vadd.f32 %v2699_v2, %v8003_v39  ;;  %vm11666_vm3 = vnez %v11483_v47  ;;  %v2688_v46 = vmul.f32 %v8867_v38, %v9278_v44  ;;  %v2728_v59 = vmul.f32 %v8919_v48, %v9345_v20 }
 0x21a   : > { %v3613_v57 = vadd.f32 %v3581_v26, %v3541_v17  ;;  %v2648_v19 = vsel %vm11666_vm3, %v2588_v37, 0.0  ;;  %v3238_v39 = vadd.f32 %v3206_v41, %v2831_v25  ;;  %v3542_v8 = vadd.f32 %v3510_v30, %v3470_v1  ;;  %v11669_v41 = vld [vmem:[#allocation37_spill] sm:$0xff] }
 0x21b   : > { %v2803_v55 = vadd.f32 %v8040_v45, %v2731_v50  ;;  %v2800_v27 = vmul.f32 %v8925_v43, %v2648_v19  ;;  %v2760_v2 = vadd.f32 %v2728_v59, %v2688_v46  ;;  %v3024_v17 = vsel %vm11666_vm3, %v9318_v53, 0.0 }
 0x21c   : > { %v9435_v60 = vadd.f32 %v3613_v57, %v3237_v63  ;;  %v3064_v12 = vmul.f32 %v8883_v36, %v9200_v40  ;;  %v3614_v37 = vadd.f32 %v3582_v15, %v3542_v8  ;;  %v3103_v45 = vmul.f32 %v8943_v3, %v9256_v29 }
 0x21d   : > { %v3210_v38 = vadd.f32 %v9357_v24, %v2803_v55  ;;  %v3175_v58 = vmul.f32 %v8949_v49, %v3024_v17  ;;  %v2832_v25 = vadd.f32 %v2800_v27, %v2760_v2  ;;  %v3371_v63 = vsel %vm11664_vm14, %v9388_v11, %v11667_v56  ;;  %v11671_v55 = vld [vmem:[#allocation43_spill] sm:$0xff]  ;;  %v11673_v27 = vld [vmem:[#allocation44_spill] sm:$0xff] }
 0x21e   : > { %v3471_v26 = vmul.f32 %v8959_v52, %v2362_v18  ;;  %v3511_v53 = vmul.f32 %v8983_v9, %v2491_v42  ;;  %v9453_v1 = vadd.f32 %v3614_v37, %v3238_v39  ;;  %v3135_v24 = vadd.f32 %v3103_v45, %v3064_v12  ;;  %v11674_v37 = vld [vmem:[#allocation39_spill] sm:$0xff] }
 0x21f   : > { %v3618_v40 = vadd.f32 %v11668_v61, %v3210_v38  ;;  %v3431_v29 = vsel %vm11666_vm3, %v3371_v63, 0.0  ;;  %vm11670_vm15 = vnez %v11669_v41  ;;  %v2801_v57 = vmul.f32 %v8925_v43, %v2587_v62 }
 0x220   : > { %v3543_v15 = vadd.f32 %v3511_v53, %v3471_v26  ;;  %v3583_v50 = vmul.f32 %v8966_v13, %v3431_v29  ;;  %v2553_v30 = vsel %vm11670_vm15, %v2492_v22, 0.0  ;;  %v3207_v18 = vadd.f32 %v3175_v58, %v3135_v24  ;;  %v11678_v26 = vld [vmem:[#allocation45_spill] sm:$0xff]  ;;  %v11680_v24 = vld [vmem:[#allocation46_spill] sm:$0xff] }
 0x221   : > { %5579 = vmatprep.mubr.f32.mxu1 %v3618_v40  ;;  %v2729_v19 = vmul.f32 %v8919_v48, %v2553_v30  ;;  %v2929_v46 = vsel %vm11670_vm15, %v9324_v33, 0.0  ;;  %v3065_v59 = vmul.f32 %v8883_v36, %v9285_v7  ;;  %v3176_v22 = vmul.f32 %v8949_v49, %v9329_v35  ;;  %v11681_v30 = vld [vmem:[#allocation41_spill] sm:$0xff] }
 0x222   : > { %5580 = vmatmul.mubr.f32.vlgmr.msra.gmra.mrb[0].mxu1 %v11671_v55  ;;  %v3615_v39 = vadd.f32 %v3583_v50, %v3543_v15  ;;  %v3104_v8 = vmul.f32 %v8943_v3, %v2929_v46  ;;  %vm11672_vm14 = vcmp.lt.s32.totalorder %v6104_v10, 1  ;;  %v3239_v2 = vadd.f32 %v3207_v18, %v2832_v25  ;;  %v11676_v25 = vld [vmem:[#allocation38_spill] sm:$0xff] }
 0x223   : > { %v3275_v62 = vsel %vm11672_vm14, %v9386_v5, %v8006_v31  ;;  %5582 = vmatprep.mubr.f32.mxu1 %v11673_v27  ;;  %v2761_v33 = vadd.f32 %v2729_v19, %v2689_v28  ;;  %v3472_v17 = vmul.f32 0.0, %v8959_v52  ;;  %v3584_v35 = vmul.f32 %v8966_v13, %v11667_v56  ;;  %v11684_v19 = vld [vmem:[#allocation48_spill] sm:$0xff] }
 0x224   : > { %v3336_v7 = vsel %vm11670_vm15, %v3275_v62, 0.0  ;;  %v3136_v12 = vadd.f32 %v3104_v8, %v3065_v59  ;;  %vm11675_vm12 = vcmp.lt.s32.totalorder %v6104_v10, 7  ;;  %v3647_v45 = vadd.f32 %v3615_v39, %v3239_v2  ;;  %v11686_v39 = vld [vmem:[#allocation50_spill] sm:$0xff]  ;;  %v11688_v62 = vld [vmem:[#allocation52_spill] sm:$0xff]  ;;  %v11693_v2 = vld [vmem:[#allocation57_spill] sm:$0xff] }
 0x225   : > { %v3512_v38 = vmul.f32 %v8983_v9, %v3336_v7  ;;  %v2618_v5 = vsel %vm11675_vm12, %v9388_v11, %v11674_v37  ;;  %v2833_v58 = vadd.f32 %v2801_v57, %v2761_v33  ;;  %vm11677_vm14 = vnez %v11676_v25  ;;  %vm11679_vm3 = vmmov %vm11675_vm12  ;;  %v11692_v27 = vld [vmem:[#allocation56_spill] sm:$0xff]  ;;  %v11694_v33 = vld [vmem:[#allocation58_spill] sm:$0xff] }
 0x226   : > { %v2650_v28 = vsel %vm11677_vm14, %v2618_v5, 0.0  ;;  %v2730_v63 = vmul.f32 %v8919_v48, %v2491_v42  ;;  %5583 = vmatmul.mubr.f32.gmra.mrb[2].mxu1 %v11678_v26  ;;  %v3208_v52 = vadd.f32 %v3176_v22, %v3136_v12  ;;  %v2994_v40 = vsel %vm11679_vm3, %v9295_v16, %v11667_v56  ;;  %vm11682_vm12 = vmmov %vm11679_vm3  ;;  %v11687_v22 = vld [vmem:[#allocation51_spill] sm:$0xff]  ;;  %v11697_v12 = vld [vmem:[#allocation61_spill] sm:$0xff] }
 0x227   : > { %v3544_v53 = vadd.f32 %v3512_v38, %v3472_v17  ;;  %v2802_v61 = vmul.f32 %v8925_v43, %v2650_v28  ;;  %5585 = vmatprep.mubr.f32.mxu1 %v11680_v24  ;;  %v3026_v29 = vsel %vm11677_vm14, %v2994_v40, 0.0  ;;  %v3066_v48 = vmul.f32 %v8883_v36, %v9278_v44  ;;  %v11683_v36 = vld [vmem:[#allocation47_spill] sm:$0xff]  ;;  %v11698_v38 = vld [vmem:[#allocation62_spill] sm:$0xff]  ;;  %v11700_v37 = vld [vmem:[#allocation64_spill] sm:$0xff] }
 0x228   : > { %v2762_v11 = vadd.f32 %v2730_v63, %v9391_v4  ;;  %v3105_v42 = vmul.f32 %v8943_v3, %v9345_v20  ;;  %v3240_v15 = vadd.f32 %v3208_v52, %v2833_v58  ;;  %v3177_v50 = vmul.f32 %v8949_v49, %v3026_v29  ;;  %v11695_v7 = vld [vmem:[#allocation59_spill] sm:$0xff]  ;;  %v5857_v5 = vld [vmem:[%s6117_s22] sm:$0xff] }
 0x229   : > { %v3616_v43 = vadd.f32 %v3584_v35, %v3544_v53  ;;  %v3401_v16 = vsel %vm11682_vm12, %v11667_v56, %v11681_v30  ;;  %v3513_v44 = vmul.f32 %v8983_v9, %v8006_v31  ;;  %v11685_v56 = vld [vmem:[#allocation49_spill] sm:$0xff]  ;;  %v11690_v9 = vld [vmem:[#allocation54_spill] sm:$0xff]  ;;  %v11699_v35 = vld [vmem:[#allocation63_spill] sm:$0xff]  ;;  %vm11710_vm3 = vcmp.lt.s32.totalorder %v6104_v10, 1 }
 0x22a   : > { %v2834_v57 = vadd.f32 %v2802_v61, %v2762_v11  ;;  %v3137_v4 = vadd.f32 %v3105_v42, %v3066_v48  ;;  %v3433_v18 = vsel %vm11677_vm14, %v3401_v16, 0.0  ;;  %5586 = vmatmul.mubr.f32.gmra.mrb[4].mxu1 %v11683_v36  ;;  %v11689_v31 = vld [vmem:[#allocation53_spill] sm:$0xff]  ;;  %v5858_v58 = vld [vmem:[%s6117_s22 + $0x8] sm:$0xff]  ;;  %v5954_v61 = vmov -3e+38   ;;  %v9580_v16 = vld [vmem:[%s6117_s22 + $0x20] sm:$0xff] }
 0x22b   : > { %v3648_v3 = vadd.f32 %v3616_v43, %v3240_v15  ;;  %v3585_v20 = vmul.f32 %v8966_v13, %v3433_v18  ;;  %5588 = vmatprep.mubr.f32.mxu1 %v11684_v19  ;;  %v3545_v46 = vadd.f32 %v3513_v44, %v3472_v17  ;;  %v11691_v13 = vld [vmem:[#allocation55_spill] sm:$0xff]  ;;  %v11696_v17 = vld [vmem:[#allocation60_spill] sm:$0xff]  ;;  %v5703_v28 = vpack.c.bf16 %v5858_v58, %v5857_v5  ;;  %v9591_v44 = vld [vmem:[%s6117_s22 + $0x38] sm:$0xff] }
 0x22c   : > { %v3209_v49 = vadd.f32 %v3177_v50, %v3137_v4  ;;  %v9559_v40 = vrot.slane %v5954_v61, 7  ;;  %v9568_v42 = vrot.slane %v5954_v61, 1  ;;  %v9572_v43 = vld [vmem:[%s6117_s22 + $0x10] sm:$0xff]  ;;  %v9575_v50 = vld [vmem:[%s6117_s22 + $0x18] sm:$0xff]  ;;  %11704 = vst [vmem:[#allocation44_spill] sm:$0xff] %v9580_v16  ;;  %11707 = vst [vmem:[#allocation46_spill] sm:$0xff] %v9591_v44 }
 0x22d   : > { %v3617_v55 = vadd.f32 %v3585_v20, %v3545_v46  ;;  %5704 = vmatprep.subr.bf16.mxu0 %v5703_v28  ;;  %11702 = vst [vmem:[#allocation42_spill] sm:$0xff] %v9572_v43  ;;  %11703 = vst [vmem:[#allocation43_spill] sm:$0xff] %v9575_v50  ;;  %v9588_v18 = vld [vmem:[%s6117_s22 + $0x30] sm:$0xff]  ;;  %v9599_v20 = vld [vmem:[%s6117_s22 + $0x48] sm:$0xff] }
 0x22e   : > { %v3241_v59 = vadd.f32 %v3209_v49, %v2834_v57  ;;  %5589 = vmatmul.mubr.f32.gmra.mrb[6].mxu1 %v11685_v56  ;;  %11701 = vst [vmem:[#allocation40_spill] sm:$0xff] %v9559_v40  ;;  %v9583_v57 = vld [vmem:[%s6117_s22 + $0x28] sm:$0xff]  ;;  %11706 = vst [vmem:[#allocation45_spill] sm:$0xff] %v9588_v18  ;;  %v9621_v56 = vld [vmem:[%s6117_s22 + $0x58] sm:$0xff] }
 0x22f   : > { %5591 = vmatprep.mubr.f32.mxu1 %v11686_v39  ;;  %11705 = vst [vmem:[#allocation39_spill] sm:$0xff] %v9583_v57  ;;  %11709 = vst [vmem:[#allocation47_spill] sm:$0xff] %v9599_v20  ;;  %v9667_v5 = vld [vmem:[%s6117_s22 + $0x88] sm:$0xff]  ;;  %v9672_v28 = vld [vmem:[%s6117_s22 + $0x90] sm:$0xff] }
 0x230   : > { %v3649_v8 = vadd.f32 %v3617_v55, %v3241_v59  ;;  %v9618_v55 = vld [vmem:[%s6117_s22 + $0x50] sm:$0xff]  ;;  %11712 = vst [vmem:[#allocation49_spill] sm:$0xff] %v9621_v56  ;;  %11719 = vst [vmem:[#allocation56_spill] sm:$0xff] %v9667_v5  ;;  %v9731_v30 = vld [vmem:[%s6117_s22 + $0xc0] sm:$0xff] }
 0x231   : > { %11711 = vst [vmem:[#allocation48_spill] sm:$0xff] %v9618_v55  ;;  %11720 = vst [vmem:[#allocation57_spill] sm:$0xff] %v9672_v28  ;;  %v9688_v61 = vld [vmem:[%s6117_s22 + $0xb0] sm:$0xff]  ;;  %v4898_v50 = vld [vmem:[%s11116_s1 + $0x8] sm:$0xff] }
 0x232   : > { %5592 = vmatmul.mubr.f32.gmra.mrb[8].mxu1 %v11687_v22  ;;  %v9629_v22 = vld [vmem:[%s6117_s22 + $0x68] sm:$0xff]  ;;  %11724 = vst [vmem:[#allocation61_spill] sm:$0xff] %v9688_v61  ;;  %11729 = vst [vmem:[#allocation64_spill] sm:$0xff] %v9731_v30  ;;  %4977 = vmatprep.mubr.f32.mxu0 %v4898_v50 }
 0x233   : > { %5594 = vmatprep.mubr.f32.mxu1 %v11688_v62  ;;  %11714 = vst [vmem:[#allocation51_spill] sm:$0xff] %v9629_v22 }
 0x236   : > { %5595 = vmatmul.mubr.f32.gmra.mrb[10].mxu1 %v11689_v31 }
 0x237   : > { %5597 = vmatprep.mubr.f32.mxu1 %v11690_v9 }
 0x23a   : > { %5598 = vmatmul.mubr.f32.gmra.mrb[12].mxu1 %v11691_v13 }
 0x23b   : > { %5600 = vmatprep.mubr.f32.mxu1 %v11692_v27 }
 0x23e   : > { %5601 = vmatmul.mubr.f32.gmra.mrb[14].mxu1 %v11693_v2  ;;  %v9645_v2 = vld [vmem:[%s6117_s22 + $0x70] sm:$0xff] }
 0x23f   : > { %5603 = vmatprep.mubr.f32.mxu1 %v11694_v33  ;;  %11715 = vst [vmem:[#allocation52_spill] sm:$0xff] %v9645_v2  ;;  %v9648_v33 = vld [vmem:[%s6117_s22 + $0x78] sm:$0xff] }
 0x240   : > { %11716 = vst [vmem:[#allocation53_spill] sm:$0xff] %v9648_v33 }
 0x242   : > { %5604 = vmatmul.mubr.f32.gmra.mrb[16].mxu1 %v11695_v7 }
 0x243   : > { %5606 = vmatprep.mubr.f32.mxu1 %v11696_v17 }
 0x246   : > { %5607 = vmatmul.mubr.f32.gmra.mrb[18].mxu1 %v11697_v12 }
 0x247   : > { %5609 = vmatprep.mubr.f32.mxu1 %v11698_v38 }
 0x24a   : > { %5610 = vmatmul.mubr.f32.gmra.mrb[20].mxu1 %v11699_v35 }
 0x24b   : > { %5612 = vmatprep.mubr.f32.mxu1 %v11700_v37  ;;  %v9664_v37 = vld [vmem:[%s6117_s22 + $0x80] sm:$0xff] }
 0x24c   : > { %11718 = vst [vmem:[#allocation55_spill] sm:$0xff] %v9664_v37 }
 0x24e   : > { %5613 = vmatmul.mubr.f32.gmra.mrb[22].mxu1 %v9275_v32  ;;  %v9542_v32 = vld [vmem:[%s11123_s8] ss:$0 sm:$0xff] }
 0x24f   : > { %5615 = vmatprep.mubr.f32.mxu1 %v9287_v14 }
 0x252   : > { %5616 = vmatmul.mubr.f32.gmra.mrb[24].mxu1 %v9364_v54  ;;  %v9547_v54 = vld [vmem:[%s11124_s9] ss:$0 sm:$0xff] }
 0x253   : > { %5618 = vmatprep.mubr.f32.mxu1 %v9371_v0 }
 0x256   : > { %5619 = vmatmul.mubr.f32.gmra.mrb[26].mxu1 %v9435_v60 }
 0x257   : > { %5621 = vmatprep.mubr.f32.mxu1 %v9453_v1 }
 0x25a   : > { %5622 = vmatmul.mubr.f32.gmra.mrb[28].mxu1 %v3647_v45 }
 0x25b   : > { %5624 = vmatprep.mubr.f32.mxu1 %v3648_v3  ;;  %v9596_v3 = vld [vmem:[%s6117_s22 + $0x40] sm:$0xff] }
 0x25c   : > { %11708 = vst [vmem:[#allocation41_spill] sm:$0xff] %v9596_v3 }
 0x25e   : > { %5625 = vmatmul.mubr.f32.gmra.mrb[30].mxu1 %v3649_v8  ;;  %v9626_v8 = vld [vmem:[%s6117_s22 + $0x60] sm:$0xff] }
 0x25f   : > { %11713 = vst [vmem:[#allocation50_spill] sm:$0xff] %v9626_v8 }
 0x2f5   : > { %v5581_v14 = vpop.f32.mrb[0].mxu1 }
 0x2f6   : > { %v3899_v0 = vmul.f32 %v5581_v14, %v9542_v32  ;;  %v3732_v60 = vpop.f32.mrb[1].mxu1  ;;  %v9675_v14 = vld [vmem:[%s6117_s22 + $0x98] sm:$0xff] }
 0x2f7   : > { %v3898_v1 = vmul.f32 %v9542_v32, %v3732_v60  ;;  %11721 = vst [vmem:[#allocation58_spill] sm:$0xff] %v9675_v14  ;;  %v9680_v60 = vld [vmem:[%s6117_s22 + $0xa0] sm:$0xff] }
 0x2f8   : > { %v9552_v45 = vadd.f32 %v9547_v54, %v3899_v0  ;;  %11722 = vst [vmem:[#allocation59_spill] sm:$0xff] %v9680_v60 }
 0x2f9   : > { %v9555_v63 = vadd.f32 %v9547_v54, %v3898_v1  ;;  %v5584_v26 = vpop.f32.mrb[2].mxu1  ;;  %v9683_v1 = vld [vmem:[%s6117_s22 + $0xa8] sm:$0xff] }
 0x2fa   : > { %v4066_v52 = vrot.slane %v9552_v45, 7  ;;  %v4194_v53 = vrot.slane %v9552_v45, 1  ;;  %v3901_v24 = vmul.f32 %v5584_v26, %v9542_v32  ;;  %v3742_v11 = vpop.f32.mrb[3].mxu1  ;;  %11723 = vst [vmem:[#allocation60_spill] sm:$0xff] %v9683_v1 }
 0x2fb   : > { %v9563_v29 = vrot.slane %v9555_v63, 7  ;;  %v9566_v48 = vrot.slane %v9555_v63, 1  ;;  %v3900_v15 = vmul.f32 %v9542_v32, %v3742_v11 }
 0x2fc   : > { %v9642_v13 = vadd.f32 %v9547_v54, %v3901_v24  ;;  %v9691_v24 = vld [vmem:[%s6117_s22 + $0xb8] sm:$0xff] }
 0x2fd   : > { %v9608_v49 = vsel %vm11710_vm3, %v9563_v29, %v4066_v52  ;;  %v9615_v46 = vsel %vm11682_vm12, %v9566_v48, %v4194_v53  ;;  %v5587_v59 = vpop.f32.mrb[4].mxu1  ;;  %v9639_v9 = vsel %vm11710_vm3, %v9559_v40, %v9563_v29  ;;  %v9656_v17 = vsel %vm11682_vm12, %v9568_v42, %v9566_v48  ;;  %11725 = vst [vmem:[#allocation62_spill] sm:$0xff] %v9691_v24 }
 0x2fe   : > { %v3752_v27 = vpop.f32.mrb[5].mxu1  ;;  %v9659_v12 = vadd.f32 %v9547_v54, %v3900_v15  ;;  %v3903_v38 = vmul.f32 %v5587_v59, %v9542_v32  ;;  %v4068_v39 = vrot.slane %v9642_v13, 7  ;;  %v11741_v55 = vmax.f32 %v9552_v45, %v9608_v49 }
 0x2ff   : > { %v3902_v35 = vmul.f32 %v9542_v32, %v3752_v27 }
 0x300   : > { %11717 = vst [vmem:[#allocation54_spill] sm:$0xff] %v9659_v12  ;;  %v9696_v15 = vrot.slane %v9659_v12, 7  ;;  %v9699_v59 = vrot.slane %v9659_v12, 1  ;;  %v9702_v27 = vadd.f32 %v9547_v54, %v3903_v38  ;;  %v4196_v38 = vrot.slane %v9642_v13, 1 }
 0x301   : > { %v9705_v26 = vadd.f32 %v9547_v54, %v3902_v35  ;;  %v5590_v0 = vpop.f32.mrb[6].mxu1 }
 0x302   : > { %11726 = vst [vmem:[#allocation63_spill] sm:$0xff] %v9699_v59  ;;  %v3905_v19 = vmul.f32 %v5590_v0, %v9542_v32  ;;  %v3762_v36 = vpop.f32.mrb[7].mxu1  ;;  %v9721_v35 = vsel %vm11710_vm3, %v4066_v52, %v9696_v15  ;;  %v9728_v4 = vsel %vm11682_vm12, %v4194_v53, %v9699_v59  ;;  %v9734_v0 = vld [vmem:[%s6117_s22 + $0xc8] sm:$0xff]  ;;  %vm11732_vm12 = vmmov %vm11710_vm3 }
 0x303   : > { %11730 = vst [vmem:[#allocation12_spill] sm:$0xff] %v9734_v0  ;;  %v4131_v7 = vsel %vm6368_vm6, %v9721_v35, -3e+38  ;;  %v11299_v24 = vrot.slane %v9705_v26, 7  ;;  %v3904_v60 = vmul.f32 %v9542_v32, %v3762_v36  ;;  %v4258_v30 = vsel %vm6235_vm5, %v9728_v4, -3e+38 }
 0x304   : > { %v9744_v61 = vadd.f32 %v9547_v54, %v3905_v19  ;;  %v4163_v53 = vmax.f32 %v9659_v12, %v4131_v7  ;;  %v9760_v7 = vsel %vm11710_vm3, %v9696_v15, %v4068_v39  ;;  %vm11734_vm3 = vcmp.lt.s32.totalorder %v6104_v10, 7 }
 0x305   : > { %v5593_v11 = vpop.f32.mrb[8].mxu1  ;;  %v9766_v36 = vsel %vm11732_vm12, %v4068_v39, %v11299_v24  ;;  %v9769_v51 = vadd.f32 %v9547_v54, %v3904_v60  ;;  %v11733_v39 = vrot.slane %v9705_v26, 1  ;;  %vm11735_vm12 = vmmov %vm11734_vm3  ;;  %v4290_v56 = vmax.f32 %v11741_v55, %v4258_v30 }
 0x306   : > { %v3907_v19 = vmul.f32 %v5593_v11, %v9542_v32  ;;  %v3772_v0 = vpop.f32.mrb[9].mxu1  ;;  %v4164_v11 = vmax.f32 %v9642_v13, %v9760_v7  ;;  %v4133_v31 = vsel %vm6158_vm4, %v9766_v36, -3e+38 }
 0x307   : > { %v3906_v1 = vmul.f32 %v9542_v32, %v3772_v0  ;;  %v9785_v60 = vsel %vm11734_vm3, %v4196_v38, %v11733_v39  ;;  %v9788_v0 = vmax.f32 %v9705_v26, %v4133_v31  ;;  %v11310_v14 = vrot.slane %v9769_v51, 7 }
 0x308   : > { %v9779_v28 = vadd.f32 %v9547_v54, %v3907_v19  ;;  %v9800_v39 = vsel %vm11735_vm12, %v9699_v59, %v4196_v38  ;;  %v4260_v24 = vsel %vm6425_vm7, %v9785_v60, -3e+38  ;;  %vm11738_vm3 = vcmp.lt.s32.totalorder %v6104_v10, 1 }
 0x309   : > { %v9793_v37 = vadd.f32 %v9547_v54, %v3906_v1  ;;  %v5596_v34 = vpop.f32.mrb[10].mxu1  ;;  %v11737_v1 = vrot.slane %v9702_v27, 7  ;;  %vm11743_vm12 = vmmov %vm11738_vm3  ;;  %v9840_v20 = vmax.f32 %v4164_v11, %v4260_v24  ;;  %v4418_v16 = vmax.f32 %v4290_v56, %v9559_v40 }
 0x30a   : > { %v3909_v5 = vmul.f32 %v5596_v34, %v9542_v32  ;;  %v3782_v2 = vpop.f32.mrb[11].mxu1  ;;  %v11759_v11 = vrot.slane %v9702_v27, 7 }
 0x30b   : > { %v9811_v33 = vsel %vm11738_vm3, %v11737_v1, %v11310_v14  ;;  %v11315_v19 = vrot.slane %v9793_v37, 7  ;;  %v3908_v8 = vmul.f32 %v9542_v32, %v3782_v2  ;;  %v4291_v1 = vmax.f32 %v4163_v53, %v9800_v39 }
 0x30c   : > { %v4135_v59 = vsel %vm6560_vm9, %v9811_v33, -3e+38  ;;  %v9820_v22 = vadd.f32 %v9547_v54, %v3909_v5  ;;  %v11742_v2 = vrot.slane %v9744_v61, 7  ;;  %v11853_v23 = vrot.slane %v9793_v37, 7 }
 0x30d   : > { %v9827_v14 = vmax.f32 %v9769_v51, %v4135_v59  ;;  %v9838_v5 = vadd.f32 %v9547_v54, %v3908_v8  ;;  %v5599_v3 = vpop.f32.mrb[12].mxu1 }
 0x30e   : > { %11740 = vst [vmem:[#allocation11_spill] sm:$0xff] %v9820_v22  ;;  %v9835_v34 = vsel %vm11743_vm12, %v11742_v2, %v11315_v19  ;;  %v3911_v18 = vmul.f32 %v5599_v3, %v9542_v32  ;;  %v3792_v44 = vpop.f32.mrb[13].mxu1  ;;  %v11748_v3 = vsel %vm6368_vm6, %v9639_v9, -3e+38  ;;  %vm11754_vm12 = vmmov %vm11738_vm3  ;;  %v11760_v9 = vrot.slane %v9705_v26, 7 }
 0x30f   : > { %11744 = vst [vmem:[#allocation10_spill] sm:$0xff] %v9835_v34  ;;  %v4137_v59 = vsel %vm6670_vm11, %v9835_v34, -3e+38  ;;  %v11319_v19 = vrot.slane %v9838_v5, 7  ;;  %v3910_v24 = vmul.f32 %v9542_v32, %v3792_v44  ;;  %v9863_v53 = vmax.f32 %v4291_v1, %v11748_v3 }
 0x310   : > { %v9849_v2 = vmax.f32 %v9793_v37, %v4137_v59  ;;  %v9856_v30 = vadd.f32 %v9547_v54, %v3911_v18  ;;  %v11749_v59 = vrot.slane %v9779_v28, 7 }
 0x311   : > { %v9875_v18 = vadd.f32 %v9547_v54, %v3910_v24  ;;  %v5602_v56 = vpop.f32.mrb[14].mxu1  ;;  %v4770_v24 = vsel %vm6235_vm5, %v9785_v60, -3e+38 }
 0x312   : > { %11746 = vst [vmem:[#allocation13_spill] sm:$0xff] %v9849_v2  ;;  %11747 = vst [vmem:[#allocation15_spill] sm:$0xff] %v9856_v30  ;;  %v9871_v44 = vsel %vm11738_vm3, %v11749_v59, %v11319_v19  ;;  %v3913_v57 = vmul.f32 %v5602_v56, %v9542_v32  ;;  %v3802_v43 = vpop.f32.mrb[15].mxu1  ;;  %v9888_v59 = vsel %vm11754_vm12, %v9559_v40, %v9696_v15  ;;  %v11762_v15 = vrot.slane %v9820_v22, 7 }
 0x313   : > { %11750 = vst [vmem:[#allocation65_spill] sm:$0xff] %v9871_v44  ;;  %11751 = vst [vmem:[#allocation66_spill] sm:$0xff] %v9875_v18  ;;  %v4139_v3 = vsel %vm6769_vm13, %v9871_v44, -3e+38  ;;  %v3912_v56 = vmul.f32 %v9542_v32, %v3802_v43  ;;  %v9916_v43 = vsel %vm11738_vm3, %v11760_v9, %v11759_v11  ;;  %v11761_v55 = vrot.slane %v9875_v18, 7 }
 0x314   : > { %11755 = vst [vmem:[#allocation14_spill] sm:$0xff] %v9888_v59  ;;  %v9894_v19 = vmax.f32 %v9838_v5, %v4139_v3  ;;  %v9904_v1 = vadd.f32 %v9547_v54, %v3913_v57  ;;  %v11758_v3 = vsel %vm6235_vm5, %v9656_v17, -3e+38  ;;  %vm11763_vm12 = vmmov %vm11738_vm3  ;;  %v4166_v17 = vmax.f32 %v9702_v27, %v9916_v43 }
 0x315   : > { %v4546_v44 = vmax.f32 %v4418_v16, %v11758_v3  ;;  %v9924_v57 = vsel %vm11763_vm12, %v11762_v15, %v11761_v55  ;;  %v9927_v62 = vadd.f32 %v9547_v54, %v3912_v56  ;;  %v5605_v16 = vpop.f32.mrb[16].mxu1  ;;  %v11766_v3 = vrot.slane %v9769_v51, 1 }
 0x316   : > { %11756 = vst [vmem:[#allocation67_spill] sm:$0xff] %v9894_v19  ;;  %11757 = vst [vmem:[#allocation68_spill] sm:$0xff] %v9904_v1  ;;  %v11767_v11 = vrot.slane %v9702_v27, 1  ;;  %vm11768_vm5 = vcmp.lt.s32.totalorder %v6104_v10, 7  ;;  %v4141_v55 = vsel %vm11580_vm0, %v9924_v57, -3e+38  ;;  %v3915_v56 = vmul.f32 %v5605_v16, %v9542_v32 }
 0x317   : > { %11764 = vst [vmem:[#allocation69_spill] sm:$0xff] %v9924_v57  ;;  %11765 = vst [vmem:[#allocation70_spill] sm:$0xff] %v9927_v62  ;;  %v3812_v19 = vpop.f32.mrb[17].mxu1  ;;  %v9948_v34 = vmax.f32 %v9875_v18, %v4141_v55  ;;  %v4674_v15 = vmax.f32 %v4546_v44, %v9760_v7  ;;  %v11772_v16 = vrot.slane %v9702_v27, 1  ;;  %v11773_v57 = vrot.slane %v9705_v26, 1  ;;  %v11778_v18 = vld [vmem:[#allocation23_spill] sm:$0xff] }
 0x318   : > { %v9937_v50 = vsel %vm11768_vm5, %v11767_v11, %v11766_v3  ;;  %v11335_v3 = vrot.slane %v9927_v62, 7  ;;  %v3914_v11 = vmul.f32 %v9542_v32, %v3812_v19  ;;  %v9954_v9 = vadd.f32 %v9547_v54, %v3915_v56  ;;  %vm11774_vm3 = vmmov %vm11768_vm5 }
 0x319   : > { %11770 = vst [vmem:[#allocation71_spill] sm:$0xff] %v9948_v34  ;;  %v9963_v22 = vsel %vm11774_vm3, %v11773_v57, %v11772_v16  ;;  %v4262_v55 = vsel %vm6494_vm8, %v9937_v50, -3e+38  ;;  %v11775_v19 = vrot.slane %v9856_v30, 7  ;;  %v5608_v2 = vpop.f32.mrb[18].mxu1  ;;  %vm11779_vm5 = vnez %v11778_v18  ;;  %vm11783_vm3 = vmmov %vm11763_vm12 }
 0x31a   : > { %11771 = vst [vmem:[#allocation72_spill] sm:$0xff] %v9954_v9  ;;  %v9977_v44 = vadd.f32 %v9547_v54, %v3914_v11  ;;  %v9981_v16 = vmax.f32 %v4166_v17, %v4262_v55  ;;  %v4802_v18 = vmax.f32 %v4674_v15, %v4770_v24  ;;  %v4420_v30 = vmax.f32 %v9840_v20, %v9608_v49  ;;  %v11786_v20 = vld [vmem:[#allocation25_spill] sm:$0xff] }
 0x31b   : > { %v9974_v56 = vsel %vm11763_vm12, %v11775_v19, %v11335_v3  ;;  %v3917_v19 = vmul.f32 %v5608_v2, %v9542_v32  ;;  %v3822_v3 = vpop.f32.mrb[19].mxu1  ;;  %v4547_v24 = vmax.f32 %v9863_v53, %v9615_v46  ;;  %vm11787_vm12 = vnez %v11786_v20 }
 0x31c   : > { %11776 = vst [vmem:[#allocation73_spill] sm:$0xff] %v9974_v56  ;;  %11777 = vst [vmem:[#allocation74_spill] sm:$0xff] %v9977_v44  ;;  %v4143_v12 = vsel %vm11779_vm5, %v9974_v56, -3e+38  ;;  %v11337_v57 = vrot.slane %v9977_v44, 7  ;;  %v3916_v17 = vmul.f32 %v9542_v32, %v3822_v3  ;;  %v11790_v58 = vrot.slane %v9954_v9, 7 }
 0x31d   : > { %v9990_v11 = vmax.f32 %v9927_v62, %v4143_v12  ;;  %v9997_v34 = vadd.f32 %v9547_v54, %v3917_v19  ;;  %v11782_v12 = vrot.slane %v9904_v1, 7  ;;  %v5611_v3 = vpop.f32.mrb[20].mxu1  ;;  %v4516_v19 = vsel %vm6425_vm7, %v9728_v4, -3e+38 }
 0x31e   : > { %v10010_v59 = vadd.f32 %v9547_v54, %v3916_v17  ;;  %v3832_v55 = vpop.f32.mrb[21].mxu1  ;;  %v4643_v17 = vsel %vm6368_vm6, %v9766_v36, -3e+38  ;;  %v4834_v15 = vmax.f32 %v4802_v18, -3e+38  ;;  %vm11791_vm6 = vmmov %vm11783_vm3  ;;  %v11795_v18 = vrot.slane %v9769_v51, 7 }
 0x31f   : > { %11780 = vst [vmem:[#allocation75_spill] sm:$0xff] %v9990_v11  ;;  %11781 = vst [vmem:[#allocation76_spill] sm:$0xff] %v9997_v34  ;;  %v10007_v2 = vsel %vm11783_vm3, %v11782_v12, %v11337_v57  ;;  %v3919_v12 = vmul.f32 %v5611_v3, %v9542_v32  ;;  %v3918_v56 = vmul.f32 %v9542_v32, %v3832_v55 }
 0x320   : > { %11784 = vst [vmem:[#allocation77_spill] sm:$0xff] %v10007_v2  ;;  %11785 = vst [vmem:[#allocation78_spill] sm:$0xff] %v10010_v59  ;;  %v4145_v49 = vsel %vm11787_vm12, %v10007_v2, -3e+38  ;;  %v11342_v53 = vrot.slane %v10010_v59, 7  ;;  %v4548_v2 = vmax.f32 %v4420_v30, %v4516_v19  ;;  %v4675_v3 = vmax.f32 %v4547_v24, %v4643_v17  ;;  %v11796_v19 = vld [vmem:[#allocation27_spill] sm:$0xff] }
 0x321   : > { %v10026_v57 = vmax.f32 %v9977_v44, %v4145_v49  ;;  %v10032_v20 = vadd.f32 %v9547_v54, %v3919_v12  ;;  %v10044_v4 = vadd.f32 %v9547_v54, %v3918_v56  ;;  %v5614_v55 = vpop.f32.mrb[22].mxu1  ;;  %v11794_v12 = vrot.slane %v9744_v61, 7 }
 0x322   : > { %v10041_v49 = vsel %vm11791_vm6, %v11790_v58, %v11342_v53  ;;  %vm11797_vm12 = vnez %v11796_v19  ;;  %v3921_v58 = vmul.f32 %v5614_v55, %v9542_v32  ;;  %v3842_v11 = vpop.f32.mrb[23].mxu1  ;;  %v4772_v56 = vsel %vm6425_vm7, %v9937_v50, -3e+38  ;;  %vm11800_vm7 = vmmov %vm11783_vm3 }
 0x323   : > { %11788 = vst [vmem:[#allocation79_spill] sm:$0xff] %v10026_v57  ;;  %11789 = vst [vmem:[#allocation80_spill] sm:$0xff] %v10032_v20  ;;  %v10052_v30 = vsel %vm11783_vm3, %v11795_v18, %v11794_v12  ;;  %v4147_v24 = vsel %vm11797_vm12, %v10041_v49, -3e+38  ;;  %v11345_v12 = vrot.slane %v10044_v4, 7  ;;  %v3920_v18 = vmul.f32 %v9542_v32, %v3842_v11 }
 0x324   : > { %11792 = vst [vmem:[#allocation81_spill] sm:$0xff] %v10041_v49  ;;  %11793 = vst [vmem:[#allocation82_spill] sm:$0xff] %v10044_v4  ;;  %v10063_v53 = vmax.f32 %v10010_v59, %v4147_v24  ;;  %v10069_v19 = vadd.f32 %v9547_v54, %v3921_v58  ;;  %v10072_v17 = vmax.f32 %v4834_v15, %v9642_v13  ;;  %v11799_v24 = vrot.slane %v9997_v34, 7 }
 0x325   : > { %v4676_v55 = vmax.f32 %v4548_v2, %v9916_v43  ;;  %v4803_v31 = vmax.f32 %v4675_v3, %v9963_v22  ;;  %v10085_v11 = vadd.f32 %v9547_v54, %v3920_v18  ;;  %v5617_v58 = vpop.f32.mrb[24].mxu1  ;;  %v4168_v15 = vmax.f32 %v9744_v61, %v10052_v30 }
 0x326   : > { %11798 = vst [vmem:[#allocation83_spill] sm:$0xff] %v10063_v53  ;;  %v10082_v57 = vsel %vm11800_vm7, %v11799_v24, %v11345_v12  ;;  %v11802_v49 = vrot.slane %v9793_v37, 1  ;;  %v11803_v2 = vrot.slane %v9744_v61, 1  ;;  %vm11804_vm6 = vcmp.lt.s32.totalorder %v6104_v10, 7  ;;  %v11805_v24 = vld [vmem:[#allocation29_spill] sm:$0xff]  ;;  %v3852_v59 = vpop.f32.mrb[25].mxu1 }
 0x327   : > { %11801 = vst [vmem:[#allocation84_spill] sm:$0xff] %v10082_v57  ;;  %vm11806_vm3 = vnez %v11805_v24  ;;  %v3923_v34 = vmul.f32 %v5617_v58, %v9542_v32  ;;  %v11358_v1 = vrot.slane %v10085_v11, 7  ;;  %v4804_v53 = vmax.f32 %v4676_v55, %v4772_v56  ;;  %vm11811_vm7 = vmmov %vm11804_vm6  ;;  %v11815_v55 = vld [vmem:[#allocation16_spill] sm:$0xff] }
 0x328   : > { %v10095_v3 = vsel %vm11804_vm6, %v11803_v2, %v11802_v49  ;;  %v4149_v12 = vsel %vm11806_vm3, %v10082_v57, -3e+38  ;;  %v3922_v49 = vmul.f32 %v9542_v32, %v3852_v59  ;;  %v4835_v24 = vmax.f32 %v4803_v31, %v9555_v63  ;;  %v11817_v57 = vld [vmem:[#allocation31_spill] sm:$0xff] }
 0x329   : > { %v10104_v9 = vmax.f32 %v10044_v4, %v4149_v12  ;;  %v10110_v2 = vadd.f32 %v9547_v54, %v3923_v34  ;;  %v11809_v18 = vrot.slane %v9744_v61, 1  ;;  %v11810_v58 = vrot.slane %v9769_v51, 1  ;;  %v5620_v56 = vpop.f32.mrb[26].mxu1 }
 0x32a   : > { %v11812_v44 = vrot.slane %v10032_v20, 7  ;;  %vm11813_vm6 = vcmp.lt.s32.totalorder %v6104_v10, 1  ;;  %v10130_v34 = vadd.f32 %v9547_v54, %v3922_v49  ;;  %vm11816_vm3 = vnez %v11815_v55  ;;  %v3862_v49 = vpop.f32.mrb[27].mxu1 }
 0x32b   : > { %11807 = vst [vmem:[#allocation85_spill] sm:$0xff] %v10104_v9  ;;  %11808 = vst [vmem:[#allocation86_spill] sm:$0xff] %v10110_v2  ;;  %v10119_v12 = vsel %vm11811_vm7, %v11810_v58, %v11809_v18  ;;  %v4264_v31 = vsel %vm11816_vm3, %v10095_v3, -3e+38  ;;  %vm11818_vm7 = vnez %v11817_v57  ;;  %v3924_v18 = vmul.f32 %v9542_v32, %v3862_v49 }
 0x32c   : > { %v10127_v59 = vsel %vm11813_vm6, %v11812_v44, %v11358_v1  ;;  %v3925_v1 = vmul.f32 %v5620_v56, %v9542_v32  ;;  %v11367_v62 = vrot.slane %v10130_v34, 7  ;;  %v4836_v57 = vmax.f32 %v4804_v53, %v9552_v45 }
 0x32d   : > { %11814 = vst [vmem:[#allocation87_spill] sm:$0xff] %v10127_v59  ;;  %v4151_v9 = vsel %vm11818_vm7, %v10127_v59, -3e+38  ;;  %v4867_v59 = vmax.f32 %v4835_v24, %v9705_v26  ;;  %v10154_v44 = vmax.f32 %v4168_v15, %v4264_v31  ;;  %v10165_v4 = vadd.f32 %v9547_v54, %v3924_v18  ;;  %v5623_v49 = vpop.f32.mrb[28].mxu1 }
 0x32e   : > { %v10144_v20 = vmax.f32 %v10085_v11, %v4151_v9  ;;  %v10150_v58 = vadd.f32 %v9547_v54, %v3925_v1  ;;  %v11821_v9 = vrot.slane %v10069_v19, 7  ;;  %v11824_v45 = vsel %vm6158_vm4, %v9721_v35, -3e+38 }
 0x32f   : > { %11823 = vst [vmem:[#allocation90_spill] sm:$0xff] %v10165_v4  ;;  %v11825_v1 = vmax.f32 %v9788_v0, %v9963_v22  ;;  %v4422_v15 = vmax.f32 %v9981_v16, %v9760_v7  ;;  %v11369_v0 = vrot.slane %v10165_v4, 7  ;;  %vm11836_vm7 = vnez %v11652_v6 }
 0x330   : > { %11819 = vst [vmem:[#allocation16_spill] sm:$0xff] %v10144_v20  ;;  %11820 = vst [vmem:[#allocation88_spill] sm:$0xff] %v10150_v58  ;;  %v10162_v56 = vsel %vm11813_vm6, %v11821_v9, %v11367_v62  ;;  %v3927_v62 = vmul.f32 %v5623_v49, %v9542_v32  ;;  %v3872_v20 = vpop.f32.mrb[29].mxu1  ;;  %v11829_v49 = vsel %vm6494_vm8, %v9785_v60, -3e+38  ;;  %v11834_v60 = vrot.slane %v10165_v4, 1 }
 0x331   : > { %11822 = vst [vmem:[#allocation89_spill] sm:$0xff] %v10162_v56  ;;  %v10174_v53 = vmax.f32 %v11825_v1, %v11824_v45  ;;  %v4153_v18 = vsel %vm11645_vm10, %v10162_v56, -3e+38  ;;  %v3926_v7 = vmul.f32 %v9542_v32, %v3872_v20  ;;  %v4868_v1 = vmax.f32 %v4836_v57, %v9702_v27 }
 0x332   : > { %v10185_v35 = vmax.f32 %v10130_v34, %v4153_v18  ;;  %v10191_v16 = vadd.f32 %v9547_v54, %v3927_v62  ;;  %v10200_v18 = vmax.f32 %v4422_v15, %v11829_v49  ;;  %v11830_v20 = vrot.slane %v10110_v2, 7 }
 0x333   : > { %v4549_v24 = vmax.f32 %v10174_v53, %v9800_v39  ;;  %v10212_v57 = vadd.f32 %v9547_v54, %v3926_v7  ;;  %v5626_v53 = vpop.f32.mrb[30].mxu1  ;;  %v11833_v45 = vrot.slane %v10150_v58, 1  ;;  %vm11835_vm10 = vcmp.lt.s32.totalorder %v6104_v10, 7 }
 0x334   : > { %11827 = vst [vmem:[#allocation91_spill] sm:$0xff] %v10185_v35  ;;  %11828 = vst [vmem:[#allocation92_spill] sm:$0xff] %v10191_v16  ;;  %v10209_v62 = vsel %vm11813_vm6, %v11830_v20, %v11369_v0  ;;  %v4094_v20 = vrot.slane %v10191_v16, 7  ;;  %v3929_v7 = vmul.f32 %v5626_v53, %v9542_v32  ;;  %v3882_v0 = vpop.f32.mrb[31].mxu1  ;;  %v10243_v53 = vpack.c.bf16 %v4868_v1, %v4867_v59 }
 0x335   : > { %11831 = vst [vmem:[#allocation93_spill] sm:$0xff] %v10209_v62  ;;  %11832 = vst [vmem:[#allocation94_spill] sm:$0xff] %v10212_v57  ;;  %v10220_v15 = vsel %vm11835_vm10, %v11834_v60, %v11833_v45  ;;  %v4155_v9 = vsel %vm11836_vm7, %v10209_v62, -3e+38  ;;  %v4093_v56 = vrot.slane %v10212_v57, 7  ;;  %v3928_v35 = vmul.f32 %v9542_v32, %v3882_v0 }
 0x336   : > { %v10229_v31 = vmax.f32 %v10165_v4, %v4155_v9  ;;  %v4645_v45 = vsel %vm6158_vm4, %v9811_v33, -3e+38  ;;  %v10237_v60 = vrot.slane %v10191_v16, 1  ;;  %v10241_v6 = vadd.f32 %v9547_v54, %v3929_v7  ;;  %vm11840_vm10 = vmmov %vm11813_vm6 }
 0x337   : > { %v4384_v9 = vsel %vm11840_vm10, %v4094_v20, %v9559_v40  ;;  %v10250_v32 = vsel %vm11813_vm6, %v4093_v56, %v4094_v20  ;;  %v11841_v52 = vrot.slane %v10150_v58, 7  ;;  %vm11842_vm4 = vmmov %vm11813_vm6  ;;  %v10259_v49 = vadd.f32 %v9547_v54, %v3928_v35 }
 0x338   : > { %11837 = vst [vmem:[#allocation95_spill] sm:$0xff] %v10229_v31  ;;  %11838 = vst [vmem:[#allocation96_spill] sm:$0xff] %v10237_v60  ;;  %v10265_v1 = vrot.slane %v10241_v6, 7  ;;  %v10268_v7 = vrot.slane %v10241_v6, 1  ;;  %v4413_v40 = vsel %vm11661_vm1, %v10209_v62, -3e+38  ;;  %v4190_v35 = vmax.f32 %v10191_v16, %v10250_v32 }
 0x339   : > { %11839 = vst [vmem:[#allocation97_spill] sm:$0xff] %v10241_v6  ;;  %v10256_v0 = vsel %vm11842_vm4, %v11841_v52, %v4093_v56  ;;  %11843 = vst [vmem:[#allocation98_spill] sm:$0xff] %v10259_v49  ;;  %v4095_v52 = vrot.slane %v10259_v49, 7  ;;  %v4223_v54 = vrot.slane %v10259_v49, 1  ;;  %v11844_v58 = vrot.slane %v10212_v57, 1 }
 0x33a   : > { %v4157_v59 = vsel %vm11661_vm1, %v10256_v0, -3e+38  ;;  %vm11845_vm10 = vcmp.lt.s32.totalorder %v6104_v10, 7  ;;  %vm11846_vm6 = vmmov %vm11842_vm4  ;;  %v4520_v21 = vsel %vm11816_vm3, %v9937_v50, -3e+38  ;;  %v11871_v50 = vrot.slane %v9838_v5, 7 }
 0x33b   : > { %v4189_v56 = vmax.f32 %v10212_v57, %v4157_v59  ;;  %v10283_v4 = vsel %vm11845_vm10, %v11844_v58, %v10237_v60  ;;  %v4128_v62 = vsel %vm11846_vm6, %v10265_v1, %v9563_v29  ;;  %vm11847_vm4 = vmmov %vm11845_vm10 }
 0x33c   : > { %v4256_v59 = vsel %vm11847_vm4, %v10268_v7, %v9566_v48  ;;  %v4129_v57 = vsel %vm6128_vm2, %v4128_v62, -3e+38  ;;  %vm11848_vm10 = vmmov %vm11846_vm6  ;;  %v4098_v48 = vsel %vm11846_vm6, %v4094_v20, %v4095_v52  ;;  %v10313_v62 = vsel %vm11847_vm4, %v4223_v54, %v10268_v7 }
 0x33d   : > { %v4317_v31 = vmax.f32 %v4189_v56, %v10283_v4  ;;  %v4288_v58 = vsel %vm11677_vm14, %v4256_v59, -3e+38  ;;  %v10303_v29 = vsel %vm11848_vm10, %v4095_v52, %v10265_v1  ;;  %v4161_v2 = vmax.f32 %v9555_v63, %v4129_v57  ;;  %vm11850_vm10 = vmmov %vm11847_vm4 }
 0x33e   : > { %11849 = vst [vmem:[#allocation99_spill] sm:$0xff] %v10303_v29  ;;  %v4192_v16 = vmax.f32 %v10241_v6, %v10303_v29  ;;  %v4159_v56 = vsel %vm11670_vm15, %v4098_v48, -3e+38  ;;  %v10320_v59 = vsel %vm11850_vm10, %v10237_v60, %v4223_v54  ;;  %v4415_v63 = vsel %vm11670_vm15, %v10256_v0, -3e+38 }
 0x33f   : > { %v4445_v57 = vmax.f32 %v4317_v31, %v4413_v40  ;;  %v4289_v20 = vmax.f32 %v4161_v2, %v9615_v46  ;;  %v4191_v52 = vmax.f32 %v10259_v49, %v4159_v56  ;;  %vm11851_vm6 = vnez %v11483_v47 }
 0x340   : > { %v4286_v6 = vsel %vm11851_vm6, %v10320_v59, -3e+38  ;;  %v10330_v29 = vmax.f32 %v4192_v16, %v4288_v58  ;;  %v4669_v60 = vsel %vm11661_vm1, %v4098_v48, -3e+38  ;;  %v4385_v40 = vsel %vm6128_vm2, %v4384_v9, -3e+38 }
 0x341   : > { %v10332_v25 = vmax.f32 %v4190_v35, %v4286_v6  ;;  %v4573_v54 = vmax.f32 %v4445_v57, %v10220_v15  ;;  %v4319_v46 = vmax.f32 %v4191_v52, %v10313_v62  ;;  %v4417_v2 = vmax.f32 %v4289_v20, %v4385_v40 }
 0x342   : > { %v4677_v31 = vmax.f32 %v4549_v24, %v4645_v45  ;;  %v4678_v56 = vmax.f32 %v10200_v18, %v10052_v30  ;;  %v4774_v6 = vsel %vm6494_vm8, %v10095_v3, -3e+38  ;;  %v11852_v16 = vrot.slane %v9779_v28, 7  ;;  %vm11860_vm8 = vmmov %vm11847_vm4 }
 0x343   : > { %v10342_v41 = vmax.f32 %v4573_v54, %v4669_v60  ;;  %vm11854_vm1 = vcmp.lt.s32.totalorder %v6104_v10, 1  ;;  %v11855_v35 = vrot.slane %v9838_v5, 1  ;;  %v11856_v24 = vrot.slane %v9779_v28, 1  ;;  %v11861_v54 = vld [vmem:[#allocation18_spill] sm:$0xff] }
 0x344   : > { %v10353_v9 = vsel %vm11854_vm1, %v11853_v23, %v11852_v16  ;;  %v10363_v45 = vmax.f32 %v4319_v46, %v4415_v63  ;;  %v4545_v8 = vmax.f32 %v4417_v2, %v9568_v42  ;;  %v4805_v60 = vmax.f32 %v4677_v31, %v10119_v12  ;;  %v11863_v46 = vld [vmem:[#allocation14_spill] sm:$0xff]  ;;  %v11866_v23 = vld [vmem:[#allocation13_spill] sm:$0xff] }
 0x345   : > { %v10361_v18 = vsel %vm11847_vm4, %v11856_v24, %v11855_v35  ;;  %v4806_v58 = vmax.f32 %v4678_v56, %v4774_v6  ;;  %v4170_v48 = vmax.f32 %v9779_v28, %v10353_v9  ;;  %v11858_v57 = vmov %v11856_v24  ;;  %v11865_v56 = vld [vmem:[#allocation54_spill] sm:$0xff] }
 0x346   : > { %11857 = vst [vmem:[#allocation100_spill] sm:$0xff] %v10363_v45  ;;  %v11859_v20 = vrot.slane %v9793_v37, 1  ;;  %vm11862_vm10 = vnez %v11861_v54  ;;  %v4391_v40 = vsel %vm6560_vm9, %v9766_v36, -3e+38  ;;  %v11864_v2 = vsel %vm6128_vm2, %v11863_v46, -3e+38  ;;  %vm11872_vm2 = vmmov %vm11854_vm1 }
 0x347   : > { %v4266_v63 = vsel %vm11862_vm10, %v10361_v18, -3e+38  ;;  %v4673_v31 = vmax.f32 %v4545_v8, %v11864_v2  ;;  %v4837_v6 = vmax.f32 %v4805_v60, %v11865_v56  ;;  %v4838_v16 = vmax.f32 %v4806_v58, %v9642_v13  ;;  %v11868_v58 = vld [vmem:[#allocation10_spill] sm:$0xff]  ;;  %v11925_v45 = vld [vmem:[#allocation73_spill] sm:$0xff] }
 0x348   : > { %v10375_v52 = vsel %vm11860_vm8, %v11859_v20, %v11858_v57  ;;  %v4298_v24 = vmax.f32 %v4170_v48, %v4266_v63  ;;  %v11867_v57 = vmax.f32 %v9827_v14, %v10119_v12  ;;  %v4424_v36 = vmax.f32 %v10154_v44, %v9916_v43  ;;  %v11869_v44 = vld [vmem:[#allocation11_spill] sm:$0xff] }
 0x349   : > { %v4297_v35 = vmax.f32 %v11866_v23, %v10375_v52  ;;  %v4801_v8 = vmax.f32 %v4673_v31, %v9800_v39  ;;  %v4869_v60 = vmax.f32 %v4837_v6, %v9769_v51  ;;  %v4870_v13 = vmax.f32 %v4838_v16, %v9744_v61  ;;  %v11873_v31 = vld [vmem:[#allocation66_spill] sm:$0xff] }
 0x34a   : > { %v4423_v20 = vmax.f32 %v11867_v57, %v4391_v40  ;;  %v4647_v48 = vsel %vm6560_vm9, %v11868_v58, -3e+38  ;;  %v4552_v63 = vmax.f32 %v4424_v36, %v4520_v21  ;;  %v4776_v43 = vsel %vm11816_vm3, %v10361_v18, -3e+38  ;;  %vm11876_vm9 = vmmov %vm11847_vm4  ;;  %v11880_v21 = vld [vmem:[#allocation20_spill] sm:$0xff] }
 0x34b   : > { %v11870_v40 = vrot.slane %v11869_v44, 7  ;;  %v4833_v46 = vmax.f32 %v4801_v8, -3e+38  ;;  %v5713_v2 = vpack.c.bf16 %v4870_v13, %v4869_v60  ;;  %v11875_v6 = vrot.slane %v11869_v44, 1  ;;  %vm11879_vm3 = vmmov %vm11847_vm4  ;;  %v11882_v13 = vld [vmem:[#allocation67_spill] sm:$0xff] }
 0x34c   : > { %v4551_v14 = vmax.f32 %v4423_v20, %v9963_v22  ;;  %v11874_v22 = vrot.slane %v11873_v31, 1  ;;  %v4680_v23 = vmax.f32 %v4552_v63, %v10353_v9  ;;  %v11878_v20 = vrot.slane %v9838_v5, 1  ;;  %vm11888_vm4 = vmmov %vm11872_vm2 }
 0x34d   : > { %v10415_v39 = vsel %vm11872_vm2, %v11871_v50, %v11870_v40  ;;  %v11877_v57 = vmov %v11875_v6  ;;  %vm11881_vm1 = vnez %v11880_v21  ;;  %v4865_v60 = vmax.f32 %v4833_v46, %v11865_v56  ;;  %v11884_v46 = vld [vmem:[#allocation65_spill] sm:$0xff]  ;;  %vm11895_vm8 = vmmov %vm11879_vm3 }
 0x34e   : > { %v4172_v38 = vmax.f32 %v11869_v44, %v10415_v39  ;;  %v10425_v55 = vsel %vm11876_vm9, %v11875_v6, %v11874_v22  ;;  %v4679_v16 = vmax.f32 %v4551_v14, %v4647_v48  ;;  %v10434_v36 = vsel %vm11879_vm3, %v11878_v20, %v11877_v57 }
 0x34f   : > { %v4268_v8 = vsel %vm11881_vm1, %v10425_v55, -3e+38  ;;  %v4299_v40 = vmax.f32 %v11882_v13, %v10434_v36  ;;  %v4393_v63 = vsel %vm6670_vm11, %v9811_v33, -3e+38  ;;  %v4808_v22 = vmax.f32 %v4680_v23, %v4776_v43 }
 0x350   : > { %v4300_v48 = vmax.f32 %v4172_v38, %v4268_v8  ;;  %v4807_v50 = vmax.f32 %v4679_v16, %v10375_v52  ;;  %v4425_v6 = vmax.f32 %v4297_v35, %v4393_v63  ;;  %v4426_v57 = vmax.f32 %v4298_v24, %v10052_v30  ;;  %v11889_v8 = vld [vmem:[#allocation70_spill] sm:$0xff] }
 0x351   : > { %v5705_v20 = vpack.c.bf16 %v10072_v17, %v4865_v60  ;;  %v4522_v56 = vsel %vm11862_vm10, %v10095_v3, -3e+38  ;;  %v4649_v38 = vsel %vm6670_vm11, %v11884_v46, -3e+38  ;;  %v4778_v33 = vsel %vm11862_vm10, %v10425_v55, -3e+38  ;;  %vm11892_vm11 = vmmov %vm11879_vm3 }
 0x352   : > { %v4839_v16 = vmax.f32 %v4807_v50, %v9705_v26  ;;  %v4840_v35 = vmax.f32 %v4808_v22, %v9702_v27  ;;  %v4553_v30 = vmax.f32 %v4425_v6, %v10119_v12  ;;  %v4554_v24 = vmax.f32 %v4426_v57, %v4522_v56  ;;  %v11885_v17 = vld [vmem:[#allocation15_spill] sm:$0xff]  ;;  %v11898_v22 = vld [vmem:[#allocation42_spill] sm:$0xff] }
 0x353   : > { %5706 = vmatpush1.bf16.msra.mxu0 %v5705_v20  ;;  %v11886_v43 = vrot.slane %v11885_v17, 7  ;;  %v11887_v3 = vrot.slane %v11873_v31, 7  ;;  %v11890_v60 = vrot.slane %v11889_v8, 1  ;;  %v11891_v54 = vrot.slane %v11885_v17, 1  ;;  %v11897_v50 = vld [vmem:[#allocation43_spill] sm:$0xff] }
 0x354   : > { %v11894_v12 = vrot.slane %v11873_v31, 1  ;;  %v4395_v63 = vsel %vm6769_vm13, %v11868_v58, -3e+38  ;;  %v11899_v6 = vpack.c.bf16 %v11897_v50, %v11898_v22  ;;  %v4871_v57 = vmax.f32 %v4839_v16, %v9793_v37  ;;  %v11902_v58 = vld [vmem:[#allocation71_spill] sm:$0xff] }
 0x355   : > { %v10466_v23 = vsel %vm11888_vm4, %v11887_v3, %v11886_v43  ;;  %v10474_v26 = vsel %vm11892_vm11, %v11891_v54, %v11890_v60  ;;  %v11893_v27 = vmov %v11891_v54  ;;  %v4872_v20 = vmax.f32 %v4840_v35, %v9779_v28  ;;  %v11900_v60 = vld [vmem:[#allocation22_spill] sm:$0xff] }
 0x356   : > { %v10482_v13 = vsel %vm11895_vm8, %v11894_v12, %v11893_v27  ;;  %5708 = vmatprep.subr.bf16.mxu0 %v11899_v6  ;;  %v4681_v56 = vmax.f32 %v4553_v30, %v4649_v38  ;;  %v4682_v43 = vmax.f32 %v4554_v24, %v10415_v39  ;;  %v4174_v3 = vmax.f32 %v11885_v17, %v10466_v23  ;;  %v11903_v6 = vld [vmem:[#allocation69_spill] sm:$0xff] }
 0x357   : > { %vm11901_vm10 = vnez %v11900_v60  ;;  %v4301_v27 = vmax.f32 %v11902_v58, %v10482_v13  ;;  %v4427_v12 = vmax.f32 %v4299_v40, %v4395_v63  ;;  %v5717_v50 = vpack.c.bf16 %v4872_v20, %v4871_v57  ;;  %5710 = vmatpush1.bf16.msra.mxu0 %v10243_v53  ;;  %v11904_v40 = vld [vmem:[#allocation39_spill] sm:$0xff]  ;;  %v11905_v63 = vld [vmem:[#allocation44_spill] sm:$0xff] }
 0x358   : > { %v4270_v54 = vsel %vm11901_vm10, %v10474_v26, -3e+38  ;;  %v4809_v22 = vmax.f32 %v4681_v56, %v10434_v36  ;;  %v4810_v16 = vmax.f32 %v4682_v43, %v4778_v33  ;;  %v4428_v35 = vmax.f32 %v4300_v48, %v10353_v9  ;;  %v11907_v20 = vld [vmem:[#allocation68_spill] sm:$0xff]  ;;  %v11911_v43 = vld [vmem:[#allocation74_spill] sm:$0xff] }
 0x359   : > { %v4302_v38 = vmax.f32 %v4174_v3, %v4270_v54  ;;  %v4524_v30 = vsel %vm11881_vm1, %v10361_v18, -3e+38  ;;  %v4555_v24 = vmax.f32 %v4427_v12, %v10375_v52  ;;  %v4651_v58 = vsel %vm6769_vm13, %v11903_v6, -3e+38  ;;  %vm11910_vm13 = vmmov %vm11872_vm2 }
 0x35a   : > { %v11906_v57 = vpack.c.bf16 %v11904_v40, %v11905_v63  ;;  %v4841_v33 = vmax.f32 %v4809_v22, %v9769_v51  ;;  %v4842_v9 = vmax.f32 %v4810_v16, %v9744_v61  ;;  %v4556_v53 = vmax.f32 %v4428_v35, %v4524_v30  ;;  %vm11914_vm2 = vmmov %vm11879_vm3  ;;  %v11920_v63 = vld [vmem:[#allocation75_spill] sm:$0xff] }
 0x35b   : > { %v4780_v48 = vsel %vm11881_vm1, %v10474_v26, -3e+38  ;;  %v4683_v18 = vmax.f32 %v4555_v24, %v4651_v58  ;;  %v11908_v52 = vrot.slane %v11907_v20, 7  ;;  %v11909_v56 = vrot.slane %v11889_v8, 7  ;;  %vm11917_vm9 = vmmov %vm11914_vm2  ;;  %v11918_v58 = vld [vmem:[#allocation24_spill] sm:$0xff] }
 0x35c   : > { %5712 = vmatprep.subr.bf16.mxu0 %v11906_v57  ;;  %v11912_v3 = vrot.slane %v11911_v43, 1  ;;  %v11913_v51 = vrot.slane %v11907_v20, 1  ;;  %v11916_v54 = vrot.slane %v11889_v8, 1  ;;  %v4873_v22 = vmax.f32 %v4841_v33, %v9838_v5  ;;  %vm11929_vm1 = vmmov %vm11888_vm4 }
 0x35d   : > { %v10524_v14 = vsel %vm11910_vm13, %v11909_v56, %v11908_v52  ;;  %v4874_v16 = vmax.f32 %v4842_v9, %v11869_v44  ;;  %v4684_v35 = vmax.f32 %v4556_v53, %v10466_v23  ;;  %5714 = vmatpush1.bf16.msra.mxu0 %v5713_v2  ;;  %v4811_v24 = vmax.f32 %v4683_v18, %v10482_v13  ;;  %v11922_v9 = vld [vmem:[#allocation46_spill] sm:$0xff]  ;;  %v11923_v56 = vld [vmem:[#allocation45_spill] sm:$0xff]  ;;  %vm11951_vm8 = vmmov %vm11929_vm1 }
 0x35e   : > { %v10532_v61 = vsel %vm11914_vm2, %v11913_v51, %v11912_v3  ;;  %v11915_v21 = vmov %v11913_v51  ;;  %v4176_v30 = vmax.f32 %v11907_v20, %v10524_v14  ;;  %vm11919_vm3 = vnez %v11918_v58 }
 0x35f   : > { %v10540_v12 = vsel %vm11917_vm9, %v11916_v54, %v11915_v21  ;;  %v4272_v40 = vsel %vm11919_vm3, %v10532_v61, -3e+38  ;;  %v4397_v33 = vsel %vm11580_vm0, %v11884_v46, -3e+38  ;;  %v11924_v53 = vpack.c.bf16 %v11922_v9, %v11923_v56  ;;  %vm11971_vm9 = vmmov %vm11929_vm1 }
 0x360   : > { %v4303_v57 = vmax.f32 %v11920_v63, %v10540_v12  ;;  %v5721_v3 = vpack.c.bf16 %v4874_v16, %v4873_v22  ;;  %v4812_v51 = vmax.f32 %v4684_v35, %v4780_v48  ;;  %v4304_v2 = vmax.f32 %v4176_v30, %v4272_v40  ;;  %v11926_v48 = vld [vmem:[#allocation72_spill] sm:$0xff]  ;;  %v11934_v30 = vld [vmem:[#allocation47_spill] sm:$0xff] }
 0x361   : > { %5716 = vmatprep.subr.bf16.mxu0 %v11924_v53  ;;  %v4429_v21 = vmax.f32 %v4301_v27, %v4397_v33  ;;  %v4843_v18 = vmax.f32 %v4811_v24, %v9793_v37  ;;  %v4430_v54 = vmax.f32 %v4302_v38, %v10415_v39  ;;  %v4526_v63 = vsel %vm11901_vm10, %v10425_v55, -3e+38  ;;  %v11935_v24 = vld [vmem:[#allocation41_spill] sm:$0xff] }
 0x362   : > { %v4653_v46 = vsel %vm11580_vm0, %v11925_v45, -3e+38  ;;  %v4844_v49 = vmax.f32 %v4812_v51, %v9779_v28  ;;  %v4782_v27 = vsel %vm11901_vm10, %v10532_v61, -3e+38  ;;  %v11927_v37 = vrot.slane %v11926_v48, 7  ;;  %5718 = vmatpush1.bf16.msra.mxu0 %v5717_v50  ;;  %vm11933_vm0 = vmmov %vm11914_vm2  ;;  %v11940_v51 = vld [vmem:[#allocation26_spill] sm:$0xff] }
 0x363   : > { %v4557_v9 = vmax.f32 %v4429_v21, %v10434_v36  ;;  %v11928_v39 = vrot.slane %v11911_v43, 7  ;;  %v4875_v55 = vmax.f32 %v4843_v18, %v11873_v31  ;;  %v4558_v22 = vmax.f32 %v4430_v54, %v4526_v63  ;;  %v11930_v36 = vld [vmem:[#allocation78_spill] sm:$0xff]  ;;  %vm11939_vm4 = vmmov %vm11933_vm0  ;;  %v11942_v54 = vld [vmem:[#allocation79_spill] sm:$0xff] }
 0x364   : > { %v11931_v16 = vrot.slane %v11930_v36, 1  ;;  %v11932_v60 = vrot.slane %v11926_v48, 1  ;;  %v11936_v40 = vpack.c.bf16 %v11934_v30, %v11935_v24  ;;  %v4876_v50 = vmax.f32 %v4844_v49, %v11885_v17  ;;  %v11944_v24 = vld [vmem:[#allocation77_spill] sm:$0xff]  ;;  %vm11958_vm10 = vmmov %vm11933_vm0 }
 0x365   : > { %v10578_v38 = vsel %vm11929_vm1, %v11928_v39, %v11927_v37  ;;  %v4685_v52 = vmax.f32 %v4557_v9, %v4653_v46  ;;  %v11938_v56 = vrot.slane %v11911_v43, 1  ;;  %vm11941_vm11 = vnez %v11940_v51  ;;  %vm11977_vm1 = vmmov %vm11933_vm0 }
 0x366   : > { %v4178_v28 = vmax.f32 %v11926_v48, %v10578_v38  ;;  %v10589_v35 = vsel %vm11933_vm0, %v11932_v60, %v11931_v16  ;;  %5720 = vmatprep.subr.bf16.mxu0 %v11936_v40  ;;  %v11937_v33 = vmov %v11932_v60  ;;  %v4686_v18 = vmax.f32 %v4558_v22, %v10524_v14  ;;  %v11946_v40 = vld [vmem:[#allocation48_spill] sm:$0xff] }
 0x367   : > { %v10601_v53 = vsel %vm11939_vm4, %v11938_v56, %v11937_v33  ;;  %v4274_v21 = vsel %vm11941_vm11, %v10589_v35, -3e+38  ;;  %v4399_v46 = vsel %vm11779_vm5, %v11903_v6, -3e+38  ;;  %v5725_v9 = vpack.c.bf16 %v4876_v50, %v4875_v55  ;;  %5722 = vmatpush1.bf16.msra.mxu0 %v5721_v3  ;;  %v11945_v55 = vld [vmem:[#allocation49_spill] sm:$0xff]  ;;  %v11952_v56 = vld [vmem:[#allocation82_spill] sm:$0xff]  ;;  %vm11994_vm4 = vmmov %vm11977_vm1 }
 0x368   : > { %v4305_v63 = vmax.f32 %v11942_v54, %v10601_v53  ;;  %v4306_v37 = vmax.f32 %v4178_v28, %v4274_v21  ;;  %v4813_v39 = vmax.f32 %v4685_v52, %v10540_v12  ;;  %v4431_v16 = vmax.f32 %v4303_v57, %v4399_v46 }
 0x369   : > { %v4432_v60 = vmax.f32 %v4304_v2, %v10466_v23  ;;  %v4814_v30 = vmax.f32 %v4686_v18, %v4782_v27  ;;  %v4528_v22 = vsel %vm11919_vm3, %v10474_v26, -3e+38  ;;  %v4655_v28 = vsel %vm11779_vm5, %v11944_v24, -3e+38  ;;  %v11948_v2 = vld [vmem:[#allocation76_spill] sm:$0xff]  ;;  %vm11955_vm5 = vmmov %vm11933_vm0 }
 0x36a   : > { %v4784_v6 = vsel %vm11919_vm3, %v10589_v35, -3e+38  ;;  %v11947_v50 = vpack.c.bf16 %v11945_v55, %v11946_v40  ;;  %v4845_v23 = vmax.f32 %v4813_v39, %v9838_v5  ;;  %v4559_v57 = vmax.f32 %v4431_v16, %v10482_v13  ;;  %v11959_v16 = vld [vmem:[#allocation28_spill] sm:$0xff]  ;;  %vm11974_vm3 = vmmov %vm11933_vm0 }
 0x36b   : > { %v4560_v3 = vmax.f32 %v4432_v60, %v4528_v22  ;;  %v11949_v27 = vrot.slane %v11948_v2, 7  ;;  %v11950_v26 = vrot.slane %v11930_v36, 7  ;;  %v4846_v58 = vmax.f32 %v4814_v30, %v11869_v44  ;;  %v11961_v22 = vld [vmem:[#allocation83_spill] sm:$0xff] }
 0x36c   : > { %5724 = vmatprep.subr.bf16.mxu0 %v11947_v50  ;;  %v11953_v21 = vrot.slane %v11952_v56, 1  ;;  %v11954_v5 = vrot.slane %v11948_v2, 1  ;;  %v11957_v54 = vrot.slane %v11930_v36, 1  ;;  %v4877_v44 = vmax.f32 %v4845_v23, %v11889_v8  ;;  %v11962_v50 = vld [vmem:[#allocation25_spill] sm:$0xff]  ;;  %v11965_v23 = vld [vmem:[#allocation50_spill] sm:$0xff] }
 0x36d   : > { %v10634_v52 = vsel %vm11951_vm8, %v11950_v26, %v11949_v27  ;;  %v4687_v46 = vmax.f32 %v4559_v57, %v4655_v28  ;;  %v4688_v39 = vmax.f32 %v4560_v3, %v10578_v38  ;;  %vm11960_vm13 = vnez %v11959_v16  ;;  %5726 = vmatpush1.bf16.msra.mxu0 %v5725_v9  ;;  %v11964_v26 = vld [vmem:[#allocation51_spill] sm:$0xff] }
 0x36e   : > { %v4180_v33 = vmax.f32 %v11948_v2, %v10634_v52  ;;  %v10645_v13 = vsel %vm11955_vm5, %v11954_v5, %v11953_v21  ;;  %v11956_v18 = vmov %v11954_v5  ;;  %v4878_v30 = vmax.f32 %v4846_v58, %v11907_v20 }
 0x36f   : > { %v10653_v49 = vsel %vm11958_vm10, %v11957_v54, %v11956_v18  ;;  %v4276_v60 = vsel %vm11960_vm13, %v10645_v13, -3e+38  ;;  %vm11963_vm2 = vnez %v11962_v50  ;;  %v11966_v28 = vpack.c.bf16 %v11964_v26, %v11965_v23  ;;  %v11979_v50 = vld [vmem:[#allocation53_spill] sm:$0xff]  ;;  %vm12007_vm10 = vmmov %vm11971_vm9 }
 0x370   : > { %v4307_v55 = vmax.f32 %v11961_v22, %v10653_v49  ;;  %v4308_v40 = vmax.f32 %v4180_v33, %v4276_v60  ;;  %v4401_v27 = vsel %vm11963_vm2, %v11925_v45, -3e+38  ;;  %v4815_v57 = vmax.f32 %v4687_v46, %v10601_v53  ;;  %v11967_v33 = vld [vmem:[#allocation81_spill] sm:$0xff] }
 0x371   : > { %5728 = vmatprep.subr.bf16.mxu0 %v11966_v28  ;;  %v4816_v3 = vmax.f32 %v4688_v39, %v4784_v6  ;;  %v4433_v21 = vmax.f32 %v4305_v63, %v4401_v27  ;;  %v4434_v9 = vmax.f32 %v4306_v37, %v10524_v14  ;;  %v5729_v5 = vpack.c.bf16 %v4878_v30, %v4877_v44  ;;  %v11968_v37 = vld [vmem:[#allocation80_spill] sm:$0xff] }
 0x372   : > { %v4530_v58 = vsel %vm11941_vm11, %v10532_v61, -3e+38  ;;  %v4657_v18 = vsel %vm11963_vm2, %v11967_v33, -3e+38  ;;  %v4786_v45 = vsel %vm11941_vm11, %v10645_v13, -3e+38  ;;  %v4847_v54 = vmax.f32 %v4815_v57, %v11873_v31  ;;  %vm11997_vm11 = vmmov %vm11977_vm1 }
 0x373   : > { %v4848_v6 = vmax.f32 %v4816_v3, %v11885_v17  ;;  %v4561_v63 = vmax.f32 %v4433_v21, %v10540_v12  ;;  %v4562_v14 = vmax.f32 %v4434_v9, %v4530_v58  ;;  %5730 = vmatpush1.bf16.msra.mxu0 %v5729_v5  ;;  %v11969_v44 = vrot.slane %v11968_v37, 7  ;;  %v11980_v27 = vld [vmem:[#allocation52_spill] sm:$0xff]  ;;  %v11982_v9 = vld [vmem:[#allocation30_spill] sm:$0xff]  ;;  %vm12017_vm2 = vmmov %vm11977_vm1 }
 0x374   : > { %v11970_v61 = vrot.slane %v11952_v56, 7  ;;  %v11972_v39 = vrot.slane %v10085_v11, 1  ;;  %v11973_v51 = vrot.slane %v11968_v37, 1  ;;  %v11976_v12 = vrot.slane %v11952_v56, 1 }
 0x375   : > { %v4403_v22 = vsel %vm11797_vm12, %v11944_v24, -3e+38  ;;  %v11981_v26 = vpack.c.bf16 %v11979_v50, %v11980_v27  ;;  %v4879_v23 = vmax.f32 %v4847_v54, %v11911_v43  ;;  %v4880_v28 = vmax.f32 %v4848_v6, %v11926_v48  ;;  %v11984_v24 = vld [vmem:[#allocation85_spill] sm:$0xff] }
 0x376   : > { %v10689_v46 = vsel %vm11971_vm9, %v11970_v61, %v11969_v44  ;;  %v10697_v31 = vsel %vm11974_vm3, %v11973_v51, %v11972_v39  ;;  %v11975_v17 = vmov %v11973_v51  ;;  %v4689_v57 = vmax.f32 %v4561_v63, %v4657_v18  ;;  %v11985_v51 = vld [vmem:[#allocation84_spill] sm:$0xff] }
 0x377   : > { %v10705_v60 = vsel %vm11977_vm1, %v11976_v12, %v11975_v17  ;;  %5732 = vmatprep.subr.bf16.mxu0 %v11981_v26  ;;  %v4690_v3 = vmax.f32 %v4562_v14, %v10634_v52  ;;  %v4182_v21 = vmax.f32 %v11968_v37, %v10689_v46  ;;  %vm11983_vm0 = vnez %v11982_v9  ;;  %v12011_v9 = vld [vmem:[#allocation90_spill] sm:$0xff] }
 0x378   : > { %v4278_v5 = vsel %vm11983_vm0, %v10697_v31, -3e+38  ;;  %v4309_v58 = vmax.f32 %v11984_v24, %v10705_v60  ;;  %v4435_v44 = vmax.f32 %v4307_v55, %v4403_v22  ;;  %v5733_v61 = vpack.c.bf16 %v4880_v28, %v4879_v23 }
 0x379   : > { %v4817_v39 = vmax.f32 %v4689_v57, %v10653_v49  ;;  %v4818_v54 = vmax.f32 %v4690_v3, %v4786_v45  ;;  %v4436_v6 = vmax.f32 %v4308_v40, %v10578_v38  ;;  %v4310_v18 = vmax.f32 %v4182_v21, %v4278_v5  ;;  %v11986_v40 = vld [vmem:[#allocation56_spill] sm:$0xff]  ;;  %v11987_v45 = vld [vmem:[#allocation55_spill] sm:$0xff] }
 0x37a   : > { %v4532_v63 = vsel %vm11960_vm13, %v10589_v35, -3e+38  ;;  %v4563_v14 = vmax.f32 %v4435_v44, %v10601_v53  ;;  %v4659_v17 = vsel %vm11797_vm12, %v11985_v51, -3e+38  ;;  %5734 = vmatpush1.bf16.msra.mxu0 %v5733_v61  ;;  %v4788_v38 = vsel %vm11960_vm13, %v10697_v31, -3e+38  ;;  %vm11991_vm12 = vmmov %vm11951_vm8 }
 0x37b   : > { %v4849_v55 = vmax.f32 %v4817_v39, %v11889_v8  ;;  %v4850_v12 = vmax.f32 %v4818_v54, %v11907_v20  ;;  %v4564_v22 = vmax.f32 %v4436_v6, %v4532_v63  ;;  %v11988_v50 = vpack.c.bf16 %v11986_v40, %v11987_v45  ;;  %v11998_v44 = vld [vmem:[#allocation32_spill] sm:$0xff]  ;;  %v12001_v6 = vld [vmem:[#allocation29_spill] sm:$0xff]  ;;  %vm12014_vm13 = vmmov %vm11977_vm1 }
 0x37c   : > { %v4691_v35 = vmax.f32 %v4563_v14, %v4659_v17  ;;  %v11989_v53 = vrot.slane %v10069_v19, 7  ;;  %v11990_v30 = vrot.slane %v10085_v11, 7  ;;  %v11992_v8 = vrot.slane %v10130_v34, 1  ;;  %v12000_v39 = vld [vmem:[#allocation16_spill] sm:$0xff]  ;;  %vm12027_vm1 = vmmov %vm12007_vm10 }
 0x37d   : > { %5736 = vmatprep.subr.bf16.mxu0 %v11988_v50  ;;  %v11993_v20 = vrot.slane %v10069_v19, 1  ;;  %v11996_v23 = vrot.slane %v10085_v11, 1  ;;  %v4881_v57 = vmax.f32 %v4849_v55, %v11930_v36  ;;  %v4882_v3 = vmax.f32 %v4850_v12, %v11948_v2  ;;  %v12003_v50 = vld [vmem:[#allocation87_spill] sm:$0xff] }
 0x37e   : > { %v10746_v27 = vsel %vm11991_vm12, %v11990_v30, %v11989_v53  ;;  %v4692_v21 = vmax.f32 %v4564_v22, %v10689_v46  ;;  %v4819_v24 = vmax.f32 %v4691_v35, %v10705_v60  ;;  %vm11999_vm8 = vnez %v11998_v44  ;;  %v12009_v30 = vld [vmem:[#allocation57_spill] sm:$0xff] }
 0x37f   : > { %v10754_v16 = vsel %vm11994_vm4, %v11993_v20, %v11992_v8  ;;  %v11995_v26 = vmov %v11993_v20  ;;  %v4184_v5 = vmax.f32 %v10069_v19, %v10746_v27  ;;  %vm12002_vm5 = vnez %v12001_v6 }
 0x380   : > { %v10762_v28 = vsel %vm11997_vm11, %v11996_v23, %v11995_v26  ;;  %v4280_v61 = vsel %vm11999_vm8, %v10754_v16, -3e+38  ;;  %v4405_v63 = vsel %vm12002_vm5, %v11967_v33, -3e+38  ;;  %v5737_v14 = vpack.c.bf16 %v4882_v3, %v4881_v57  ;;  %vm12040_vm11 = vmmov %vm12027_vm1 }
 0x381   : > { %v4311_v54 = vmax.f32 %v12000_v39, %v10762_v28  ;;  %v4820_v17 = vmax.f32 %v4692_v21, %v4788_v38  ;;  %v4312_v55 = vmax.f32 %v4184_v5, %v4280_v61  ;;  %v4437_v12 = vmax.f32 %v4309_v58, %v4405_v63  ;;  %v12018_v39 = vld [vmem:[#allocation34_spill] sm:$0xff] }
 0x382   : > { %v4851_v22 = vmax.f32 %v4819_v24, %v11911_v43  ;;  %v4438_v40 = vmax.f32 %v4310_v18, %v10634_v52  ;;  %v4534_v45 = vsel %vm11983_vm0, %v10645_v13, -3e+38  ;;  %v4661_v35 = vsel %vm12002_vm5, %v12003_v50, -3e+38  ;;  %5738 = vmatpush1.bf16.msra.mxu0 %v5737_v14  ;;  %v12004_v43 = vld [vmem:[#allocation86_spill] sm:$0xff]  ;;  %v12020_v14 = vld [vmem:[#allocation91_spill] sm:$0xff] }
 0x383   : > { %v4852_v53 = vmax.f32 %v4820_v17, %v11926_v48  ;;  %v4565_v33 = vmax.f32 %v4437_v12, %v10653_v49  ;;  %v4790_v58 = vsel %vm11983_vm0, %v10754_v16, -3e+38  ;;  %v12005_v38 = vrot.slane %v12004_v43, 7  ;;  %v12008_v18 = vld [vmem:[#allocation58_spill] sm:$0xff]  ;;  %vm12034_vm0 = vmmov %vm12017_vm2 }
 0x384   : > { %v12006_v52 = vrot.slane %v10130_v34, 7  ;;  %v12010_v8 = vpack.c.bf16 %v12008_v18, %v12009_v30  ;;  %v4883_v48 = vmax.f32 %v4851_v22, %v11952_v56  ;;  %v4566_v20 = vmax.f32 %v4438_v40, %v4534_v45  ;;  %v12021_v22 = vld [vmem:[#allocation31_spill] sm:$0xff]  ;;  %v12023_v18 = vld [vmem:[#allocation89_spill] sm:$0xff] }
 0x385   : > { %v12012_v26 = vrot.slane %v12011_v9, 1  ;;  %v12013_v23 = vrot.slane %v12004_v43, 1  ;;  %v4884_v3 = vmax.f32 %v4852_v53, %v11968_v37  ;;  %v4693_v21 = vmax.f32 %v4565_v33, %v4661_v35 }
 0x386   : > { %v10797_v13 = vsel %vm12007_vm10, %v12006_v52, %v12005_v38  ;;  %5740 = vmatprep.subr.bf16.mxu0 %v12010_v8  ;;  %v12016_v24 = vrot.slane %v10130_v34, 1  ;;  %vm12019_vm9 = vnez %v12018_v39  ;;  %v4694_v63 = vmax.f32 %v4566_v20, %v10746_v27  ;;  %v12024_v20 = vld [vmem:[#allocation88_spill] sm:$0xff] }
 0x387   : > { %v4186_v49 = vmax.f32 %v12004_v43, %v10797_v13  ;;  %v4230_v57 = vsel %vm12014_vm13, %v12013_v23, %v12012_v26  ;;  %v12015_v5 = vmov %v12013_v23  ;;  %vm12022_vm3 = vnez %v12021_v22  ;;  %v12037_v22 = vld [vmem:[#allocation36_spill] sm:$0xff] }
 0x388   : > { %v10818_v61 = vsel %vm12017_vm2, %v12016_v24, %v12015_v5  ;;  %v4282_v6 = vsel %vm12019_vm9, %v4230_v57, -3e+38  ;;  %v4407_v40 = vsel %vm12022_vm3, %v11985_v51, -3e+38  ;;  %v5741_v45 = vpack.c.bf16 %v4884_v3, %v4883_v48  ;;  %v12031_v3 = vld [vmem:[#allocation94_spill] sm:$0xff]  ;;  %v12035_v5 = vld [vmem:[#allocation33_spill] sm:$0xff] }
 0x389   : > { %v4313_v17 = vmax.f32 %v12020_v14, %v10818_v61  ;;  %v4314_v12 = vmax.f32 %v4186_v49, %v4282_v6  ;;  %v4821_v35 = vmax.f32 %v4693_v21, %v10762_v28  ;;  %v4439_v53 = vmax.f32 %v4311_v54, %v4407_v40  ;;  %v12029_v49 = vld [vmem:[#allocation59_spill] sm:$0xff] }
 0x38a   : > { %v4440_v33 = vmax.f32 %v4312_v55, %v10689_v46  ;;  %v4822_v38 = vmax.f32 %v4694_v63, %v4790_v58  ;;  %v4536_v52 = vsel %vm11999_vm8, %v10697_v31, -3e+38  ;;  %v4663_v30 = vsel %vm12022_vm3, %v12023_v18, -3e+38  ;;  %5742 = vmatpush1.bf16.msra.mxu0 %v5741_v45  ;;  %v12028_v58 = vld [vmem:[#allocation60_spill] sm:$0xff] }
 0x38b   : > { %v4792_v8 = vsel %vm11999_vm8, %v4230_v57, -3e+38  ;;  %v4853_v51 = vmax.f32 %v4821_v35, %v11930_v36  ;;  %v4567_v48 = vmax.f32 %v4439_v53, %v10705_v60  ;;  %v12025_v46 = vrot.slane %v12024_v20, 7  ;;  %vm12041_vm8 = vmmov %vm12034_vm0 }
 0x38c   : > { %v4568_v54 = vmax.f32 %v4440_v33, %v4536_v52  ;;  %v12026_v55 = vrot.slane %v12011_v9, 7  ;;  %v12030_v26 = vpack.c.bf16 %v12028_v58, %v12029_v49  ;;  %v4854_v44 = vmax.f32 %v4822_v38, %v11948_v2  ;;  %v12039_v33 = vld [vmem:[#allocation40_spill] sm:$0xff]  ;;  %v12044_v58 = vld [vmem:[#allocation95_spill] sm:$0xff] }
 0x38d   : > { %v12032_v36 = vrot.slane %v12031_v3, 1  ;;  %v12033_v60 = vrot.slane %v12024_v20, 1  ;;  %vm12036_vm12 = vnez %v12035_v5  ;;  %v4885_v6 = vmax.f32 %v4853_v51, %v10085_v11 }
 0x38e   : > { %v4101_v31 = vsel %vm12027_vm1, %v12026_v55, %v12025_v46  ;;  %5744 = vmatprep.subr.bf16.mxu0 %v12030_v26  ;;  %v4409_v24 = vsel %vm12036_vm12, %v12003_v50, -3e+38  ;;  %v4695_v63 = vmax.f32 %v4567_v48, %v4663_v30  ;;  %v4696_v14 = vmax.f32 %v4568_v54, %v10797_v13  ;;  %v12042_v54 = vld [vmem:[#allocation93_spill] sm:$0xff] }
 0x38f   : > { %v4188_v23 = vmax.f32 %v12024_v20, %v4101_v31  ;;  %v4228_v21 = vsel %vm12034_vm0, %v12033_v60, %v12032_v36  ;;  %vm12038_vm4 = vnez %v12037_v22  ;;  %v4886_v40 = vmax.f32 %v4854_v44, %v10069_v19  ;;  %v12047_v26 = vld [vmem:[#allocation61_spill] sm:$0xff] }
 0x390   : > { %v4284_v2 = vsel %vm12038_vm4, %v4228_v21, -3e+38  ;;  %v4441_v35 = vmax.f32 %v4313_v17, %v4409_v24  ;;  %v4442_v53 = vmax.f32 %v4314_v12, %v10746_v27  ;;  %v10870_v38 = vsel %vm12040_vm11, %v10265_v1, %v12039_v33 }
 0x391   : > { %v4316_v45 = vmax.f32 %v4188_v23, %v4284_v2  ;;  %v4823_v50 = vmax.f32 %v4695_v63, %v10818_v61  ;;  %v4824_v52 = vmax.f32 %v4696_v14, %v4792_v8  ;;  %v4538_v30 = vsel %vm12019_vm9, %v10754_v16, -3e+38  ;;  %v5883_v14 = vld [vmem:[%s6117_s22 + $0xd0] sm:$0xff]  ;;  %v5884_v2 = vld [vmem:[%s6117_s22 + $0xd8] sm:$0xff] }
 0x392   : > { %v10880_v17 = vsel %vm12041_vm8, %v10268_v7, %v9568_v42  ;;  %v5745_v27 = vpack.c.bf16 %v4886_v40, %v4885_v6  ;;  %v4569_v12 = vmax.f32 %v4441_v35, %v10762_v28  ;;  %v4570_v51 = vmax.f32 %v4442_v53, %v4538_v30  ;;  %v12057_v16 = vld [vmem:[#allocation100_spill] sm:$0xff] }
 0x393   : > { %v4855_v1 = vmax.f32 %v4823_v50, %v11952_v56  ;;  %v4856_v48 = vmax.f32 %v4824_v52, %v11968_v37  ;;  %v4665_v8 = vsel %vm12036_vm12, %v12042_v54, -3e+38  ;;  %v4411_v46 = vsel %vm11836_vm7, %v12023_v18, -3e+38  ;;  %v12046_v37 = vld [vmem:[#allocation62_spill] sm:$0xff] }
 0x394   : > { %5746 = vmatpush1.bf16.msra.mxu0 %v5745_v27  ;;  %v4697_v7 = vmax.f32 %v4569_v12, %v4665_v8  ;;  %v4698_v55 = vmax.f32 %v4570_v51, %v4101_v31  ;;  %v12045_v28 = vmax.f32 %v12044_v58, %v10220_v15  ;;  %v4444_v56 = vmax.f32 %v4316_v45, %v10797_v13  ;;  %v12056_v54 = vld [vmem:[#allocation98_spill] sm:$0xff] }
 0x395   : > { %v12048_v44 = vpack.c.bf16 %v12046_v37, %v12047_v26  ;;  %v4887_v23 = vmax.f32 %v4855_v1, %v10130_v34  ;;  %v4888_v36 = vmax.f32 %v4856_v48, %v12004_v43  ;;  %v4794_v18 = vsel %vm12019_vm9, %v4228_v21, -3e+38  ;;  %v12060_v37 = vld [vmem:[#allocation63_spill] sm:$0xff] }
 0x396   : > { %v4443_v49 = vmax.f32 %v12045_v28, %v4411_v46  ;;  %v4540_v60 = vsel %vm12038_vm4, %v4230_v57, -3e+38  ;;  %v4825_v5 = vmax.f32 %v4697_v7, %v10220_v15  ;;  %v4826_v24 = vmax.f32 %v4698_v55, %v4794_v18  ;;  %v5029_v55 = vld [vmem:[%s11125_s10 + $0x18] sm:$0xff]  ;;  %v12058_v28 = vld [vmem:[#allocation92_spill] sm:$0xff] }
 0x397   : > { %5748 = vmatprep.subr.bf16.mxu0 %v12048_v44  ;;  %v4572_v13 = vmax.f32 %v4444_v56, %v4540_v60  ;;  %v5749_v63 = vpack.c.bf16 %v4888_v36, %v4887_v23  ;;  %v5755_v40 = vpack.c.bf16 %v5884_v2, %v5883_v14  ;;  %v4667_v45 = vsel %vm11836_vm7, %v10256_v0, -3e+38  ;;  %vm12053_vm7 = vmmov %vm12034_vm0  ;;  %v5885_v44 = vld [vmem:[%s6117_s22 + $0xe8] sm:$0xff]  ;;  %v5886_v23 = vld [vmem:[%s6117_s22 + $0xe0] sm:$0xff] }
 0x398   : > { %v4571_v6 = vmax.f32 %v4443_v49, %v10818_v61  ;;  %v4446_v39 = vmax.f32 %v10332_v25, %v4101_v31  ;;  %v4857_v35 = vmax.f32 %v4825_v5, %v10085_v11  ;;  %v4858_v57 = vmax.f32 %v4826_v24, %v10069_v19  ;;  %v12049_v11 = vld [vmem:[#allocation12_spill] sm:$0xff]  ;;  %v5030_v2 = vld [vmem:[%s11125_s10 + $0x20] sm:$0xff] }
 0x399   : > { %v4700_v15 = vmax.f32 %v4572_v13, %v10250_v32  ;;  %5750 = vmatpush1.bf16.msra.mxu0 %v5749_v63  ;;  %v4796_v61 = vsel %vm12038_vm4, %v10320_v59, -3e+38  ;;  %v4542_v50 = vsel %vm11851_vm6, %v4228_v21, -3e+38  ;;  %v4798_v0 = vsel %vm11851_vm6, %v10880_v17, -3e+38  ;;  %vm12061_vm6 = vmmov %vm12034_vm0 }
 0x39a   : > { %v4699_v53 = vmax.f32 %v4571_v6, %v4667_v45  ;;  %v4829_v25 = vmax.f32 %v10342_v41, %v10313_v62  ;;  %v12050_v19 = vld [vmem:[#allocation64_spill] sm:$0xff]  ;;  %v4889_v52 = vmax.f32 %v4857_v35, %v12011_v9  ;;  %v4890_v30 = vmax.f32 %v4858_v57, %v12024_v20 }
 0x39b   : > { %v12051_v31 = vpack.c.bf16 %v12049_v11, %v12050_v19  ;;  %v4828_v22 = vmax.f32 %v4700_v15, %v4796_v61  ;;  %v4574_v27 = vmax.f32 %v4446_v39, %v4542_v50  ;;  %v4448_v47 = vmax.f32 %v10330_v29, %v10250_v32  ;;  %v12052_v17 = vld [vmem:[#allocation96_spill] sm:$0xff]  ;;  %v12055_v32 = vld [vmem:[#allocation99_spill] sm:$0xff] }
 0x39c   : > { %v4827_v59 = vmax.f32 %v4699_v53, %v10283_v4  ;;  %v4861_v21 = vmax.f32 %v4829_v25, %v12011_v9  ;;  %v4512_v41 = vsel %vm12053_vm7, %v12052_v17, %v9568_v42  ;;  %v5753_v62 = vpack.c.bf16 %v4890_v30, %v4889_v52  ;;  %v5026_v9 = vld [vmem:[%s11125_s10] sm:$0xff]  ;;  %v5888_v35 = vld [vmem:[%s6117_s22 + $0xf0] sm:$0xff]  ;;  %v4900_v25 = vld [vmem:[%s11116_s1 + $0x18] sm:$0xff] }
 0x39d   : > { %5752 = vmatprep.subr.bf16.mxu0 %v12051_v31  ;;  %v4860_v51 = vmax.f32 %v4828_v22, %v12004_v43  ;;  %v4544_v48 = vsel %vm11677_vm14, %v4512_v41, -3e+38  ;;  %v4702_v29 = vmax.f32 %v4574_v27, %v12055_v32  ;;  %v4575_v46 = vmax.f32 %v12057_v16, %v10283_v4  ;;  %v5028_v43 = vld [vmem:[%s11125_s10 + $0x10] sm:$0xff]  ;;  %v4902_v19 = vld [vmem:[%s11116_s1 + $0x28] sm:$0xff]  ;;  %v4901_v31 = vld [vmem:[%s11116_s1 + $0x20] sm:$0xff] }
 0x39e   : > { %v4859_v12 = vmax.f32 %v4827_v59, %v10130_v34  ;;  %v4893_v8 = vmax.f32 %v4861_v21, %v12056_v54  ;;  %v4576_v7 = vmax.f32 %v4448_v47, %v4544_v48  ;;  %v5027_v34 = vld [vmem:[%s11125_s10 + $0x8] sm:$0xff]  ;;  %5754 = vmatpush1.bf16.msra.mxu0 %v5753_v62  ;;  %v4671_v56 = vsel %vm11670_vm15, %v10870_v38, -3e+38  ;;  %v4899_v11 = vld [vmem:[%s11116_s1 + $0x10] sm:$0xff]  ;;  %v4904_v52 = vld [vmem:[%s11116_s1 + $0x38] sm:$0xff] }
 0x39f   : > { %v4892_v49 = vmax.f32 %v4860_v51, %v12058_v28  ;;  %v4768_v26 = vsel %vm12061_vm6, %v9568_v42, %v12060_v37  ;;  %5756 = vmatprep.subr.bf16.mxu0 %v5755_v40  ;;  %v5759_v36 = vpack.c.bf16 %v5885_v44, %v5886_v23  ;;  %v4830_v18 = vmax.f32 %v4702_v29, %v4798_v0  ;;  %v12062_v40 = vld [vmem:[#allocation97_spill] sm:$0xff]  ;;  %v4903_v30 = vld [vmem:[%s11116_s1 + $0x30] sm:$0xff]  ;;  %v4906_v59 = vld [vmem:[%s11116_s1 + $0x48] sm:$0xff] }
 0x3a0   : > { %v4891_v58 = vmax.f32 %v4859_v12, %v12031_v3  ;;  %v4703_v60 = vmax.f32 %v4575_v46, %v4671_v56  ;;  %v4704_v5 = vmax.f32 %v4576_v7, %v12039_v33  ;;  %v4800_v6 = vsel %vm11677_vm14, %v4768_v26, -3e+38  ;;  %v5031_v33 = vld [vmem:[%s11125_s10 + $0x28] sm:$0xff]  ;;  %v4905_v22 = vld [vmem:[%s11116_s1 + $0x40] sm:$0xff]  ;;  %v4908_v27 = vld [vmem:[%s11116_s1 + $0x58] sm:$0xff] }
 0x3a1   : > { %v5767_v38 = vpack.c.bf16 %v5027_v34, %v5026_v9  ;;  %v5771_v13 = vpack.c.bf16 %v5029_v55, %v5028_v43  ;;  %v4862_v63 = vmax.f32 %v4830_v18, %v12024_v20  ;;  %v5775_v53 = vpack.c.bf16 %v5031_v33, %v5030_v2  ;;  %v4907_v21 = vld [vmem:[%s11116_s1 + $0x50] sm:$0xff]  ;;  %v4910_v47 = vld [vmem:[%s11116_s1 + $0x68] sm:$0xff]  ;;  %v4909_v17 = vld [vmem:[%s11116_s1 + $0x60] sm:$0xff] }
 0x3a2   : > { %v5757_v24 = vpack.c.bf16 %v4892_v49, %v4891_v58  ;;  %v4831_v10 = vmax.f32 %v4703_v60, %v9568_v42  ;;  %v4832_v14 = vmax.f32 %v4704_v5, %v4800_v6  ;;  %v5887_v42 = vld [vmem:[%s6117_s22 + $0xf8] sm:$0xff]  ;;  %v4911_v62 = vld [vmem:[%s11116_s1 + $0x70] sm:$0xff]  ;;  %vm12063_vm15 = vcmask 523264   ;;  %s431_s22 = sand.u32 1, %s5943_s26   ;;  %v5370_v56 = vld [vmem:[%s11126_s11] ss:$0 sm:$0xff] }
 0x3a3   : > { %5768 = vmatprep.subr.bf16.mxu1 %v5767_v38  ;;  %v4894_v45 = vmax.f32 %v4862_v63, %v12062_v40  ;;  %v5763_v57 = vpack.c.bf16 %v5887_v42, %v5888_v35  ;;  %v4912_v41 = vld [vmem:[%s11116_s1 + $0x78] sm:$0xff]  ;;  %v5032_v12 = vld [vmem:[%s11125_s10 + $0x30] sm:$0xff]  ;;  %vm12064_vm14 = vmmov %vm12063_vm15  ;;  %s5289_s24 = sshll.u32 %s431_s22, 6  ;;  %s11074_s23 = scalar_lea.sflag [#allocation6], %s431_s22 }
 0x3a4   : > { %5758 = vmatpush1.bf16.msra.mxu0 %v5757_v24  ;;  %v4863_v39 = vmax.f32 %v4831_v10, %v12031_v3  ;;  %v4864_v20 = vmax.f32 %v4832_v14, %v12058_v28  ;;  %5770 = vmatpush3.bf16.msra.mxu1 %v5767_v38  ;;  %v4897_v3 = vld [vmem:[%s11116_s1] sm:$0xff]  ;;  %v5033_v51 = vld [vmem:[%s11125_s10 + $0x38] sm:$0xff]  ;;  %vm12065_vm5 = vmmov %vm12064_vm14  ;;  %s11053_s30 = scalar_lea.vmem [#allocation5], %s5289_s24  ;;  %s5893_s24 = sshll.u32 %s5955_s27, 4  ;;  %s5894_s24 = int_to_ptr.vmem [resolvable:$false] %s5893_s24 }
 0x3a5   : > { %5760 = vmatprep.subr.bf16.mxu0 %v5759_v36  ;;  %5772 = vmatprep.subr.bf16.mxu1 %v5771_v13  ;;  %v5761_v15 = vpack.c.bf16 %v4894_v45, %v4893_v8  ;;  %v5779_v1 = vpack.c.bf16 %v5033_v51, %v5032_v12  ;;  %vm12066_vm10 = vmmov %vm12065_vm5  ;;  %v5371_v26 = vld [vmem:[%s11127_s12] ss:$0 sm:$0xff]  ;;  %s5223_s16 = sshll.u32 %s11053_s30, 4  ;;  %s5895_s15 = scalar_lea.vmem %s5894_s24, 2048  ;;  %s11068_s16 = int_to_ptr.vmem [resolvable:$true] %s5223_s16 }
 0x3a6   : > { %v4895_v61 = vmax.f32 %v4863_v39, -3e+38  ;;  %v4896_v50 = vmax.f32 %v4864_v20, -3e+38  ;;  %vm12067_vm13 = vmmov %vm12065_vm5  ;;  %s5889_s29 = scalar_lea.vmem %s11068_s16, 1024  ;;  %p5896_p0 = scmp.lt.s32.totalorder %s11068_s16, %s5894_s24 }
 0x3a7   : > { %vm12068_vm2 = vmmov %vm12065_vm5  ;;  %p5890_p11 = scmp.ne.s32.totalorder %s11068_s16, %s5889_s29  ;;  %p5897_p1 = scmp.lt.s32.totalorder %s5895_s15, %s5889_s29 }
 0x3a8   : > { %5762 = vmatpush1.bf16.msra.mxu0 %v5761_v15  ;;  %v5765_v0 = vpack.c.bf16 %v4896_v50, %v4895_v61  ;;  %5774 = vmatpush3.bf16.msra.mxu1 %v5771_v13  ;;  %vm12069_vm9 = vmmov %vm12068_vm2 }
 0x3a9   : > { %5764 = vmatprep.subr.bf16.mxu0 %v5763_v57  ;;  %5776 = vmatprep.subr.bf16.mxu1 %v5775_v53  ;;  %vm12070_vm3 = vmmov %vm12068_vm2  ;;  %p5891_p12 = pnand %p5890_p11, %p6066_p5  ;;  %p5898_p2 = por %p5897_p1, %p5896_p0 }
 0x3ab   : > { %p5892_p13 = pneg %p5891_p12 }
 0x3ac   : > { %5766 = vmatpush1.bf16.msra.mxu0 %v5765_v0  ;;  %5778 = vmatpush3.bf16.msra.mxu1 %v5775_v53 }
 0x3ad   : > { %5780 = vmatprep.subr.bf16.mxu1 %v5779_v1  ;;  %p5899_p3 = pnand %p5898_p2, %p5892_p13 }
 0x3af   : > { %4978 = vmatmul.mubr.f32.vlgmr.msra.gmra.mrb[32].mxu0 %v4897_v3 }
 0x3b0   : > { %4983 = vmatprep.mubr.f32.mxu0 %v4900_v25  ;;  %5782 = vmatpush3.bf16.msra.mxu1 %v5779_v1 }
 0x3b3   : > { %4984 = vmatmul.mubr.f32.gmra.mrb[34].mxu0 %v4899_v11 }
 0x3b4   : > { %4989 = vmatprep.mubr.f32.mxu0 %v4902_v19 }
 0x3b7   : > { %4990 = vmatmul.mubr.f32.gmra.mrb[36].mxu0 %v4901_v31 }
 0x3b8   : > { %4995 = vmatprep.mubr.f32.mxu0 %v4904_v52 }
 0x3bb   : > { %4996 = vmatmul.mubr.f32.gmra.mrb[38].mxu0 %v4903_v30 }
 0x3bc   : > { %5001 = vmatprep.mubr.f32.mxu0 %v4906_v59 }
 0x3bf   : > { %5002 = vmatmul.mubr.f32.gmra.mrb[40].mxu0 %v4905_v22 }
 0x3c0   : > { %5007 = vmatprep.mubr.f32.mxu0 %v4908_v27 }
 0x3c3   : > { %5008 = vmatmul.mubr.f32.gmra.mrb[42].mxu0 %v4907_v21 }
 0x3c4   : > { %5013 = vmatprep.mubr.f32.mxu0 %v4910_v47 }
 0x3c7   : > { %5014 = vmatmul.mubr.f32.gmra.mrb[44].mxu0 %v4909_v17 }
 0x3c8   : > { %5019 = vmatprep.mubr.f32.mxu0 %v4912_v41 }
 0x3cb   : > { %5020 = vmatmul.mubr.f32.gmra.mrb[46].mxu0 %v4911_v62 }
 0x482   : > { %v4979_v48 = vpop.f32.mrb[32].mxu0 }
 0x483   : > { %v4981_v9 = vpop.f32.mrb[33].mxu0 }
 0x484   : > { %5643 = vmatprep.mubr.msk.f32.mxu1 %vm12063_vm15, %v4981_v9 }
 0x486   : > { %v4985_v32 = vpop.f32.mrb[34].mxu0 }
 0x487   : > { %v4987_v29 = vpop.f32.mrb[35].mxu0 }
 0x488   : > { %5644 = vmatmul.mubr.msk.f32.vlgmr.msra.gmra.mrb[32].mxu1 %vm12064_vm14, %v4987_v29 }
 0x48a   : > { %v4991_v54 = vpop.f32.mrb[36].mxu0 }
 0x48b   : > { %v4993_v8 = vpop.f32.mrb[37].mxu0 }
 0x48c   : > { %5646 = vmatprep.mubr.msk.f32.mxu1 %vm12065_vm5, %v4993_v8 }
 0x48e   : > { %v4997_v16 = vpop.f32.mrb[38].mxu0 }
 0x48f   : > { %v4999_v46 = vpop.f32.mrb[39].mxu0 }
 0x490   : > { %5647 = vmatmul.mubr.msk.f32.gmra.mrb[34].mxu1 %vm12066_vm10, %v4999_v46 }
 0x492   : > { %v5003_v7 = vpop.f32.mrb[40].mxu0 }
 0x493   : > { %v5005_v34 = vpop.f32.mrb[41].mxu0 }
 0x494   : > { %5649 = vmatprep.mubr.msk.f32.mxu1 %vm12067_vm13, %v5005_v34 }
 0x496   : > { %v5009_v43 = vpop.f32.mrb[42].mxu0 }
 0x497   : > { %v5011_v55 = vpop.f32.mrb[43].mxu0 }
 0x498   : > { %5650 = vmatmul.mubr.msk.f32.gmra.mrb[36].mxu1 %vm12068_vm2, %v5011_v55 }
 0x49a   : > { %v5015_v58 = vpop.f32.mrb[44].mxu0 }
 0x49b   : > { %v5017_v28 = vpop.f32.mrb[45].mxu0 }
 0x49c   : > { %5652 = vmatprep.mubr.msk.f32.mxu1 %vm12069_vm9, %v5017_v28 }
 0x49e   : > { %v5021_v49 = vpop.f32.mrb[46].mxu0 }
 0x49f   : > { %v5023_v4 = vpop.f32.mrb[47].mxu0 }
 0x4a0   : > { %5653 = vmatmul.mubr.msk.f32.gmra.mrb[38].mxu1 %vm12070_vm3, %v5023_v4 }
 0x55b   : > { %v5645_v37 = vpop.f32.mrb[32].mxu1 }
 0x55c   : > { %v5171_v44 = vmul.f32 %v5645_v37, %v5370_v56  ;;  %v5124_v23 = vpop.f32.mrb[33].mxu1 }
 0x55d   : > { %v5170_v36 = vmul.f32 %v5370_v56, %v5124_v23 }
 0x55e   : > { %v5186_v18 = vadd.f32 %v5371_v26, %v5171_v44 }
 0x55f   : > { %v5185_v60 = vadd.f32 %v5371_v26, %v5170_v36 }
 0x560   : > { %v5194_v5 = vadd.f32 %v5186_v18, %v4985_v32 }
 0x561   : > { %v5193_v24 = vadd.f32 %v5185_v60, %v4979_v48 }
 0x562   : > { %5202 = vst [vmem:[%s11053_s30 + $0x8] sm:$0xff] %v5194_v5 }
 0x563   : > { %5201 = vst [vmem:[%s11053_s30] sm:$0xff] %v5193_v24  ;;  %v5648_v6 = vpop.f32.mrb[34].mxu1 }
 0x564   : > { %v5173_v38 = vmul.f32 %v5648_v6, %v5370_v56  ;;  %v5134_v13 = vpop.f32.mrb[35].mxu1 }
 0x565   : > { %v5172_v63 = vmul.f32 %v5370_v56, %v5134_v13 }
 0x566   : > { %v5188_v10 = vadd.f32 %v5371_v26, %v5173_v38 }
 0x567   : > { %v5187_v14 = vadd.f32 %v5371_v26, %v5172_v63 }
 0x568   : > { %v5196_v2 = vadd.f32 %v5188_v10, %v4997_v16 }
 0x569   : > { %v5195_v33 = vadd.f32 %v5187_v14, %v4991_v54 }
 0x56a   : > { %5204 = vst [vmem:[%s11053_s30 + $0x18] sm:$0xff] %v5196_v2 }
 0x56b   : > { %5203 = vst [vmem:[%s11053_s30 + $0x10] sm:$0xff] %v5195_v33  ;;  %v5651_v40 = vpop.f32.mrb[36].mxu1 }
 0x56c   : > { %v5175_v45 = vmul.f32 %v5651_v40, %v5370_v56  ;;  %v5144_v39 = vpop.f32.mrb[37].mxu1 }
 0x56d   : > { %v5174_v20 = vmul.f32 %v5370_v56, %v5144_v39 }
 0x56e   : > { %v5190_v42 = vadd.f32 %v5371_v26, %v5175_v45 }
 0x56f   : > { %v5189_v35 = vadd.f32 %v5371_v26, %v5174_v20 }
 0x570   : > { %v5198_v57 = vadd.f32 %v5190_v42, %v5009_v43 }
 0x571   : > { %v5197_v53 = vadd.f32 %v5189_v35, %v5003_v7 }
 0x572   : > { %5206 = vst [vmem:[%s11053_s30 + $0x28] sm:$0xff] %v5198_v57 }
 0x573   : > { %5205 = vst [vmem:[%s11053_s30 + $0x20] sm:$0xff] %v5197_v53  ;;  %v5654_v15 = vpop.f32.mrb[38].mxu1 }
 0x574   : > { %v5177_v61 = vmul.f32 %v5654_v15, %v5370_v56  ;;  %v5154_v50 = vpop.f32.mrb[39].mxu1 }
 0x575   : > { %v5176_v0 = vmul.f32 %v5370_v56, %v5154_v50 }
 0x576   : > { %v5192_v3 = vadd.f32 %v5371_v26, %v5177_v61 }
 0x577   : > { %v5191_v25 = vadd.f32 %v5371_v26, %v5176_v0 }
 0x578   : > { %v5200_v11 = vadd.f32 %v5192_v3, %v5021_v49 }
 0x579   : > { %v5199_v19 = vadd.f32 %v5191_v25, %v5015_v58 }
 0x57a   : > { %5208 = vst [vmem:[%s11053_s30 + $0x38] sm:$0xff] %v5200_v11 }
 0x57b   : > { %5207 = vst [vmem:[%s11053_s30 + $0x30] sm:$0xff] %v5199_v19 }
 0x57c   : > { %5902 = shalt.err (!%p5899_p3)
}
 0x57d   : > { %s5903_s22 = scalar_lea.hbm %s11066_s17, 1024  ;;  %s5907_s21 = scalar_lea.hbm %s11128_s13, 2048 }
 0x57e   : > { %p5904_p4 = scmp.ne.s32.totalorder %s11066_s17, %s5903_s22  ;;  %p5908_p9 = scmp.lt.u32.totalorder %s11066_s17, %s11128_s13 }
 0x57f   : > { %p5909_p10 = scmp.lt.u32.totalorder %s5907_s21, %s5903_s22  ;;  %p5911_p12 = scmp.lt.u32.totalorder %s5903_s22, %s11066_s17 }
 0x580   : > { %p5905_p7 = pnand %p5904_p4, %p6066_p5 }
 0x581   : > { %p5910_p11 = por %p5909_p10, %p5908_p9 }
 0x582   : > { %p5906_p8 = pneg %p5905_p7 }
 0x583   : > { %p5912_p13 = por %p5911_p12, %p5910_p11 }
 0x585   : > { %p5913_p0 = pnand %p5912_p13, %p5906_p8 }
 0x587   : > { %5916 = shalt.err (!%p5913_p0)
}
 0x588   : > { %s5956_s29 = smov 128   ;;  %s5957_s15 = smov 8  }
 0x589   : > { %5783 = dma.vmem_to_hbm [thread:$0]  (%p6066_p5), %s11068_s16, 1024, %s11066_s17, %s11074_s23, %s5956_s29, %s5956_s29, %s5957_s15  }
 0x58a PF: > { %p5789_p1 = scmp.ge.s32.totalorder %s5951_s28, 2  ;;  %s5238_s30 = sand.u32 1, %s5939_s25  }
 0x58b   : > { %s5239_s22 = scalar_lea.sflag [#allocation6], %s5238_s30 }
 0x58c   : > { %p5786_p2 = pnand %p5789_p1, %p6070_p6 }
 0x58e   : > { %5934 = dma.done.wait (!%p5786_p2), %s5239_s22, 1024  }
 0x58f   : > { %5936 = vsyncadd (!%p5786_p2), %s5239_s22, 4294966272  ;;  %s12071_s20 = sld [smem:[#allocation8_spill]]  ;;  %s12072_s27 = sld [smem:[#allocation9_spill]] }
 0x590   : > { %p23_p3 = scmp.ge.s32.totalorder %s6053_s14, 4   ;;  %s12073_s25 = smov %s5943_s26 }
 0x591   : > { %s12075_s28 = smov %s6053_s14 }
 0x592   :  { %25 = sbr.rel (!%p23_p3) target bundleno = 3 (0x3), region = 123 }
 0x595   : > { %s12074_s26 = smov %s12071_s20 }
 0x599   :  { %5244 = vsyncpa [#allocation6], 1 }
 0x59a   :  { %5246 = vsyncpa [#allocation6 + $0x1], 1 }

</bundles_post_ra>
